<compile_context>
chip_gen: v7x
topology: tpu7x:2x2x1
jax: 0.10.0
libtpu: 0.0.40
codegen_flags: <defaults>
</compile_context>

<pallas_src>
import functools

import numpy as np

import jax
import jax.numpy as jnp
from jax import lax
from jax.experimental import pallas as pl
from jax.experimental.pallas import tpu as pltpu


# ----------------------------------------------------------------------------
# Fused Pallas kernel: entire RecurrentHourglass forward for one batch element
# ----------------------------------------------------------------------------
def _hourglass_kernel(*refs, n_levels, H, W, K, c_in, hid, emb):
    HW = H * W
    pad = K // 2

    # ---- unpack refs: masks, x, params..., output ----
    n_in = 2 + 4 * n_levels + 4
    masks_ref = refs[0]
    x_ref = refs[1]
    base = 2
    pre_w = refs[base:base + n_levels]
    pre_b = refs[base + n_levels:base + 2 * n_levels]
    post_w = refs[base + 2 * n_levels:base + 3 * n_levels]
    post_b = refs[base + 3 * n_levels:base + 4 * n_levels]
    wxf_ref, wgh_ref, wch_ref, bgru_ref = refs[base + 4 * n_levels:n_in]
    o_ref = refs[n_in]

    # Boundary masks for the K*K taps, loaded once and reused by every conv.
    masks = masks_ref[...]                                   # (K*K, HW) f32

    def conv(x2d, w_ref):
        """KxK 'same' conv in channels-first lane-dense layout.

        x2d: (Cin, HW) f32  ->  (Cout, HW) f32.
        Patch matrix built via XLU lane-rolls + boundary masks, then ONE MXU dot
        against the pre-flattened bf16 weight (Cout, K*K*Cin).
        """
        taps = []
        for dy in range(K):
            for dx in range(K):
                s = (dy - pad) * W + (dx - pad)              # flattened spatial offset
                if s == 0:
                    taps.append(x2d)                         # center tap: no roll, no mask
                else:
                    shifted = pltpu.roll(x2d, (-s) % HW, 1)  # shifted[i] = x[i + s]
                    t = dy * K + dx
                    taps.append(shifted * masks[t:t + 1, :])
        patch = jnp.concatenate(taps, axis=0).astype(jnp.bfloat16)   # (K*K*Cin, HW)
        return jnp.dot(w_ref[...], patch, preferred_element_type=jnp.float32)

    # ---- encoding: pre-conv + ConvGRU unroll ----
    x = x_ref[0].astype(jnp.float32)                         # (c_in, HW)
    skips = []
    hidden = None
    for i in range(n_levels):
        # pre conv + ReLU
        x = jnp.maximum(conv(x, pre_w[i]) + pre_b[i][...], 0.0)       # (hid, HW)

        # ConvGRU cell. x-path gate+candidate convs are fused (Cout = 3*hid), the
        # gate/candidate biases are folded into the same add.
        xc = conv(x, wxf_ref) + bgru_ref[...]                          # (3*hid, HW)
        if i == 0:
            # hidden == 0 exactly -> the hidden-path convs (no bias) are exactly zero.
            g = jax.nn.sigmoid(xc[:2 * hid])
            u = g[hid:]
            hidden = (1.0 - u) * jnp.tanh(xc[2 * hid:])
        else:
            g = jax.nn.sigmoid(xc[:2 * hid] + conv(hidden, wgh_ref))
            r, u = g[:hid], g[hid:]
            cand = jnp.tanh(xc[2 * hid:] + conv(r * hidden, wch_ref))
            hidden = u * hidden + (1.0 - u) * cand
        skips.append(hidden)

    # ---- decoding: post convs with skip adds fused into the conv input ----
    post = jnp.maximum(conv(skips[n_levels - 1], post_w[n_levels - 1])
                       + post_b[n_levels - 1][...], 0.0)
    for i in reversed(range(n_levels - 1)):
        post = jnp.maximum(conv(post + skips[i], post_w[i]) + post_b[i][...], 0.0)

    o_ref[...] = post.reshape(1, emb, HW).astype(o_ref.dtype)


# ----------------------------------------------------------------------------
# Wrapper: single pallas_call over the batch, lane-dense (channels-first) I/O
# ----------------------------------------------------------------------------
def _make_tap_masks(H, W, K):
    """(K*K, H*W) f32 masks: 1 where the shifted pixel for tap (dy,dx) is in-bounds."""
    pad = K // 2
    ys, xs = np.meshgrid(np.arange(H), np.arange(W), indexing="ij")
    m = np.zeros((K * K, H * W), np.float32)
    for dy in range(K):
        for dx in range(K):
            valid = ((ys + dy - pad >= 0) & (ys + dy - pad < H) &
                     (xs + dx - pad >= 0) & (xs + dx - pad < W))
            m[dy * K + dx] = valid.reshape(-1).astype(np.float32)
    return jnp.asarray(m)


def recurrent_hourglass_forward(x_nchw, params, n_levels):
    N, c_in, H, W_ = x_nchw.shape
    K = params["pre_w"][0].shape[0]
    hid = params["pre_w"][0].shape[-1]
    emb = params["post_w"][0].shape[-1]
    HW = H * W_

    x = x_nchw.reshape(N, c_in, HW)                  # lane-dense input (spatial last)
    masks = _make_tap_masks(H, W_, K)

    def flat_w(w):
        # HWIO (K,K,Cin,Cout) -> (Cout, K*K*Cin) bf16, matching kernel tap/channel order.
        kk, _, cin, cout = w.shape
        return w.reshape(kk * kk * cin, cout).T.astype(jnp.bfloat16)

    def col_b(b):
        return b.reshape(-1, 1).astype(jnp.float32)  # broadcasts along the lane axis

    # Split GRU weights along Cin (x part / hidden part); fuse the two x-path convs
    # along Cout and fuse their biases (gate bias + candidate bias).
    wg, bg = params["gru"]["wg"], params["gru"]["bg"]
    wc, bc = params["gru"]["wc"], params["gru"]["bc"]
    wgx, wgh = wg[:, :, :hid, :], wg[:, :, hid:, :]
    wcx, wch = wc[:, :, :hid, :], wc[:, :, hid:, :]
    wxf = jnp.concatenate([wgx, wcx], axis=3)        # (K,K,hid, 3*hid)
    bgru = jnp.concatenate([bg, bc], axis=0)         # (3*hid,)

    inputs = [masks, x]
    inputs += [flat_w(w) for w in params["pre_w"]]
    inputs += [col_b(b) for b in params["pre_b"]]
    inputs += [flat_w(w) for w in params["post_w"]]
    inputs += [col_b(b) for b in params["post_b"]]
    inputs += [flat_w(wxf), flat_w(wgh), flat_w(wch), col_b(bgru)]

    def const_spec(a):                               # all constants are 2-D
        return pl.BlockSpec(a.shape, lambda n: (0, 0))

    in_specs = [const_spec(masks),
                pl.BlockSpec((1, c_in, HW), lambda n: (n, 0, 0))]
    in_specs += [const_spec(a) for a in inputs[2:]]

    kern = functools.partial(_hourglass_kernel, n_levels=n_levels,
                             H=H, W=W_, K=K, c_in=c_in, hid=hid, emb=emb)

    out = pl.pallas_call(
        kern,
        out_shape=jax.ShapeDtypeStruct((N, emb, HW), x_nchw.dtype),
        grid=(N,),
        in_specs=in_specs,
        out_specs=pl.BlockSpec((1, emb, HW), lambda n: (n, 0, 0)),
        compiler_params=pltpu.CompilerParams(dimension_semantics=("parallel",)),
    )(*inputs)
    return out.reshape(N, emb, H, W_)                # back to NCHW (free: HW contiguous)


# ----------------------------------------------------------------------------
# Pure-JAX reference (lax.conv, NHWC) for correctness checking
# ----------------------------------------------------------------------------
def _ref_conv(x, w, b, act):
    out = lax.conv_general_dilated(
        x, w, window_strides=(1, 1), padding="SAME",
        dimension_numbers=("NHWC", "HWIO", "NHWC"))
    out = out + b
    if act == "relu":
        out = jnp.maximum(out, 0.0)
    elif act == "sigmoid":
        out = jax.nn.sigmoid(out)
    elif act == "tanh":
        out = jnp.tanh(out)
    return out


def _ref_forward(x, params, n_levels):
    outputs = []
    hidden = None
    for i in range(n_levels):
        x = _ref_conv(x, params["pre_w"][i], params["pre_b"][i], "relu")
        if hidden is None:
            hidden = jnp.zeros_like(x)
        C = hidden.shape[-1]
        g = _ref_conv(jnp.concatenate([x, hidden], -1),
                      params["gru"]["wg"], params["gru"]["bg"], "sigmoid")
        r, u = g[..., :C], g[..., C:]
        cand = _ref_conv(jnp.concatenate([x, r * hidden], -1),
                         params["gru"]["wc"], params["gru"]["bc"], "tanh")
        hidden = u * hidden + (1.0 - u) * cand
        outputs.append(hidden)
    post = _ref_conv(outputs[-1], params["post_w"][n_levels - 1],
                     params["post_b"][n_levels - 1], "relu")
    for i in reversed(range(n_levels - 1)):
        post = post + outputs[i]
        post = _ref_conv(post, params["post_w"][i], params["post_b"][i], "relu")
    return post


# ----------------------------------------------------------------------------
# Deterministic parameter init + driver
# ----------------------------------------------------------------------------
def make_params(key, c_in, hid, emb, k, n_levels):
    def conv_p(key, cin, cout):
        kw, kb = jax.random.split(key)
        w = 0.1 * jax.random.normal(kw, (k, k, cin, cout), jnp.float32)
        b = 0.05 * jax.random.normal(kb, (cout,), jnp.float32)
        return w, b

    keys = jax.random.split(key, 2 * n_levels + 2)
    pre_w, pre_b, post_w, post_b = [], [], [], []
    for i in range(n_levels):
        w, b = conv_p(keys[i], c_in if i == 0 else hid, hid)
        pre_w.append(w); pre_b.append(b)
    for i in range(n_levels):
        w, b = conv_p(keys[n_levels + i], hid, emb if i == 0 else hid)
        post_w.append(w); post_b.append(b)
    wg, bg = conv_p(keys[-2], 2 * hid, 2 * hid)
    wc, bc = conv_p(keys[-1], 2 * hid, hid)
    return {"pre_w": pre_w, "pre_b": pre_b,
            "post_w": post_w, "post_b": post_b,
            "gru": {"wg": wg, "bg": bg, "wc": wc, "bc": bc}}


if __name__ == "__main__":
    # Small config: input_n_filters=4, hidden_n_filters=8, kernel_size=3,
    #               n_levels=3, embedding_size=16, use_coordinates=False.
    N, H, W = 2, 16, 16
    C_IN, HID, EMB, K, N_LEVELS = 4, 8, 16, 3, 3

    key = jax.random.PRNGKey(0)
    k_x, k_p = jax.random.split(key)
    x = jax.random.normal(k_x, (N, C_IN, H, W), jnp.float32)   # NCHW, as in PyTorch
    params = make_params(k_p, C_IN, HID, EMB, K, N_LEVELS)

    fwd = jax.jit(functools.partial(recurrent_hourglass_forward, n_levels=N_LEVELS))
    out = jax.block_until_ready(fwd(x, params))

    assert out.shape == (N, EMB, H, W), out.shape
    assert bool(jnp.all(jnp.isfinite(out)))

    x_nhwc = jnp.transpose(x, (0, 2, 3, 1))
    ref = jnp.transpose(_ref_forward(x_nhwc, params, N_LEVELS), (0, 3, 1, 2))
    ref = jax.block_until_ready(ref)
    max_err = float(jnp.max(jnp.abs(out - ref)))
    assert max_err < 5e-2, f"mismatch vs reference: {max_err}"

    print("KERNEL_OK")
</pallas_src>

<mosaic_0001>
module attributes {stable_mosaic.version = 11 : i64} {
  func.func @_hourglass_kernel(%arg0: i32, %arg1: memref<9x256xf32, #tpu.memory_space<vmem>>, %arg2: memref<1x4x256xf32, #tpu.memory_space<vmem>>, %arg3: memref<8x36xbf16, #tpu.memory_space<vmem>>, %arg4: memref<8x72xbf16, #tpu.memory_space<vmem>>, %arg5: memref<8x72xbf16, #tpu.memory_space<vmem>>, %arg6: memref<8x1xf32, #tpu.memory_space<vmem>>, %arg7: memref<8x1xf32, #tpu.memory_space<vmem>>, %arg8: memref<8x1xf32, #tpu.memory_space<vmem>>, %arg9: memref<16x72xbf16, #tpu.memory_space<vmem>>, %arg10: memref<8x72xbf16, #tpu.memory_space<vmem>>, %arg11: memref<8x72xbf16, #tpu.memory_space<vmem>>, %arg12: memref<16x1xf32, #tpu.memory_space<vmem>>, %arg13: memref<8x1xf32, #tpu.memory_space<vmem>>, %arg14: memref<8x1xf32, #tpu.memory_space<vmem>>, %arg15: memref<24x72xbf16, #tpu.memory_space<vmem>>, %arg16: memref<16x72xbf16, #tpu.memory_space<vmem>>, %arg17: memref<8x72xbf16, #tpu.memory_space<vmem>>, %arg18: memref<24x1xf32, #tpu.memory_space<vmem>>, %arg19: memref<1x16x256xf32, #tpu.memory_space<vmem>>) attributes {dimension_semantics = [#tpu.dimension_semantics<parallel>], iteration_bounds = array<i64: 2>, scalar_prefetch = 0 : i64, scratch_operands = 0 : i64, tpu.core_type = #tpu.core_type<tc>, window_params = [{pipeline_mode = #tpu.pipeline_mode<synchronous>, transform_indices = @transform_0, window_bounds = array<i64: 9, 256>}, {transform_indices = @transform_1, window_bounds = array<i64: 1, 4, 256>}, {pipeline_mode = #tpu.pipeline_mode<synchronous>, transform_indices = @transform_2, window_bounds = array<i64: 8, 36>}, {pipeline_mode = #tpu.pipeline_mode<synchronous>, transform_indices = @transform_3, window_bounds = array<i64: 8, 72>}, {pipeline_mode = #tpu.pipeline_mode<synchronous>, transform_indices = @transform_4, window_bounds = array<i64: 8, 72>}, {pipeline_mode = #tpu.pipeline_mode<synchronous>, transform_indices = @transform_5, window_bounds = array<i64: 8, 1>}, {pipeline_mode = #tpu.pipeline_mode<synchronous>, transform_indices = @transform_6, window_bounds = array<i64: 8, 1>}, {pipeline_mode = #tpu.pipeline_mode<synchronous>, transform_indices = @transform_7, window_bounds = array<i64: 8, 1>}, {pipeline_mode = #tpu.pipeline_mode<synchronous>, transform_indices = @transform_8, window_bounds = array<i64: 16, 72>}, {pipeline_mode = #tpu.pipeline_mode<synchronous>, transform_indices = @transform_9, window_bounds = array<i64: 8, 72>}, {pipeline_mode = #tpu.pipeline_mode<synchronous>, transform_indices = @transform_10, window_bounds = array<i64: 8, 72>}, {pipeline_mode = #tpu.pipeline_mode<synchronous>, transform_indices = @transform_11, window_bounds = array<i64: 16, 1>}, {pipeline_mode = #tpu.pipeline_mode<synchronous>, transform_indices = @transform_12, window_bounds = array<i64: 8, 1>}, {pipeline_mode = #tpu.pipeline_mode<synchronous>, transform_indices = @transform_13, window_bounds = array<i64: 8, 1>}, {pipeline_mode = #tpu.pipeline_mode<synchronous>, transform_indices = @transform_14, window_bounds = array<i64: 24, 72>}, {pipeline_mode = #tpu.pipeline_mode<synchronous>, transform_indices = @transform_15, window_bounds = array<i64: 16, 72>}, {pipeline_mode = #tpu.pipeline_mode<synchronous>, transform_indices = @transform_16, window_bounds = array<i64: 8, 72>}, {pipeline_mode = #tpu.pipeline_mode<synchronous>, transform_indices = @transform_17, window_bounds = array<i64: 24, 1>}, {transform_indices = @transform_18, window_bounds = array<i64: 1, 16, 256>}]} {
    %c0 = arith.constant 0 : index
    %c0_0 = arith.constant 0 : index
    %0 = vector.load %arg1[%c0, %c0_0] : memref<9x256xf32, #tpu.memory_space<vmem>>, vector<9x256xf32>
    %c0_1 = arith.constant 0 : index
    %c0_2 = arith.constant 0 : index
    %c0_3 = arith.constant 0 : index
    %1 = vector.load %arg2[%c0_1, %c0_2, %c0_3] : memref<1x4x256xf32, #tpu.memory_space<vmem>>, vector<1x4x256xf32>
    %2 = vector.shape_cast %1 : vector<1x4x256xf32> to vector<4x256xf32>
    %c17_i32 = arith.constant 17 : i32
    %3 = tpu.dynamic_rotate %2 by %c17_i32 dim 1 : vector<4x256xf32>, i32 -> vector<4x256xf32>
    %4 = vector.extract_strided_slice %0 {offsets = [0, 0], sizes = [1, 256], strides = [1, 1]} : vector<9x256xf32> to vector<1x256xf32>
    %5 = vector.broadcast %4 : vector<1x256xf32> to vector<4x256xf32>
    %6 = arith.mulf %3, %5 : vector<4x256xf32>
    %c16_i32 = arith.constant 16 : i32
    %7 = tpu.dynamic_rotate %2 by %c16_i32 dim 1 : vector<4x256xf32>, i32 -> vector<4x256xf32>
    %8 = vector.extract_strided_slice %0 {offsets = [1, 0], sizes = [1, 256], strides = [1, 1]} : vector<9x256xf32> to vector<1x256xf32>
    %9 = vector.broadcast %8 : vector<1x256xf32> to vector<4x256xf32>
    %10 = arith.mulf %7, %9 : vector<4x256xf32>
    %c15_i32 = arith.constant 15 : i32
    %11 = tpu.dynamic_rotate %2 by %c15_i32 dim 1 : vector<4x256xf32>, i32 -> vector<4x256xf32>
    %12 = vector.extract_strided_slice %0 {offsets = [2, 0], sizes = [1, 256], strides = [1, 1]} : vector<9x256xf32> to vector<1x256xf32>
    %13 = vector.broadcast %12 : vector<1x256xf32> to vector<4x256xf32>
    %14 = arith.mulf %11, %13 : vector<4x256xf32>
    %c1_i32 = arith.constant 1 : i32
    %15 = tpu.dynamic_rotate %2 by %c1_i32 dim 1 : vector<4x256xf32>, i32 -> vector<4x256xf32>
    %16 = vector.extract_strided_slice %0 {offsets = [3, 0], sizes = [1, 256], strides = [1, 1]} : vector<9x256xf32> to vector<1x256xf32>
    %17 = vector.broadcast %16 : vector<1x256xf32> to vector<4x256xf32>
    %18 = arith.mulf %15, %17 : vector<4x256xf32>
    %c255_i32 = arith.constant 255 : i32
    %19 = tpu.dynamic_rotate %2 by %c255_i32 dim 1 : vector<4x256xf32>, i32 -> vector<4x256xf32>
    %20 = vector.extract_strided_slice %0 {offsets = [5, 0], sizes = [1, 256], strides = [1, 1]} : vector<9x256xf32> to vector<1x256xf32>
    %21 = vector.broadcast %20 : vector<1x256xf32> to vector<4x256xf32>
    %22 = arith.mulf %19, %21 : vector<4x256xf32>
    %c241_i32 = arith.constant 241 : i32
    %23 = tpu.dynamic_rotate %2 by %c241_i32 dim 1 : vector<4x256xf32>, i32 -> vector<4x256xf32>
    %24 = vector.extract_strided_slice %0 {offsets = [6, 0], sizes = [1, 256], strides = [1, 1]} : vector<9x256xf32> to vector<1x256xf32>
    %25 = vector.broadcast %24 : vector<1x256xf32> to vector<4x256xf32>
    %26 = arith.mulf %23, %25 : vector<4x256xf32>
    %c240_i32 = arith.constant 240 : i32
    %27 = tpu.dynamic_rotate %2 by %c240_i32 dim 1 : vector<4x256xf32>, i32 -> vector<4x256xf32>
    %28 = vector.extract_strided_slice %0 {offsets = [7, 0], sizes = [1, 256], strides = [1, 1]} : vector<9x256xf32> to vector<1x256xf32>
    %29 = vector.broadcast %28 : vector<1x256xf32> to vector<4x256xf32>
    %30 = arith.mulf %27, %29 : vector<4x256xf32>
    %c239_i32 = arith.constant 239 : i32
    %31 = tpu.dynamic_rotate %2 by %c239_i32 dim 1 : vector<4x256xf32>, i32 -> vector<4x256xf32>
    %32 = vector.extract_strided_slice %0 {offsets = [8, 0], sizes = [1, 256], strides = [1, 1]} : vector<9x256xf32> to vector<1x256xf32>
    %33 = vector.broadcast %32 : vector<1x256xf32> to vector<4x256xf32>
    %34 = arith.mulf %31, %33 : vector<4x256xf32>
    %35 = tpu.concatenate %6, %10, %14, %18, %2, %22, %26, %30, %34 in 0 : vector<4x256xf32>, vector<4x256xf32>, vector<4x256xf32>, vector<4x256xf32>, vector<4x256xf32>, vector<4x256xf32>, vector<4x256xf32>, vector<4x256xf32>, vector<4x256xf32> -> vector<36x256xf32>
    %36 = arith.truncf %35 : vector<36x256xf32> to vector<36x256xbf16>
    %c0_4 = arith.constant 0 : index
    %c0_5 = arith.constant 0 : index
    %37 = vector.load %arg3[%c0_4, %c0_5] : memref<8x36xbf16, #tpu.memory_space<vmem>>, vector<8x36xbf16>
    %cst = arith.constant dense<0.000000e+00> : vector<8x256xf32>
    %38 = tpu.matmul %37, %36, %cst {dimension_numbers = #tpu.dot_dimension_numbers<[1], [0], [0], [1], [0, 0, 1, 1], [], []>} : vector<8x36xbf16>, vector<36x256xbf16>, vector<8x256xf32> -> vector<8x256xf32>
    %c0_6 = arith.constant 0 : index
    %c0_7 = arith.constant 0 : index
    %39 = vector.load %arg6[%c0_6, %c0_7] : memref<8x1xf32, #tpu.memory_space<vmem>>, vector<8x1xf32>
    %40 = vector.broadcast %39 : vector<8x1xf32> to vector<8x256xf32>
    %41 = arith.addf %38, %40 : vector<8x256xf32>
    %cst_8 = arith.constant 0.000000e+00 : f32
    %42 = vector.broadcast %cst_8 : f32 to vector<8x256xf32>
    %43 = arith.maximumf %41, %42 : vector<8x256xf32>
    %c17_i32_9 = arith.constant 17 : i32
    %44 = tpu.dynamic_rotate %43 by %c17_i32_9 dim 1 : vector<8x256xf32>, i32 -> vector<8x256xf32>
    %45 = vector.extract_strided_slice %0 {offsets = [0, 0], sizes = [1, 256], strides = [1, 1]} : vector<9x256xf32> to vector<1x256xf32>
    %46 = vector.broadcast %45 : vector<1x256xf32> to vector<8x256xf32>
    %47 = arith.mulf %44, %46 : vector<8x256xf32>
    %c16_i32_10 = arith.constant 16 : i32
    %48 = tpu.dynamic_rotate %43 by %c16_i32_10 dim 1 : vector<8x256xf32>, i32 -> vector<8x256xf32>
    %49 = vector.extract_strided_slice %0 {offsets = [1, 0], sizes = [1, 256], strides = [1, 1]} : vector<9x256xf32> to vector<1x256xf32>
    %50 = vector.broadcast %49 : vector<1x256xf32> to vector<8x256xf32>
    %51 = arith.mulf %48, %50 : vector<8x256xf32>
    %c15_i32_11 = arith.constant 15 : i32
    %52 = tpu.dynamic_rotate %43 by %c15_i32_11 dim 1 : vector<8x256xf32>, i32 -> vector<8x256xf32>
    %53 = vector.extract_strided_slice %0 {offsets = [2, 0], sizes = [1, 256], strides = [1, 1]} : vector<9x256xf32> to vector<1x256xf32>
    %54 = vector.broadcast %53 : vector<1x256xf32> to vector<8x256xf32>
    %55 = arith.mulf %52, %54 : vector<8x256xf32>
    %c1_i32_12 = arith.constant 1 : i32
    %56 = tpu.dynamic_rotate %43 by %c1_i32_12 dim 1 : vector<8x256xf32>, i32 -> vector<8x256xf32>
    %57 = vector.extract_strided_slice %0 {offsets = [3, 0], sizes = [1, 256], strides = [1, 1]} : vector<9x256xf32> to vector<1x256xf32>
    %58 = vector.broadcast %57 : vector<1x256xf32> to vector<8x256xf32>
    %59 = arith.mulf %56, %58 : vector<8x256xf32>
    %c255_i32_13 = arith.constant 255 : i32
    %60 = tpu.dynamic_rotate %43 by %c255_i32_13 dim 1 : vector<8x256xf32>, i32 -> vector<8x256xf32>
    %61 = vector.extract_strided_slice %0 {offsets = [5, 0], sizes = [1, 256], strides = [1, 1]} : vector<9x256xf32> to vector<1x256xf32>
    %62 = vector.broadcast %61 : vector<1x256xf32> to vector<8x256xf32>
    %63 = arith.mulf %60, %62 : vector<8x256xf32>
    %c241_i32_14 = arith.constant 241 : i32
    %64 = tpu.dynamic_rotate %43 by %c241_i32_14 dim 1 : vector<8x256xf32>, i32 -> vector<8x256xf32>
    %65 = vector.extract_strided_slice %0 {offsets = [6, 0], sizes = [1, 256], strides = [1, 1]} : vector<9x256xf32> to vector<1x256xf32>
    %66 = vector.broadcast %65 : vector<1x256xf32> to vector<8x256xf32>
    %67 = arith.mulf %64, %66 : vector<8x256xf32>
    %c240_i32_15 = arith.constant 240 : i32
    %68 = tpu.dynamic_rotate %43 by %c240_i32_15 dim 1 : vector<8x256xf32>, i32 -> vector<8x256xf32>
    %69 = vector.extract_strided_slice %0 {offsets = [7, 0], sizes = [1, 256], strides = [1, 1]} : vector<9x256xf32> to vector<1x256xf32>
    %70 = vector.broadcast %69 : vector<1x256xf32> to vector<8x256xf32>
    %71 = arith.mulf %68, %70 : vector<8x256xf32>
    %c239_i32_16 = arith.constant 239 : i32
    %72 = tpu.dynamic_rotate %43 by %c239_i32_16 dim 1 : vector<8x256xf32>, i32 -> vector<8x256xf32>
    %73 = vector.extract_strided_slice %0 {offsets = [8, 0], sizes = [1, 256], strides = [1, 1]} : vector<9x256xf32> to vector<1x256xf32>
    %74 = vector.broadcast %73 : vector<1x256xf32> to vector<8x256xf32>
    %75 = arith.mulf %72, %74 : vector<8x256xf32>
    %76 = tpu.concatenate %47, %51, %55, %59, %43, %63, %67, %71, %75 in 0 : vector<8x256xf32>, vector<8x256xf32>, vector<8x256xf32>, vector<8x256xf32>, vector<8x256xf32>, vector<8x256xf32>, vector<8x256xf32>, vector<8x256xf32>, vector<8x256xf32> -> vector<72x256xf32>
    %77 = arith.truncf %76 : vector<72x256xf32> to vector<72x256xbf16>
    %c0_17 = arith.constant 0 : index
    %c0_18 = arith.constant 0 : index
    %78 = vector.load %arg15[%c0_17, %c0_18] : memref<24x72xbf16, #tpu.memory_space<vmem>>, vector<24x72xbf16>
    %cst_19 = arith.constant dense<0.000000e+00> : vector<24x256xf32>
    %79 = tpu.matmul %78, %77, %cst_19 {dimension_numbers = #tpu.dot_dimension_numbers<[1], [0], [0], [1], [0, 0, 1, 1], [], []>} : vector<24x72xbf16>, vector<72x256xbf16>, vector<24x256xf32> -> vector<24x256xf32>
    %c0_20 = arith.constant 0 : index
    %c0_21 = arith.constant 0 : index
    %80 = vector.load %arg18[%c0_20, %c0_21] : memref<24x1xf32, #tpu.memory_space<vmem>>, vector<24x1xf32>
    %81 = vector.broadcast %80 : vector<24x1xf32> to vector<24x256xf32>
    %82 = arith.addf %79, %81 : vector<24x256xf32>
    %83 = vector.extract_strided_slice %82 {offsets = [0, 0], sizes = [16, 256], strides = [1, 1]} : vector<24x256xf32> to vector<16x256xf32>
    %84 = arith.negf %83 : vector<16x256xf32>
    %85 = math.exp %84 : vector<16x256xf32>
    %cst_22 = arith.constant 1.000000e+00 : f32
    %86 = vector.broadcast %cst_22 : f32 to vector<16x256xf32>
    %87 = arith.addf %86, %85 : vector<16x256xf32>
    %88 = arith.divf %86, %87 : vector<16x256xf32>
    %89 = vector.extract_strided_slice %88 {offsets = [8, 0], sizes = [8, 256], strides = [1, 1]} : vector<16x256xf32> to vector<8x256xf32>
    %cst_23 = arith.constant 1.000000e+00 : f32
    %90 = vector.broadcast %cst_23 : f32 to vector<8x256xf32>
    %91 = arith.subf %90, %89 : vector<8x256xf32>
    %92 = vector.extract_strided_slice %82 {offsets = [16, 0], sizes = [8, 256], strides = [1, 1]} : vector<24x256xf32> to vector<8x256xf32>
    %93 = math.tanh %92 : vector<8x256xf32>
    %94 = arith.mulf %91, %93 : vector<8x256xf32>
    %c17_i32_24 = arith.constant 17 : i32
    %95 = tpu.dynamic_rotate %43 by %c17_i32_24 dim 1 : vector<8x256xf32>, i32 -> vector<8x256xf32>
    %96 = vector.extract_strided_slice %0 {offsets = [0, 0], sizes = [1, 256], strides = [1, 1]} : vector<9x256xf32> to vector<1x256xf32>
    %97 = vector.broadcast %96 : vector<1x256xf32> to vector<8x256xf32>
    %98 = arith.mulf %95, %97 : vector<8x256xf32>
    %c16_i32_25 = arith.constant 16 : i32
    %99 = tpu.dynamic_rotate %43 by %c16_i32_25 dim 1 : vector<8x256xf32>, i32 -> vector<8x256xf32>
    %100 = vector.extract_strided_slice %0 {offsets = [1, 0], sizes = [1, 256], strides = [1, 1]} : vector<9x256xf32> to vector<1x256xf32>
    %101 = vector.broadcast %100 : vector<1x256xf32> to vector<8x256xf32>
    %102 = arith.mulf %99, %101 : vector<8x256xf32>
    %c15_i32_26 = arith.constant 15 : i32
    %103 = tpu.dynamic_rotate %43 by %c15_i32_26 dim 1 : vector<8x256xf32>, i32 -> vector<8x256xf32>
    %104 = vector.extract_strided_slice %0 {offsets = [2, 0], sizes = [1, 256], strides = [1, 1]} : vector<9x256xf32> to vector<1x256xf32>
    %105 = vector.broadcast %104 : vector<1x256xf32> to vector<8x256xf32>
    %106 = arith.mulf %103, %105 : vector<8x256xf32>
    %c1_i32_27 = arith.constant 1 : i32
    %107 = tpu.dynamic_rotate %43 by %c1_i32_27 dim 1 : vector<8x256xf32>, i32 -> vector<8x256xf32>
    %108 = vector.extract_strided_slice %0 {offsets = [3, 0], sizes = [1, 256], strides = [1, 1]} : vector<9x256xf32> to vector<1x256xf32>
    %109 = vector.broadcast %108 : vector<1x256xf32> to vector<8x256xf32>
    %110 = arith.mulf %107, %109 : vector<8x256xf32>
    %c255_i32_28 = arith.constant 255 : i32
    %111 = tpu.dynamic_rotate %43 by %c255_i32_28 dim 1 : vector<8x256xf32>, i32 -> vector<8x256xf32>
    %112 = vector.extract_strided_slice %0 {offsets = [5, 0], sizes = [1, 256], strides = [1, 1]} : vector<9x256xf32> to vector<1x256xf32>
    %113 = vector.broadcast %112 : vector<1x256xf32> to vector<8x256xf32>
    %114 = arith.mulf %111, %113 : vector<8x256xf32>
    %c241_i32_29 = arith.constant 241 : i32
    %115 = tpu.dynamic_rotate %43 by %c241_i32_29 dim 1 : vector<8x256xf32>, i32 -> vector<8x256xf32>
    %116 = vector.extract_strided_slice %0 {offsets = [6, 0], sizes = [1, 256], strides = [1, 1]} : vector<9x256xf32> to vector<1x256xf32>
    %117 = vector.broadcast %116 : vector<1x256xf32> to vector<8x256xf32>
    %118 = arith.mulf %115, %117 : vector<8x256xf32>
    %c240_i32_30 = arith.constant 240 : i32
    %119 = tpu.dynamic_rotate %43 by %c240_i32_30 dim 1 : vector<8x256xf32>, i32 -> vector<8x256xf32>
    %120 = vector.extract_strided_slice %0 {offsets = [7, 0], sizes = [1, 256], strides = [1, 1]} : vector<9x256xf32> to vector<1x256xf32>
    %121 = vector.broadcast %120 : vector<1x256xf32> to vector<8x256xf32>
    %122 = arith.mulf %119, %121 : vector<8x256xf32>
    %c239_i32_31 = arith.constant 239 : i32
    %123 = tpu.dynamic_rotate %43 by %c239_i32_31 dim 1 : vector<8x256xf32>, i32 -> vector<8x256xf32>
    %124 = vector.extract_strided_slice %0 {offsets = [8, 0], sizes = [1, 256], strides = [1, 1]} : vector<9x256xf32> to vector<1x256xf32>
    %125 = vector.broadcast %124 : vector<1x256xf32> to vector<8x256xf32>
    %126 = arith.mulf %123, %125 : vector<8x256xf32>
    %127 = tpu.concatenate %98, %102, %106, %110, %43, %114, %118, %122, %126 in 0 : vector<8x256xf32>, vector<8x256xf32>, vector<8x256xf32>, vector<8x256xf32>, vector<8x256xf32>, vector<8x256xf32>, vector<8x256xf32>, vector<8x256xf32>, vector<8x256xf32> -> vector<72x256xf32>
    %128 = arith.truncf %127 : vector<72x256xf32> to vector<72x256xbf16>
    %c0_32 = arith.constant 0 : index
    %c0_33 = arith.constant 0 : index
    %129 = vector.load %arg4[%c0_32, %c0_33] : memref<8x72xbf16, #tpu.memory_space<vmem>>, vector<8x72xbf16>
    %cst_34 = arith.constant dense<0.000000e+00> : vector<8x256xf32>
    %130 = tpu.matmul %129, %128, %cst_34 {dimension_numbers = #tpu.dot_dimension_numbers<[1], [0], [0], [1], [0, 0, 1, 1], [], []>} : vector<8x72xbf16>, vector<72x256xbf16>, vector<8x256xf32> -> vector<8x256xf32>
    %c0_35 = arith.constant 0 : index
    %c0_36 = arith.constant 0 : index
    %131 = vector.load %arg7[%c0_35, %c0_36] : memref<8x1xf32, #tpu.memory_space<vmem>>, vector<8x1xf32>
    %132 = vector.broadcast %131 : vector<8x1xf32> to vector<8x256xf32>
    %133 = arith.addf %130, %132 : vector<8x256xf32>
    %cst_37 = arith.constant 0.000000e+00 : f32
    %134 = vector.broadcast %cst_37 : f32 to vector<8x256xf32>
    %135 = arith.maximumf %133, %134 : vector<8x256xf32>
    %c17_i32_38 = arith.constant 17 : i32
    %136 = tpu.dynamic_rotate %135 by %c17_i32_38 dim 1 : vector<8x256xf32>, i32 -> vector<8x256xf32>
    %137 = vector.extract_strided_slice %0 {offsets = [0, 0], sizes = [1, 256], strides = [1, 1]} : vector<9x256xf32> to vector<1x256xf32>
    %138 = vector.broadcast %137 : vector<1x256xf32> to vector<8x256xf32>
    %139 = arith.mulf %136, %138 : vector<8x256xf32>
    %c16_i32_39 = arith.constant 16 : i32
    %140 = tpu.dynamic_rotate %135 by %c16_i32_39 dim 1 : vector<8x256xf32>, i32 -> vector<8x256xf32>
    %141 = vector.extract_strided_slice %0 {offsets = [1, 0], sizes = [1, 256], strides = [1, 1]} : vector<9x256xf32> to vector<1x256xf32>
    %142 = vector.broadcast %141 : vector<1x256xf32> to vector<8x256xf32>
    %143 = arith.mulf %140, %142 : vector<8x256xf32>
    %c15_i32_40 = arith.constant 15 : i32
    %144 = tpu.dynamic_rotate %135 by %c15_i32_40 dim 1 : vector<8x256xf32>, i32 -> vector<8x256xf32>
    %145 = vector.extract_strided_slice %0 {offsets = [2, 0], sizes = [1, 256], strides = [1, 1]} : vector<9x256xf32> to vector<1x256xf32>
    %146 = vector.broadcast %145 : vector<1x256xf32> to vector<8x256xf32>
    %147 = arith.mulf %144, %146 : vector<8x256xf32>
    %c1_i32_41 = arith.constant 1 : i32
    %148 = tpu.dynamic_rotate %135 by %c1_i32_41 dim 1 : vector<8x256xf32>, i32 -> vector<8x256xf32>
    %149 = vector.extract_strided_slice %0 {offsets = [3, 0], sizes = [1, 256], strides = [1, 1]} : vector<9x256xf32> to vector<1x256xf32>
    %150 = vector.broadcast %149 : vector<1x256xf32> to vector<8x256xf32>
    %151 = arith.mulf %148, %150 : vector<8x256xf32>
    %c255_i32_42 = arith.constant 255 : i32
    %152 = tpu.dynamic_rotate %135 by %c255_i32_42 dim 1 : vector<8x256xf32>, i32 -> vector<8x256xf32>
    %153 = vector.extract_strided_slice %0 {offsets = [5, 0], sizes = [1, 256], strides = [1, 1]} : vector<9x256xf32> to vector<1x256xf32>
    %154 = vector.broadcast %153 : vector<1x256xf32> to vector<8x256xf32>
    %155 = arith.mulf %152, %154 : vector<8x256xf32>
    %c241_i32_43 = arith.constant 241 : i32
    %156 = tpu.dynamic_rotate %135 by %c241_i32_43 dim 1 : vector<8x256xf32>, i32 -> vector<8x256xf32>
    %157 = vector.extract_strided_slice %0 {offsets = [6, 0], sizes = [1, 256], strides = [1, 1]} : vector<9x256xf32> to vector<1x256xf32>
    %158 = vector.broadcast %157 : vector<1x256xf32> to vector<8x256xf32>
    %159 = arith.mulf %156, %158 : vector<8x256xf32>
    %c240_i32_44 = arith.constant 240 : i32
    %160 = tpu.dynamic_rotate %135 by %c240_i32_44 dim 1 : vector<8x256xf32>, i32 -> vector<8x256xf32>
    %161 = vector.extract_strided_slice %0 {offsets = [7, 0], sizes = [1, 256], strides = [1, 1]} : vector<9x256xf32> to vector<1x256xf32>
    %162 = vector.broadcast %161 : vector<1x256xf32> to vector<8x256xf32>
    %163 = arith.mulf %160, %162 : vector<8x256xf32>
    %c239_i32_45 = arith.constant 239 : i32
    %164 = tpu.dynamic_rotate %135 by %c239_i32_45 dim 1 : vector<8x256xf32>, i32 -> vector<8x256xf32>
    %165 = vector.extract_strided_slice %0 {offsets = [8, 0], sizes = [1, 256], strides = [1, 1]} : vector<9x256xf32> to vector<1x256xf32>
    %166 = vector.broadcast %165 : vector<1x256xf32> to vector<8x256xf32>
    %167 = arith.mulf %164, %166 : vector<8x256xf32>
    %168 = tpu.concatenate %139, %143, %147, %151, %135, %155, %159, %163, %167 in 0 : vector<8x256xf32>, vector<8x256xf32>, vector<8x256xf32>, vector<8x256xf32>, vector<8x256xf32>, vector<8x256xf32>, vector<8x256xf32>, vector<8x256xf32>, vector<8x256xf32> -> vector<72x256xf32>
    %169 = arith.truncf %168 : vector<72x256xf32> to vector<72x256xbf16>
    %c0_46 = arith.constant 0 : index
    %c0_47 = arith.constant 0 : index
    %170 = vector.load %arg15[%c0_46, %c0_47] : memref<24x72xbf16, #tpu.memory_space<vmem>>, vector<24x72xbf16>
    %cst_48 = arith.constant dense<0.000000e+00> : vector<24x256xf32>
    %171 = tpu.matmul %170, %169, %cst_48 {dimension_numbers = #tpu.dot_dimension_numbers<[1], [0], [0], [1], [0, 0, 1, 1], [], []>} : vector<24x72xbf16>, vector<72x256xbf16>, vector<24x256xf32> -> vector<24x256xf32>
    %c0_49 = arith.constant 0 : index
    %c0_50 = arith.constant 0 : index
    %172 = vector.load %arg18[%c0_49, %c0_50] : memref<24x1xf32, #tpu.memory_space<vmem>>, vector<24x1xf32>
    %173 = vector.broadcast %172 : vector<24x1xf32> to vector<24x256xf32>
    %174 = arith.addf %171, %173 : vector<24x256xf32>
    %175 = vector.extract_strided_slice %174 {offsets = [0, 0], sizes = [16, 256], strides = [1, 1]} : vector<24x256xf32> to vector<16x256xf32>
    %c17_i32_51 = arith.constant 17 : i32
    %176 = tpu.dynamic_rotate %94 by %c17_i32_51 dim 1 : vector<8x256xf32>, i32 -> vector<8x256xf32>
    %177 = vector.extract_strided_slice %0 {offsets = [0, 0], sizes = [1, 256], strides = [1, 1]} : vector<9x256xf32> to vector<1x256xf32>
    %178 = vector.broadcast %177 : vector<1x256xf32> to vector<8x256xf32>
    %179 = arith.mulf %176, %178 : vector<8x256xf32>
    %c16_i32_52 = arith.constant 16 : i32
    %180 = tpu.dynamic_rotate %94 by %c16_i32_52 dim 1 : vector<8x256xf32>, i32 -> vector<8x256xf32>
    %181 = vector.extract_strided_slice %0 {offsets = [1, 0], sizes = [1, 256], strides = [1, 1]} : vector<9x256xf32> to vector<1x256xf32>
    %182 = vector.broadcast %181 : vector<1x256xf32> to vector<8x256xf32>
    %183 = arith.mulf %180, %182 : vector<8x256xf32>
    %c15_i32_53 = arith.constant 15 : i32
    %184 = tpu.dynamic_rotate %94 by %c15_i32_53 dim 1 : vector<8x256xf32>, i32 -> vector<8x256xf32>
    %185 = vector.extract_strided_slice %0 {offsets = [2, 0], sizes = [1, 256], strides = [1, 1]} : vector<9x256xf32> to vector<1x256xf32>
    %186 = vector.broadcast %185 : vector<1x256xf32> to vector<8x256xf32>
    %187 = arith.mulf %184, %186 : vector<8x256xf32>
    %c1_i32_54 = arith.constant 1 : i32
    %188 = tpu.dynamic_rotate %94 by %c1_i32_54 dim 1 : vector<8x256xf32>, i32 -> vector<8x256xf32>
    %189 = vector.extract_strided_slice %0 {offsets = [3, 0], sizes = [1, 256], strides = [1, 1]} : vector<9x256xf32> to vector<1x256xf32>
    %190 = vector.broadcast %189 : vector<1x256xf32> to vector<8x256xf32>
    %191 = arith.mulf %188, %190 : vector<8x256xf32>
    %c255_i32_55 = arith.constant 255 : i32
    %192 = tpu.dynamic_rotate %94 by %c255_i32_55 dim 1 : vector<8x256xf32>, i32 -> vector<8x256xf32>
    %193 = vector.extract_strided_slice %0 {offsets = [5, 0], sizes = [1, 256], strides = [1, 1]} : vector<9x256xf32> to vector<1x256xf32>
    %194 = vector.broadcast %193 : vector<1x256xf32> to vector<8x256xf32>
    %195 = arith.mulf %192, %194 : vector<8x256xf32>
    %c241_i32_56 = arith.constant 241 : i32
    %196 = tpu.dynamic_rotate %94 by %c241_i32_56 dim 1 : vector<8x256xf32>, i32 -> vector<8x256xf32>
    %197 = vector.extract_strided_slice %0 {offsets = [6, 0], sizes = [1, 256], strides = [1, 1]} : vector<9x256xf32> to vector<1x256xf32>
    %198 = vector.broadcast %197 : vector<1x256xf32> to vector<8x256xf32>
    %199 = arith.mulf %196, %198 : vector<8x256xf32>
    %c240_i32_57 = arith.constant 240 : i32
    %200 = tpu.dynamic_rotate %94 by %c240_i32_57 dim 1 : vector<8x256xf32>, i32 -> vector<8x256xf32>
    %201 = vector.extract_strided_slice %0 {offsets = [7, 0], sizes = [1, 256], strides = [1, 1]} : vector<9x256xf32> to vector<1x256xf32>
    %202 = vector.broadcast %201 : vector<1x256xf32> to vector<8x256xf32>
    %203 = arith.mulf %200, %202 : vector<8x256xf32>
    %c239_i32_58 = arith.constant 239 : i32
    %204 = tpu.dynamic_rotate %94 by %c239_i32_58 dim 1 : vector<8x256xf32>, i32 -> vector<8x256xf32>
    %205 = vector.extract_strided_slice %0 {offsets = [8, 0], sizes = [1, 256], strides = [1, 1]} : vector<9x256xf32> to vector<1x256xf32>
    %206 = vector.broadcast %205 : vector<1x256xf32> to vector<8x256xf32>
    %207 = arith.mulf %204, %206 : vector<8x256xf32>
    %208 = tpu.concatenate %179, %183, %187, %191, %94, %195, %199, %203, %207 in 0 : vector<8x256xf32>, vector<8x256xf32>, vector<8x256xf32>, vector<8x256xf32>, vector<8x256xf32>, vector<8x256xf32>, vector<8x256xf32>, vector<8x256xf32>, vector<8x256xf32> -> vector<72x256xf32>
    %209 = arith.truncf %208 : vector<72x256xf32> to vector<72x256xbf16>
    %c0_59 = arith.constant 0 : index
    %c0_60 = arith.constant 0 : index
    %210 = vector.load %arg16[%c0_59, %c0_60] : memref<16x72xbf16, #tpu.memory_space<vmem>>, vector<16x72xbf16>
    %cst_61 = arith.constant dense<0.000000e+00> : vector<16x256xf32>
    %211 = tpu.matmul %210, %209, %cst_61 {dimension_numbers = #tpu.dot_dimension_numbers<[1], [0], [0], [1], [0, 0, 1, 1], [], []>} : vector<16x72xbf16>, vector<72x256xbf16>, vector<16x256xf32> -> vector<16x256xf32>
    %212 = arith.addf %175, %211 : vector<16x256xf32>
    %213 = arith.negf %212 : vector<16x256xf32>
    %214 = math.exp %213 : vector<16x256xf32>
    %cst_62 = arith.constant 1.000000e+00 : f32
    %215 = vector.broadcast %cst_62 : f32 to vector<16x256xf32>
    %216 = arith.addf %215, %214 : vector<16x256xf32>
    %217 = arith.divf %215, %216 : vector<16x256xf32>
    %218 = vector.extract_strided_slice %217 {offsets = [0, 0], sizes = [8, 256], strides = [1, 1]} : vector<16x256xf32> to vector<8x256xf32>
    %219 = vector.extract_strided_slice %217 {offsets = [8, 0], sizes = [8, 256], strides = [1, 1]} : vector<16x256xf32> to vector<8x256xf32>
    %220 = vector.extract_strided_slice %174 {offsets = [16, 0], sizes = [8, 256], strides = [1, 1]} : vector<24x256xf32> to vector<8x256xf32>
    %221 = arith.mulf %218, %94 : vector<8x256xf32>
    %c17_i32_63 = arith.constant 17 : i32
    %222 = tpu.dynamic_rotate %221 by %c17_i32_63 dim 1 : vector<8x256xf32>, i32 -> vector<8x256xf32>
    %223 = vector.extract_strided_slice %0 {offsets = [0, 0], sizes = [1, 256], strides = [1, 1]} : vector<9x256xf32> to vector<1x256xf32>
    %224 = vector.broadcast %223 : vector<1x256xf32> to vector<8x256xf32>
    %225 = arith.mulf %222, %224 : vector<8x256xf32>
    %c16_i32_64 = arith.constant 16 : i32
    %226 = tpu.dynamic_rotate %221 by %c16_i32_64 dim 1 : vector<8x256xf32>, i32 -> vector<8x256xf32>
    %227 = vector.extract_strided_slice %0 {offsets = [1, 0], sizes = [1, 256], strides = [1, 1]} : vector<9x256xf32> to vector<1x256xf32>
    %228 = vector.broadcast %227 : vector<1x256xf32> to vector<8x256xf32>
    %229 = arith.mulf %226, %228 : vector<8x256xf32>
    %c15_i32_65 = arith.constant 15 : i32
    %230 = tpu.dynamic_rotate %221 by %c15_i32_65 dim 1 : vector<8x256xf32>, i32 -> vector<8x256xf32>
    %231 = vector.extract_strided_slice %0 {offsets = [2, 0], sizes = [1, 256], strides = [1, 1]} : vector<9x256xf32> to vector<1x256xf32>
    %232 = vector.broadcast %231 : vector<1x256xf32> to vector<8x256xf32>
    %233 = arith.mulf %230, %232 : vector<8x256xf32>
    %c1_i32_66 = arith.constant 1 : i32
    %234 = tpu.dynamic_rotate %221 by %c1_i32_66 dim 1 : vector<8x256xf32>, i32 -> vector<8x256xf32>
    %235 = vector.extract_strided_slice %0 {offsets = [3, 0], sizes = [1, 256], strides = [1, 1]} : vector<9x256xf32> to vector<1x256xf32>
    %236 = vector.broadcast %235 : vector<1x256xf32> to vector<8x256xf32>
    %237 = arith.mulf %234, %236 : vector<8x256xf32>
    %c255_i32_67 = arith.constant 255 : i32
    %238 = tpu.dynamic_rotate %221 by %c255_i32_67 dim 1 : vector<8x256xf32>, i32 -> vector<8x256xf32>
    %239 = vector.extract_strided_slice %0 {offsets = [5, 0], sizes = [1, 256], strides = [1, 1]} : vector<9x256xf32> to vector<1x256xf32>
    %240 = vector.broadcast %239 : vector<1x256xf32> to vector<8x256xf32>
    %241 = arith.mulf %238, %240 : vector<8x256xf32>
    %c241_i32_68 = arith.constant 241 : i32
    %242 = tpu.dynamic_rotate %221 by %c241_i32_68 dim 1 : vector<8x256xf32>, i32 -> vector<8x256xf32>
    %243 = vector.extract_strided_slice %0 {offsets = [6, 0], sizes = [1, 256], strides = [1, 1]} : vector<9x256xf32> to vector<1x256xf32>
    %244 = vector.broadcast %243 : vector<1x256xf32> to vector<8x256xf32>
    %245 = arith.mulf %242, %244 : vector<8x256xf32>
    %c240_i32_69 = arith.constant 240 : i32
    %246 = tpu.dynamic_rotate %221 by %c240_i32_69 dim 1 : vector<8x256xf32>, i32 -> vector<8x256xf32>
    %247 = vector.extract_strided_slice %0 {offsets = [7, 0], sizes = [1, 256], strides = [1, 1]} : vector<9x256xf32> to vector<1x256xf32>
    %248 = vector.broadcast %247 : vector<1x256xf32> to vector<8x256xf32>
    %249 = arith.mulf %246, %248 : vector<8x256xf32>
    %c239_i32_70 = arith.constant 239 : i32
    %250 = tpu.dynamic_rotate %221 by %c239_i32_70 dim 1 : vector<8x256xf32>, i32 -> vector<8x256xf32>
    %251 = vector.extract_strided_slice %0 {offsets = [8, 0], sizes = [1, 256], strides = [1, 1]} : vector<9x256xf32> to vector<1x256xf32>
    %252 = vector.broadcast %251 : vector<1x256xf32> to vector<8x256xf32>
    %253 = arith.mulf %250, %252 : vector<8x256xf32>
    %254 = tpu.concatenate %225, %229, %233, %237, %221, %241, %245, %249, %253 in 0 : vector<8x256xf32>, vector<8x256xf32>, vector<8x256xf32>, vector<8x256xf32>, vector<8x256xf32>, vector<8x256xf32>, vector<8x256xf32>, vector<8x256xf32>, vector<8x256xf32> -> vector<72x256xf32>
    %255 = arith.truncf %254 : vector<72x256xf32> to vector<72x256xbf16>
    %c0_71 = arith.constant 0 : index
    %c0_72 = arith.constant 0 : index
    %256 = vector.load %arg17[%c0_71, %c0_72] : memref<8x72xbf16, #tpu.memory_space<vmem>>, vector<8x72xbf16>
    %cst_73 = arith.constant dense<0.000000e+00> : vector<8x256xf32>
    %257 = tpu.matmul %256, %255, %cst_73 {dimension_numbers = #tpu.dot_dimension_numbers<[1], [0], [0], [1], [0, 0, 1, 1], [], []>} : vector<8x72xbf16>, vector<72x256xbf16>, vector<8x256xf32> -> vector<8x256xf32>
    %258 = arith.addf %220, %257 : vector<8x256xf32>
    %259 = math.tanh %258 : vector<8x256xf32>
    %260 = arith.mulf %219, %94 : vector<8x256xf32>
    %cst_74 = arith.constant 1.000000e+00 : f32
    %261 = vector.broadcast %cst_74 : f32 to vector<8x256xf32>
    %262 = arith.subf %261, %219 : vector<8x256xf32>
    %263 = arith.mulf %262, %259 : vector<8x256xf32>
    %264 = arith.addf %260, %263 : vector<8x256xf32>
    %c17_i32_75 = arith.constant 17 : i32
    %265 = tpu.dynamic_rotate %135 by %c17_i32_75 dim 1 : vector<8x256xf32>, i32 -> vector<8x256xf32>
    %266 = vector.extract_strided_slice %0 {offsets = [0, 0], sizes = [1, 256], strides = [1, 1]} : vector<9x256xf32> to vector<1x256xf32>
    %267 = vector.broadcast %266 : vector<1x256xf32> to vector<8x256xf32>
    %268 = arith.mulf %265, %267 : vector<8x256xf32>
    %c16_i32_76 = arith.constant 16 : i32
    %269 = tpu.dynamic_rotate %135 by %c16_i32_76 dim 1 : vector<8x256xf32>, i32 -> vector<8x256xf32>
    %270 = vector.extract_strided_slice %0 {offsets = [1, 0], sizes = [1, 256], strides = [1, 1]} : vector<9x256xf32> to vector<1x256xf32>
    %271 = vector.broadcast %270 : vector<1x256xf32> to vector<8x256xf32>
    %272 = arith.mulf %269, %271 : vector<8x256xf32>
    %c15_i32_77 = arith.constant 15 : i32
    %273 = tpu.dynamic_rotate %135 by %c15_i32_77 dim 1 : vector<8x256xf32>, i32 -> vector<8x256xf32>
    %274 = vector.extract_strided_slice %0 {offsets = [2, 0], sizes = [1, 256], strides = [1, 1]} : vector<9x256xf32> to vector<1x256xf32>
    %275 = vector.broadcast %274 : vector<1x256xf32> to vector<8x256xf32>
    %276 = arith.mulf %273, %275 : vector<8x256xf32>
    %c1_i32_78 = arith.constant 1 : i32
    %277 = tpu.dynamic_rotate %135 by %c1_i32_78 dim 1 : vector<8x256xf32>, i32 -> vector<8x256xf32>
    %278 = vector.extract_strided_slice %0 {offsets = [3, 0], sizes = [1, 256], strides = [1, 1]} : vector<9x256xf32> to vector<1x256xf32>
    %279 = vector.broadcast %278 : vector<1x256xf32> to vector<8x256xf32>
    %280 = arith.mulf %277, %279 : vector<8x256xf32>
    %c255_i32_79 = arith.constant 255 : i32
    %281 = tpu.dynamic_rotate %135 by %c255_i32_79 dim 1 : vector<8x256xf32>, i32 -> vector<8x256xf32>
    %282 = vector.extract_strided_slice %0 {offsets = [5, 0], sizes = [1, 256], strides = [1, 1]} : vector<9x256xf32> to vector<1x256xf32>
    %283 = vector.broadcast %282 : vector<1x256xf32> to vector<8x256xf32>
    %284 = arith.mulf %281, %283 : vector<8x256xf32>
    %c241_i32_80 = arith.constant 241 : i32
    %285 = tpu.dynamic_rotate %135 by %c241_i32_80 dim 1 : vector<8x256xf32>, i32 -> vector<8x256xf32>
    %286 = vector.extract_strided_slice %0 {offsets = [6, 0], sizes = [1, 256], strides = [1, 1]} : vector<9x256xf32> to vector<1x256xf32>
    %287 = vector.broadcast %286 : vector<1x256xf32> to vector<8x256xf32>
    %288 = arith.mulf %285, %287 : vector<8x256xf32>
    %c240_i32_81 = arith.constant 240 : i32
    %289 = tpu.dynamic_rotate %135 by %c240_i32_81 dim 1 : vector<8x256xf32>, i32 -> vector<8x256xf32>
    %290 = vector.extract_strided_slice %0 {offsets = [7, 0], sizes = [1, 256], strides = [1, 1]} : vector<9x256xf32> to vector<1x256xf32>
    %291 = vector.broadcast %290 : vector<1x256xf32> to vector<8x256xf32>
    %292 = arith.mulf %289, %291 : vector<8x256xf32>
    %c239_i32_82 = arith.constant 239 : i32
    %293 = tpu.dynamic_rotate %135 by %c239_i32_82 dim 1 : vector<8x256xf32>, i32 -> vector<8x256xf32>
    %294 = vector.extract_strided_slice %0 {offsets = [8, 0], sizes = [1, 256], strides = [1, 1]} : vector<9x256xf32> to vector<1x256xf32>
    %295 = vector.broadcast %294 : vector<1x256xf32> to vector<8x256xf32>
    %296 = arith.mulf %293, %295 : vector<8x256xf32>
    %297 = tpu.concatenate %268, %272, %276, %280, %135, %284, %288, %292, %296 in 0 : vector<8x256xf32>, vector<8x256xf32>, vector<8x256xf32>, vector<8x256xf32>, vector<8x256xf32>, vector<8x256xf32>, vector<8x256xf32>, vector<8x256xf32>, vector<8x256xf32> -> vector<72x256xf32>
    %298 = arith.truncf %297 : vector<72x256xf32> to vector<72x256xbf16>
    %c0_83 = arith.constant 0 : index
    %c0_84 = arith.constant 0 : index
    %299 = vector.load %arg5[%c0_83, %c0_84] : memref<8x72xbf16, #tpu.memory_space<vmem>>, vector<8x72xbf16>
    %cst_85 = arith.constant dense<0.000000e+00> : vector<8x256xf32>
    %300 = tpu.matmul %299, %298, %cst_85 {dimension_numbers = #tpu.dot_dimension_numbers<[1], [0], [0], [1], [0, 0, 1, 1], [], []>} : vector<8x72xbf16>, vector<72x256xbf16>, vector<8x256xf32> -> vector<8x256xf32>
    %c0_86 = arith.constant 0 : index
    %c0_87 = arith.constant 0 : index
    %301 = vector.load %arg8[%c0_86, %c0_87] : memref<8x1xf32, #tpu.memory_space<vmem>>, vector<8x1xf32>
    %302 = vector.broadcast %301 : vector<8x1xf32> to vector<8x256xf32>
    %303 = arith.addf %300, %302 : vector<8x256xf32>
    %cst_88 = arith.constant 0.000000e+00 : f32
    %304 = vector.broadcast %cst_88 : f32 to vector<8x256xf32>
    %305 = arith.maximumf %303, %304 : vector<8x256xf32>
    %c17_i32_89 = arith.constant 17 : i32
    %306 = tpu.dynamic_rotate %305 by %c17_i32_89 dim 1 : vector<8x256xf32>, i32 -> vector<8x256xf32>
    %307 = vector.extract_strided_slice %0 {offsets = [0, 0], sizes = [1, 256], strides = [1, 1]} : vector<9x256xf32> to vector<1x256xf32>
    %308 = vector.broadcast %307 : vector<1x256xf32> to vector<8x256xf32>
    %309 = arith.mulf %306, %308 : vector<8x256xf32>
    %c16_i32_90 = arith.constant 16 : i32
    %310 = tpu.dynamic_rotate %305 by %c16_i32_90 dim 1 : vector<8x256xf32>, i32 -> vector<8x256xf32>
    %311 = vector.extract_strided_slice %0 {offsets = [1, 0], sizes = [1, 256], strides = [1, 1]} : vector<9x256xf32> to vector<1x256xf32>
    %312 = vector.broadcast %311 : vector<1x256xf32> to vector<8x256xf32>
    %313 = arith.mulf %310, %312 : vector<8x256xf32>
    %c15_i32_91 = arith.constant 15 : i32
    %314 = tpu.dynamic_rotate %305 by %c15_i32_91 dim 1 : vector<8x256xf32>, i32 -> vector<8x256xf32>
    %315 = vector.extract_strided_slice %0 {offsets = [2, 0], sizes = [1, 256], strides = [1, 1]} : vector<9x256xf32> to vector<1x256xf32>
    %316 = vector.broadcast %315 : vector<1x256xf32> to vector<8x256xf32>
    %317 = arith.mulf %314, %316 : vector<8x256xf32>
    %c1_i32_92 = arith.constant 1 : i32
    %318 = tpu.dynamic_rotate %305 by %c1_i32_92 dim 1 : vector<8x256xf32>, i32 -> vector<8x256xf32>
    %319 = vector.extract_strided_slice %0 {offsets = [3, 0], sizes = [1, 256], strides = [1, 1]} : vector<9x256xf32> to vector<1x256xf32>
    %320 = vector.broadcast %319 : vector<1x256xf32> to vector<8x256xf32>
    %321 = arith.mulf %318, %320 : vector<8x256xf32>
    %c255_i32_93 = arith.constant 255 : i32
    %322 = tpu.dynamic_rotate %305 by %c255_i32_93 dim 1 : vector<8x256xf32>, i32 -> vector<8x256xf32>
    %323 = vector.extract_strided_slice %0 {offsets = [5, 0], sizes = [1, 256], strides = [1, 1]} : vector<9x256xf32> to vector<1x256xf32>
    %324 = vector.broadcast %323 : vector<1x256xf32> to vector<8x256xf32>
    %325 = arith.mulf %322, %324 : vector<8x256xf32>
    %c241_i32_94 = arith.constant 241 : i32
    %326 = tpu.dynamic_rotate %305 by %c241_i32_94 dim 1 : vector<8x256xf32>, i32 -> vector<8x256xf32>
    %327 = vector.extract_strided_slice %0 {offsets = [6, 0], sizes = [1, 256], strides = [1, 1]} : vector<9x256xf32> to vector<1x256xf32>
    %328 = vector.broadcast %327 : vector<1x256xf32> to vector<8x256xf32>
    %329 = arith.mulf %326, %328 : vector<8x256xf32>
    %c240_i32_95 = arith.constant 240 : i32
    %330 = tpu.dynamic_rotate %305 by %c240_i32_95 dim 1 : vector<8x256xf32>, i32 -> vector<8x256xf32>
    %331 = vector.extract_strided_slice %0 {offsets = [7, 0], sizes = [1, 256], strides = [1, 1]} : vector<9x256xf32> to vector<1x256xf32>
    %332 = vector.broadcast %331 : vector<1x256xf32> to vector<8x256xf32>
    %333 = arith.mulf %330, %332 : vector<8x256xf32>
    %c239_i32_96 = arith.constant 239 : i32
    %334 = tpu.dynamic_rotate %305 by %c239_i32_96 dim 1 : vector<8x256xf32>, i32 -> vector<8x256xf32>
    %335 = vector.extract_strided_slice %0 {offsets = [8, 0], sizes = [1, 256], strides = [1, 1]} : vector<9x256xf32> to vector<1x256xf32>
    %336 = vector.broadcast %335 : vector<1x256xf32> to vector<8x256xf32>
    %337 = arith.mulf %334, %336 : vector<8x256xf32>
    %338 = tpu.concatenate %309, %313, %317, %321, %305, %325, %329, %333, %337 in 0 : vector<8x256xf32>, vector<8x256xf32>, vector<8x256xf32>, vector<8x256xf32>, vector<8x256xf32>, vector<8x256xf32>, vector<8x256xf32>, vector<8x256xf32>, vector<8x256xf32> -> vector<72x256xf32>
    %339 = arith.truncf %338 : vector<72x256xf32> to vector<72x256xbf16>
    %c0_97 = arith.constant 0 : index
    %c0_98 = arith.constant 0 : index
    %340 = vector.load %arg15[%c0_97, %c0_98] : memref<24x72xbf16, #tpu.memory_space<vmem>>, vector<24x72xbf16>
    %cst_99 = arith.constant dense<0.000000e+00> : vector<24x256xf32>
    %341 = tpu.matmul %340, %339, %cst_99 {dimension_numbers = #tpu.dot_dimension_numbers<[1], [0], [0], [1], [0, 0, 1, 1], [], []>} : vector<24x72xbf16>, vector<72x256xbf16>, vector<24x256xf32> -> vector<24x256xf32>
    %c0_100 = arith.constant 0 : index
    %c0_101 = arith.constant 0 : index
    %342 = vector.load %arg18[%c0_100, %c0_101] : memref<24x1xf32, #tpu.memory_space<vmem>>, vector<24x1xf32>
    %343 = vector.broadcast %342 : vector<24x1xf32> to vector<24x256xf32>
    %344 = arith.addf %341, %343 : vector<24x256xf32>
    %345 = vector.extract_strided_slice %344 {offsets = [0, 0], sizes = [16, 256], strides = [1, 1]} : vector<24x256xf32> to vector<16x256xf32>
    %c17_i32_102 = arith.constant 17 : i32
    %346 = tpu.dynamic_rotate %264 by %c17_i32_102 dim 1 : vector<8x256xf32>, i32 -> vector<8x256xf32>
    %347 = vector.extract_strided_slice %0 {offsets = [0, 0], sizes = [1, 256], strides = [1, 1]} : vector<9x256xf32> to vector<1x256xf32>
    %348 = vector.broadcast %347 : vector<1x256xf32> to vector<8x256xf32>
    %349 = arith.mulf %346, %348 : vector<8x256xf32>
    %c16_i32_103 = arith.constant 16 : i32
    %350 = tpu.dynamic_rotate %264 by %c16_i32_103 dim 1 : vector<8x256xf32>, i32 -> vector<8x256xf32>
    %351 = vector.extract_strided_slice %0 {offsets = [1, 0], sizes = [1, 256], strides = [1, 1]} : vector<9x256xf32> to vector<1x256xf32>
    %352 = vector.broadcast %351 : vector<1x256xf32> to vector<8x256xf32>
    %353 = arith.mulf %350, %352 : vector<8x256xf32>
    %c15_i32_104 = arith.constant 15 : i32
    %354 = tpu.dynamic_rotate %264 by %c15_i32_104 dim 1 : vector<8x256xf32>, i32 -> vector<8x256xf32>
    %355 = vector.extract_strided_slice %0 {offsets = [2, 0], sizes = [1, 256], strides = [1, 1]} : vector<9x256xf32> to vector<1x256xf32>
    %356 = vector.broadcast %355 : vector<1x256xf32> to vector<8x256xf32>
    %357 = arith.mulf %354, %356 : vector<8x256xf32>
    %c1_i32_105 = arith.constant 1 : i32
    %358 = tpu.dynamic_rotate %264 by %c1_i32_105 dim 1 : vector<8x256xf32>, i32 -> vector<8x256xf32>
    %359 = vector.extract_strided_slice %0 {offsets = [3, 0], sizes = [1, 256], strides = [1, 1]} : vector<9x256xf32> to vector<1x256xf32>
    %360 = vector.broadcast %359 : vector<1x256xf32> to vector<8x256xf32>
    %361 = arith.mulf %358, %360 : vector<8x256xf32>
    %c255_i32_106 = arith.constant 255 : i32
    %362 = tpu.dynamic_rotate %264 by %c255_i32_106 dim 1 : vector<8x256xf32>, i32 -> vector<8x256xf32>
    %363 = vector.extract_strided_slice %0 {offsets = [5, 0], sizes = [1, 256], strides = [1, 1]} : vector<9x256xf32> to vector<1x256xf32>
    %364 = vector.broadcast %363 : vector<1x256xf32> to vector<8x256xf32>
    %365 = arith.mulf %362, %364 : vector<8x256xf32>
    %c241_i32_107 = arith.constant 241 : i32
    %366 = tpu.dynamic_rotate %264 by %c241_i32_107 dim 1 : vector<8x256xf32>, i32 -> vector<8x256xf32>
    %367 = vector.extract_strided_slice %0 {offsets = [6, 0], sizes = [1, 256], strides = [1, 1]} : vector<9x256xf32> to vector<1x256xf32>
    %368 = vector.broadcast %367 : vector<1x256xf32> to vector<8x256xf32>
    %369 = arith.mulf %366, %368 : vector<8x256xf32>
    %c240_i32_108 = arith.constant 240 : i32
    %370 = tpu.dynamic_rotate %264 by %c240_i32_108 dim 1 : vector<8x256xf32>, i32 -> vector<8x256xf32>
    %371 = vector.extract_strided_slice %0 {offsets = [7, 0], sizes = [1, 256], strides = [1, 1]} : vector<9x256xf32> to vector<1x256xf32>
    %372 = vector.broadcast %371 : vector<1x256xf32> to vector<8x256xf32>
    %373 = arith.mulf %370, %372 : vector<8x256xf32>
    %c239_i32_109 = arith.constant 239 : i32
    %374 = tpu.dynamic_rotate %264 by %c239_i32_109 dim 1 : vector<8x256xf32>, i32 -> vector<8x256xf32>
    %375 = vector.extract_strided_slice %0 {offsets = [8, 0], sizes = [1, 256], strides = [1, 1]} : vector<9x256xf32> to vector<1x256xf32>
    %376 = vector.broadcast %375 : vector<1x256xf32> to vector<8x256xf32>
    %377 = arith.mulf %374, %376 : vector<8x256xf32>
    %378 = tpu.concatenate %349, %353, %357, %361, %264, %365, %369, %373, %377 in 0 : vector<8x256xf32>, vector<8x256xf32>, vector<8x256xf32>, vector<8x256xf32>, vector<8x256xf32>, vector<8x256xf32>, vector<8x256xf32>, vector<8x256xf32>, vector<8x256xf32> -> vector<72x256xf32>
    %379 = arith.truncf %378 : vector<72x256xf32> to vector<72x256xbf16>
    %c0_110 = arith.constant 0 : index
    %c0_111 = arith.constant 0 : index
    %380 = vector.load %arg16[%c0_110, %c0_111] : memref<16x72xbf16, #tpu.memory_space<vmem>>, vector<16x72xbf16>
    %cst_112 = arith.constant dense<0.000000e+00> : vector<16x256xf32>
    %381 = tpu.matmul %380, %379, %cst_112 {dimension_numbers = #tpu.dot_dimension_numbers<[1], [0], [0], [1], [0, 0, 1, 1], [], []>} : vector<16x72xbf16>, vector<72x256xbf16>, vector<16x256xf32> -> vector<16x256xf32>
    %382 = arith.addf %345, %381 : vector<16x256xf32>
    %383 = arith.negf %382 : vector<16x256xf32>
    %384 = math.exp %383 : vector<16x256xf32>
    %cst_113 = arith.constant 1.000000e+00 : f32
    %385 = vector.broadcast %cst_113 : f32 to vector<16x256xf32>
    %386 = arith.addf %385, %384 : vector<16x256xf32>
    %387 = arith.divf %385, %386 : vector<16x256xf32>
    %388 = vector.extract_strided_slice %387 {offsets = [0, 0], sizes = [8, 256], strides = [1, 1]} : vector<16x256xf32> to vector<8x256xf32>
    %389 = vector.extract_strided_slice %387 {offsets = [8, 0], sizes = [8, 256], strides = [1, 1]} : vector<16x256xf32> to vector<8x256xf32>
    %390 = vector.extract_strided_slice %344 {offsets = [16, 0], sizes = [8, 256], strides = [1, 1]} : vector<24x256xf32> to vector<8x256xf32>
    %391 = arith.mulf %388, %264 : vector<8x256xf32>
    %c17_i32_114 = arith.constant 17 : i32
    %392 = tpu.dynamic_rotate %391 by %c17_i32_114 dim 1 : vector<8x256xf32>, i32 -> vector<8x256xf32>
    %393 = vector.extract_strided_slice %0 {offsets = [0, 0], sizes = [1, 256], strides = [1, 1]} : vector<9x256xf32> to vector<1x256xf32>
    %394 = vector.broadcast %393 : vector<1x256xf32> to vector<8x256xf32>
    %395 = arith.mulf %392, %394 : vector<8x256xf32>
    %c16_i32_115 = arith.constant 16 : i32
    %396 = tpu.dynamic_rotate %391 by %c16_i32_115 dim 1 : vector<8x256xf32>, i32 -> vector<8x256xf32>
    %397 = vector.extract_strided_slice %0 {offsets = [1, 0], sizes = [1, 256], strides = [1, 1]} : vector<9x256xf32> to vector<1x256xf32>
    %398 = vector.broadcast %397 : vector<1x256xf32> to vector<8x256xf32>
    %399 = arith.mulf %396, %398 : vector<8x256xf32>
    %c15_i32_116 = arith.constant 15 : i32
    %400 = tpu.dynamic_rotate %391 by %c15_i32_116 dim 1 : vector<8x256xf32>, i32 -> vector<8x256xf32>
    %401 = vector.extract_strided_slice %0 {offsets = [2, 0], sizes = [1, 256], strides = [1, 1]} : vector<9x256xf32> to vector<1x256xf32>
    %402 = vector.broadcast %401 : vector<1x256xf32> to vector<8x256xf32>
    %403 = arith.mulf %400, %402 : vector<8x256xf32>
    %c1_i32_117 = arith.constant 1 : i32
    %404 = tpu.dynamic_rotate %391 by %c1_i32_117 dim 1 : vector<8x256xf32>, i32 -> vector<8x256xf32>
    %405 = vector.extract_strided_slice %0 {offsets = [3, 0], sizes = [1, 256], strides = [1, 1]} : vector<9x256xf32> to vector<1x256xf32>
    %406 = vector.broadcast %405 : vector<1x256xf32> to vector<8x256xf32>
    %407 = arith.mulf %404, %406 : vector<8x256xf32>
    %c255_i32_118 = arith.constant 255 : i32
    %408 = tpu.dynamic_rotate %391 by %c255_i32_118 dim 1 : vector<8x256xf32>, i32 -> vector<8x256xf32>
    %409 = vector.extract_strided_slice %0 {offsets = [5, 0], sizes = [1, 256], strides = [1, 1]} : vector<9x256xf32> to vector<1x256xf32>
    %410 = vector.broadcast %409 : vector<1x256xf32> to vector<8x256xf32>
    %411 = arith.mulf %408, %410 : vector<8x256xf32>
    %c241_i32_119 = arith.constant 241 : i32
    %412 = tpu.dynamic_rotate %391 by %c241_i32_119 dim 1 : vector<8x256xf32>, i32 -> vector<8x256xf32>
    %413 = vector.extract_strided_slice %0 {offsets = [6, 0], sizes = [1, 256], strides = [1, 1]} : vector<9x256xf32> to vector<1x256xf32>
    %414 = vector.broadcast %413 : vector<1x256xf32> to vector<8x256xf32>
    %415 = arith.mulf %412, %414 : vector<8x256xf32>
    %c240_i32_120 = arith.constant 240 : i32
    %416 = tpu.dynamic_rotate %391 by %c240_i32_120 dim 1 : vector<8x256xf32>, i32 -> vector<8x256xf32>
    %417 = vector.extract_strided_slice %0 {offsets = [7, 0], sizes = [1, 256], strides = [1, 1]} : vector<9x256xf32> to vector<1x256xf32>
    %418 = vector.broadcast %417 : vector<1x256xf32> to vector<8x256xf32>
    %419 = arith.mulf %416, %418 : vector<8x256xf32>
    %c239_i32_121 = arith.constant 239 : i32
    %420 = tpu.dynamic_rotate %391 by %c239_i32_121 dim 1 : vector<8x256xf32>, i32 -> vector<8x256xf32>
    %421 = vector.extract_strided_slice %0 {offsets = [8, 0], sizes = [1, 256], strides = [1, 1]} : vector<9x256xf32> to vector<1x256xf32>
    %422 = vector.broadcast %421 : vector<1x256xf32> to vector<8x256xf32>
    %423 = arith.mulf %420, %422 : vector<8x256xf32>
    %424 = tpu.concatenate %395, %399, %403, %407, %391, %411, %415, %419, %423 in 0 : vector<8x256xf32>, vector<8x256xf32>, vector<8x256xf32>, vector<8x256xf32>, vector<8x256xf32>, vector<8x256xf32>, vector<8x256xf32>, vector<8x256xf32>, vector<8x256xf32> -> vector<72x256xf32>
    %425 = arith.truncf %424 : vector<72x256xf32> to vector<72x256xbf16>
    %c0_122 = arith.constant 0 : index
    %c0_123 = arith.constant 0 : index
    %426 = vector.load %arg17[%c0_122, %c0_123] : memref<8x72xbf16, #tpu.memory_space<vmem>>, vector<8x72xbf16>
    %cst_124 = arith.constant dense<0.000000e+00> : vector<8x256xf32>
    %427 = tpu.matmul %426, %425, %cst_124 {dimension_numbers = #tpu.dot_dimension_numbers<[1], [0], [0], [1], [0, 0, 1, 1], [], []>} : vector<8x72xbf16>, vector<72x256xbf16>, vector<8x256xf32> -> vector<8x256xf32>
    %428 = arith.addf %390, %427 : vector<8x256xf32>
    %429 = math.tanh %428 : vector<8x256xf32>
    %430 = arith.mulf %389, %264 : vector<8x256xf32>
    %cst_125 = arith.constant 1.000000e+00 : f32
    %431 = vector.broadcast %cst_125 : f32 to vector<8x256xf32>
    %432 = arith.subf %431, %389 : vector<8x256xf32>
    %433 = arith.mulf %432, %429 : vector<8x256xf32>
    %434 = arith.addf %430, %433 : vector<8x256xf32>
    %c17_i32_126 = arith.constant 17 : i32
    %435 = tpu.dynamic_rotate %434 by %c17_i32_126 dim 1 : vector<8x256xf32>, i32 -> vector<8x256xf32>
    %436 = vector.extract_strided_slice %0 {offsets = [0, 0], sizes = [1, 256], strides = [1, 1]} : vector<9x256xf32> to vector<1x256xf32>
    %437 = vector.broadcast %436 : vector<1x256xf32> to vector<8x256xf32>
    %438 = arith.mulf %435, %437 : vector<8x256xf32>
    %c16_i32_127 = arith.constant 16 : i32
    %439 = tpu.dynamic_rotate %434 by %c16_i32_127 dim 1 : vector<8x256xf32>, i32 -> vector<8x256xf32>
    %440 = vector.extract_strided_slice %0 {offsets = [1, 0], sizes = [1, 256], strides = [1, 1]} : vector<9x256xf32> to vector<1x256xf32>
    %441 = vector.broadcast %440 : vector<1x256xf32> to vector<8x256xf32>
    %442 = arith.mulf %439, %441 : vector<8x256xf32>
    %c15_i32_128 = arith.constant 15 : i32
    %443 = tpu.dynamic_rotate %434 by %c15_i32_128 dim 1 : vector<8x256xf32>, i32 -> vector<8x256xf32>
    %444 = vector.extract_strided_slice %0 {offsets = [2, 0], sizes = [1, 256], strides = [1, 1]} : vector<9x256xf32> to vector<1x256xf32>
    %445 = vector.broadcast %444 : vector<1x256xf32> to vector<8x256xf32>
    %446 = arith.mulf %443, %445 : vector<8x256xf32>
    %c1_i32_129 = arith.constant 1 : i32
    %447 = tpu.dynamic_rotate %434 by %c1_i32_129 dim 1 : vector<8x256xf32>, i32 -> vector<8x256xf32>
    %448 = vector.extract_strided_slice %0 {offsets = [3, 0], sizes = [1, 256], strides = [1, 1]} : vector<9x256xf32> to vector<1x256xf32>
    %449 = vector.broadcast %448 : vector<1x256xf32> to vector<8x256xf32>
    %450 = arith.mulf %447, %449 : vector<8x256xf32>
    %c255_i32_130 = arith.constant 255 : i32
    %451 = tpu.dynamic_rotate %434 by %c255_i32_130 dim 1 : vector<8x256xf32>, i32 -> vector<8x256xf32>
    %452 = vector.extract_strided_slice %0 {offsets = [5, 0], sizes = [1, 256], strides = [1, 1]} : vector<9x256xf32> to vector<1x256xf32>
    %453 = vector.broadcast %452 : vector<1x256xf32> to vector<8x256xf32>
    %454 = arith.mulf %451, %453 : vector<8x256xf32>
    %c241_i32_131 = arith.constant 241 : i32
    %455 = tpu.dynamic_rotate %434 by %c241_i32_131 dim 1 : vector<8x256xf32>, i32 -> vector<8x256xf32>
    %456 = vector.extract_strided_slice %0 {offsets = [6, 0], sizes = [1, 256], strides = [1, 1]} : vector<9x256xf32> to vector<1x256xf32>
    %457 = vector.broadcast %456 : vector<1x256xf32> to vector<8x256xf32>
    %458 = arith.mulf %455, %457 : vector<8x256xf32>
    %c240_i32_132 = arith.constant 240 : i32
    %459 = tpu.dynamic_rotate %434 by %c240_i32_132 dim 1 : vector<8x256xf32>, i32 -> vector<8x256xf32>
    %460 = vector.extract_strided_slice %0 {offsets = [7, 0], sizes = [1, 256], strides = [1, 1]} : vector<9x256xf32> to vector<1x256xf32>
    %461 = vector.broadcast %460 : vector<1x256xf32> to vector<8x256xf32>
    %462 = arith.mulf %459, %461 : vector<8x256xf32>
    %c239_i32_133 = arith.constant 239 : i32
    %463 = tpu.dynamic_rotate %434 by %c239_i32_133 dim 1 : vector<8x256xf32>, i32 -> vector<8x256xf32>
    %464 = vector.extract_strided_slice %0 {offsets = [8, 0], sizes = [1, 256], strides = [1, 1]} : vector<9x256xf32> to vector<1x256xf32>
    %465 = vector.broadcast %464 : vector<1x256xf32> to vector<8x256xf32>
    %466 = arith.mulf %463, %465 : vector<8x256xf32>
    %467 = tpu.concatenate %438, %442, %446, %450, %434, %454, %458, %462, %466 in 0 : vector<8x256xf32>, vector<8x256xf32>, vector<8x256xf32>, vector<8x256xf32>, vector<8x256xf32>, vector<8x256xf32>, vector<8x256xf32>, vector<8x256xf32>, vector<8x256xf32> -> vector<72x256xf32>
    %468 = arith.truncf %467 : vector<72x256xf32> to vector<72x256xbf16>
    %c0_134 = arith.constant 0 : index
    %c0_135 = arith.constant 0 : index
    %469 = vector.load %arg11[%c0_134, %c0_135] : memref<8x72xbf16, #tpu.memory_space<vmem>>, vector<8x72xbf16>
    %cst_136 = arith.constant dense<0.000000e+00> : vector<8x256xf32>
    %470 = tpu.matmul %469, %468, %cst_136 {dimension_numbers = #tpu.dot_dimension_numbers<[1], [0], [0], [1], [0, 0, 1, 1], [], []>} : vector<8x72xbf16>, vector<72x256xbf16>, vector<8x256xf32> -> vector<8x256xf32>
    %c0_137 = arith.constant 0 : index
    %c0_138 = arith.constant 0 : index
    %471 = vector.load %arg14[%c0_137, %c0_138] : memref<8x1xf32, #tpu.memory_space<vmem>>, vector<8x1xf32>
    %472 = vector.broadcast %471 : vector<8x1xf32> to vector<8x256xf32>
    %473 = arith.addf %470, %472 : vector<8x256xf32>
    %cst_139 = arith.constant 0.000000e+00 : f32
    %474 = vector.broadcast %cst_139 : f32 to vector<8x256xf32>
    %475 = arith.maximumf %473, %474 : vector<8x256xf32>
    %476 = arith.addf %475, %264 : vector<8x256xf32>
    %c17_i32_140 = arith.constant 17 : i32
    %477 = tpu.dynamic_rotate %476 by %c17_i32_140 dim 1 : vector<8x256xf32>, i32 -> vector<8x256xf32>
    %478 = vector.extract_strided_slice %0 {offsets = [0, 0], sizes = [1, 256], strides = [1, 1]} : vector<9x256xf32> to vector<1x256xf32>
    %479 = vector.broadcast %478 : vector<1x256xf32> to vector<8x256xf32>
    %480 = arith.mulf %477, %479 : vector<8x256xf32>
    %c16_i32_141 = arith.constant 16 : i32
    %481 = tpu.dynamic_rotate %476 by %c16_i32_141 dim 1 : vector<8x256xf32>, i32 -> vector<8x256xf32>
    %482 = vector.extract_strided_slice %0 {offsets = [1, 0], sizes = [1, 256], strides = [1, 1]} : vector<9x256xf32> to vector<1x256xf32>
    %483 = vector.broadcast %482 : vector<1x256xf32> to vector<8x256xf32>
    %484 = arith.mulf %481, %483 : vector<8x256xf32>
    %c15_i32_142 = arith.constant 15 : i32
    %485 = tpu.dynamic_rotate %476 by %c15_i32_142 dim 1 : vector<8x256xf32>, i32 -> vector<8x256xf32>
    %486 = vector.extract_strided_slice %0 {offsets = [2, 0], sizes = [1, 256], strides = [1, 1]} : vector<9x256xf32> to vector<1x256xf32>
    %487 = vector.broadcast %486 : vector<1x256xf32> to vector<8x256xf32>
    %488 = arith.mulf %485, %487 : vector<8x256xf32>
    %c1_i32_143 = arith.constant 1 : i32
    %489 = tpu.dynamic_rotate %476 by %c1_i32_143 dim 1 : vector<8x256xf32>, i32 -> vector<8x256xf32>
    %490 = vector.extract_strided_slice %0 {offsets = [3, 0], sizes = [1, 256], strides = [1, 1]} : vector<9x256xf32> to vector<1x256xf32>
    %491 = vector.broadcast %490 : vector<1x256xf32> to vector<8x256xf32>
    %492 = arith.mulf %489, %491 : vector<8x256xf32>
    %c255_i32_144 = arith.constant 255 : i32
    %493 = tpu.dynamic_rotate %476 by %c255_i32_144 dim 1 : vector<8x256xf32>, i32 -> vector<8x256xf32>
    %494 = vector.extract_strided_slice %0 {offsets = [5, 0], sizes = [1, 256], strides = [1, 1]} : vector<9x256xf32> to vector<1x256xf32>
    %495 = vector.broadcast %494 : vector<1x256xf32> to vector<8x256xf32>
    %496 = arith.mulf %493, %495 : vector<8x256xf32>
    %c241_i32_145 = arith.constant 241 : i32
    %497 = tpu.dynamic_rotate %476 by %c241_i32_145 dim 1 : vector<8x256xf32>, i32 -> vector<8x256xf32>
    %498 = vector.extract_strided_slice %0 {offsets = [6, 0], sizes = [1, 256], strides = [1, 1]} : vector<9x256xf32> to vector<1x256xf32>
    %499 = vector.broadcast %498 : vector<1x256xf32> to vector<8x256xf32>
    %500 = arith.mulf %497, %499 : vector<8x256xf32>
    %c240_i32_146 = arith.constant 240 : i32
    %501 = tpu.dynamic_rotate %476 by %c240_i32_146 dim 1 : vector<8x256xf32>, i32 -> vector<8x256xf32>
    %502 = vector.extract_strided_slice %0 {offsets = [7, 0], sizes = [1, 256], strides = [1, 1]} : vector<9x256xf32> to vector<1x256xf32>
    %503 = vector.broadcast %502 : vector<1x256xf32> to vector<8x256xf32>
    %504 = arith.mulf %501, %503 : vector<8x256xf32>
    %c239_i32_147 = arith.constant 239 : i32
    %505 = tpu.dynamic_rotate %476 by %c239_i32_147 dim 1 : vector<8x256xf32>, i32 -> vector<8x256xf32>
    %506 = vector.extract_strided_slice %0 {offsets = [8, 0], sizes = [1, 256], strides = [1, 1]} : vector<9x256xf32> to vector<1x256xf32>
    %507 = vector.broadcast %506 : vector<1x256xf32> to vector<8x256xf32>
    %508 = arith.mulf %505, %507 : vector<8x256xf32>
    %509 = tpu.concatenate %480, %484, %488, %492, %476, %496, %500, %504, %508 in 0 : vector<8x256xf32>, vector<8x256xf32>, vector<8x256xf32>, vector<8x256xf32>, vector<8x256xf32>, vector<8x256xf32>, vector<8x256xf32>, vector<8x256xf32>, vector<8x256xf32> -> vector<72x256xf32>
    %510 = arith.truncf %509 : vector<72x256xf32> to vector<72x256xbf16>
    %c0_148 = arith.constant 0 : index
    %c0_149 = arith.constant 0 : index
    %511 = vector.load %arg10[%c0_148, %c0_149] : memref<8x72xbf16, #tpu.memory_space<vmem>>, vector<8x72xbf16>
    %cst_150 = arith.constant dense<0.000000e+00> : vector<8x256xf32>
    %512 = tpu.matmul %511, %510, %cst_150 {dimension_numbers = #tpu.dot_dimension_numbers<[1], [0], [0], [1], [0, 0, 1, 1], [], []>} : vector<8x72xbf16>, vector<72x256xbf16>, vector<8x256xf32> -> vector<8x256xf32>
    %c0_151 = arith.constant 0 : index
    %c0_152 = arith.constant 0 : index
    %513 = vector.load %arg13[%c0_151, %c0_152] : memref<8x1xf32, #tpu.memory_space<vmem>>, vector<8x1xf32>
    %514 = vector.broadcast %513 : vector<8x1xf32> to vector<8x256xf32>
    %515 = arith.addf %512, %514 : vector<8x256xf32>
    %cst_153 = arith.constant 0.000000e+00 : f32
    %516 = vector.broadcast %cst_153 : f32 to vector<8x256xf32>
    %517 = arith.maximumf %515, %516 : vector<8x256xf32>
    %518 = arith.addf %517, %94 : vector<8x256xf32>
    %c17_i32_154 = arith.constant 17 : i32
    %519 = tpu.dynamic_rotate %518 by %c17_i32_154 dim 1 : vector<8x256xf32>, i32 -> vector<8x256xf32>
    %520 = vector.extract_strided_slice %0 {offsets = [0, 0], sizes = [1, 256], strides = [1, 1]} : vector<9x256xf32> to vector<1x256xf32>
    %521 = vector.broadcast %520 : vector<1x256xf32> to vector<8x256xf32>
    %522 = arith.mulf %519, %521 : vector<8x256xf32>
    %c16_i32_155 = arith.constant 16 : i32
    %523 = tpu.dynamic_rotate %518 by %c16_i32_155 dim 1 : vector<8x256xf32>, i32 -> vector<8x256xf32>
    %524 = vector.extract_strided_slice %0 {offsets = [1, 0], sizes = [1, 256], strides = [1, 1]} : vector<9x256xf32> to vector<1x256xf32>
    %525 = vector.broadcast %524 : vector<1x256xf32> to vector<8x256xf32>
    %526 = arith.mulf %523, %525 : vector<8x256xf32>
    %c15_i32_156 = arith.constant 15 : i32
    %527 = tpu.dynamic_rotate %518 by %c15_i32_156 dim 1 : vector<8x256xf32>, i32 -> vector<8x256xf32>
    %528 = vector.extract_strided_slice %0 {offsets = [2, 0], sizes = [1, 256], strides = [1, 1]} : vector<9x256xf32> to vector<1x256xf32>
    %529 = vector.broadcast %528 : vector<1x256xf32> to vector<8x256xf32>
    %530 = arith.mulf %527, %529 : vector<8x256xf32>
    %c1_i32_157 = arith.constant 1 : i32
    %531 = tpu.dynamic_rotate %518 by %c1_i32_157 dim 1 : vector<8x256xf32>, i32 -> vector<8x256xf32>
    %532 = vector.extract_strided_slice %0 {offsets = [3, 0], sizes = [1, 256], strides = [1, 1]} : vector<9x256xf32> to vector<1x256xf32>
    %533 = vector.broadcast %532 : vector<1x256xf32> to vector<8x256xf32>
    %534 = arith.mulf %531, %533 : vector<8x256xf32>
    %c255_i32_158 = arith.constant 255 : i32
    %535 = tpu.dynamic_rotate %518 by %c255_i32_158 dim 1 : vector<8x256xf32>, i32 -> vector<8x256xf32>
    %536 = vector.extract_strided_slice %0 {offsets = [5, 0], sizes = [1, 256], strides = [1, 1]} : vector<9x256xf32> to vector<1x256xf32>
    %537 = vector.broadcast %536 : vector<1x256xf32> to vector<8x256xf32>
    %538 = arith.mulf %535, %537 : vector<8x256xf32>
    %c241_i32_159 = arith.constant 241 : i32
    %539 = tpu.dynamic_rotate %518 by %c241_i32_159 dim 1 : vector<8x256xf32>, i32 -> vector<8x256xf32>
    %540 = vector.extract_strided_slice %0 {offsets = [6, 0], sizes = [1, 256], strides = [1, 1]} : vector<9x256xf32> to vector<1x256xf32>
    %541 = vector.broadcast %540 : vector<1x256xf32> to vector<8x256xf32>
    %542 = arith.mulf %539, %541 : vector<8x256xf32>
    %c240_i32_160 = arith.constant 240 : i32
    %543 = tpu.dynamic_rotate %518 by %c240_i32_160 dim 1 : vector<8x256xf32>, i32 -> vector<8x256xf32>
    %544 = vector.extract_strided_slice %0 {offsets = [7, 0], sizes = [1, 256], strides = [1, 1]} : vector<9x256xf32> to vector<1x256xf32>
    %545 = vector.broadcast %544 : vector<1x256xf32> to vector<8x256xf32>
    %546 = arith.mulf %543, %545 : vector<8x256xf32>
    %c239_i32_161 = arith.constant 239 : i32
    %547 = tpu.dynamic_rotate %518 by %c239_i32_161 dim 1 : vector<8x256xf32>, i32 -> vector<8x256xf32>
    %548 = vector.extract_strided_slice %0 {offsets = [8, 0], sizes = [1, 256], strides = [1, 1]} : vector<9x256xf32> to vector<1x256xf32>
    %549 = vector.broadcast %548 : vector<1x256xf32> to vector<8x256xf32>
    %550 = arith.mulf %547, %549 : vector<8x256xf32>
    %551 = tpu.concatenate %522, %526, %530, %534, %518, %538, %542, %546, %550 in 0 : vector<8x256xf32>, vector<8x256xf32>, vector<8x256xf32>, vector<8x256xf32>, vector<8x256xf32>, vector<8x256xf32>, vector<8x256xf32>, vector<8x256xf32>, vector<8x256xf32> -> vector<72x256xf32>
    %552 = arith.truncf %551 : vector<72x256xf32> to vector<72x256xbf16>
    %c0_162 = arith.constant 0 : index
    %c0_163 = arith.constant 0 : index
    %553 = vector.load %arg9[%c0_162, %c0_163] : memref<16x72xbf16, #tpu.memory_space<vmem>>, vector<16x72xbf16>
    %cst_164 = arith.constant dense<0.000000e+00> : vector<16x256xf32>
    %554 = tpu.matmul %553, %552, %cst_164 {dimension_numbers = #tpu.dot_dimension_numbers<[1], [0], [0], [1], [0, 0, 1, 1], [], []>} : vector<16x72xbf16>, vector<72x256xbf16>, vector<16x256xf32> -> vector<16x256xf32>
    %c0_165 = arith.constant 0 : index
    %c0_166 = arith.constant 0 : index
    %555 = vector.load %arg12[%c0_165, %c0_166] : memref<16x1xf32, #tpu.memory_space<vmem>>, vector<16x1xf32>
    %556 = vector.broadcast %555 : vector<16x1xf32> to vector<16x256xf32>
    %557 = arith.addf %554, %556 : vector<16x256xf32>
    %cst_167 = arith.constant 0.000000e+00 : f32
    %558 = vector.broadcast %cst_167 : f32 to vector<16x256xf32>
    %559 = arith.maximumf %557, %558 : vector<16x256xf32>
    %560 = vector.shape_cast %559 : vector<16x256xf32> to vector<1x16x256xf32>
    %c0_168 = arith.constant 0 : index
    %c0_169 = arith.constant 0 : index
    %c0_170 = arith.constant 0 : index
    %561 = vector.load %arg19[%c0_168, %c0_169, %c0_170] : memref<1x16x256xf32, #tpu.memory_space<vmem>>, vector<1x16x256xf32>
    tpu.vector_store %arg19[%c0_168, %c0_169, %c0_170], %560 {strides = array<i32>} : memref<1x16x256xf32, #tpu.memory_space<vmem>>, vector<1x16x256xf32>,
    return
  }
  func.func @transform_0(%arg0: i32) -> (i32, i32) {
    %c0_i32 = arith.constant 0 : i32
    %c0_i32_0 = arith.constant 0 : i32
    %c0_i32_1 = arith.constant 0 : i32
    return %c0_i32, %c0_i32_0 : i32, i32
  }
  func.func @transform_1(%arg0: i32) -> (i32, i32, i32) {
    %c0_i32 = arith.constant 0 : i32
    %c0_i32_0 = arith.constant 0 : i32
    %c0_i32_1 = arith.constant 0 : i32
    return %arg0, %c0_i32, %c0_i32_0 : i32, i32, i32
  }
  func.func @transform_2(%arg0: i32) -> (i32, i32) {
    %c0_i32 = arith.constant 0 : i32
    %c0_i32_0 = arith.constant 0 : i32
    %c0_i32_1 = arith.constant 0 : i32
    return %c0_i32, %c0_i32_0 : i32, i32
  }
  func.func @transform_3(%arg0: i32) -> (i32, i32) {
    %c0_i32 = arith.constant 0 : i32
    %c0_i32_0 = arith.constant 0 : i32
    %c0_i32_1 = arith.constant 0 : i32
    return %c0_i32, %c0_i32_0 : i32, i32
  }
  func.func @transform_4(%arg0: i32) -> (i32, i32) {
    %c0_i32 = arith.constant 0 : i32
    %c0_i32_0 = arith.constant 0 : i32
    %c0_i32_1 = arith.constant 0 : i32
    return %c0_i32, %c0_i32_0 : i32, i32
  }
  func.func @transform_5(%arg0: i32) -> (i32, i32) {
    %c0_i32 = arith.constant 0 : i32
    %c0_i32_0 = arith.constant 0 : i32
    %c0_i32_1 = arith.constant 0 : i32
    return %c0_i32, %c0_i32_0 : i32, i32
  }
  func.func @transform_6(%arg0: i32) -> (i32, i32) {
    %c0_i32 = arith.constant 0 : i32
    %c0_i32_0 = arith.constant 0 : i32
    %c0_i32_1 = arith.constant 0 : i32
    return %c0_i32, %c0_i32_0 : i32, i32
  }
  func.func @transform_7(%arg0: i32) -> (i32, i32) {
    %c0_i32 = arith.constant 0 : i32
    %c0_i32_0 = arith.constant 0 : i32
    %c0_i32_1 = arith.constant 0 : i32
    return %c0_i32, %c0_i32_0 : i32, i32
  }
  func.func @transform_8(%arg0: i32) -> (i32, i32) {
    %c0_i32 = arith.constant 0 : i32
    %c0_i32_0 = arith.constant 0 : i32
    %c0_i32_1 = arith.constant 0 : i32
    return %c0_i32, %c0_i32_0 : i32, i32
  }
  func.func @transform_9(%arg0: i32) -> (i32, i32) {
    %c0_i32 = arith.constant 0 : i32
    %c0_i32_0 = arith.constant 0 : i32
    %c0_i32_1 = arith.constant 0 : i32
    return %c0_i32, %c0_i32_0 : i32, i32
  }
  func.func @transform_10(%arg0: i32) -> (i32, i32) {
    %c0_i32 = arith.constant 0 : i32
    %c0_i32_0 = arith.constant 0 : i32
    %c0_i32_1 = arith.constant 0 : i32
    return %c0_i32, %c0_i32_0 : i32, i32
  }
  func.func @transform_11(%arg0: i32) -> (i32, i32) {
    %c0_i32 = arith.constant 0 : i32
    %c0_i32_0 = arith.constant 0 : i32
    %c0_i32_1 = arith.constant 0 : i32
    return %c0_i32, %c0_i32_0 : i32, i32
  }
  func.func @transform_12(%arg0: i32) -> (i32, i32) {
    %c0_i32 = arith.constant 0 : i32
    %c0_i32_0 = arith.constant 0 : i32
    %c0_i32_1 = arith.constant 0 : i32
    return %c0_i32, %c0_i32_0 : i32, i32
  }
  func.func @transform_13(%arg0: i32) -> (i32, i32) {
    %c0_i32 = arith.constant 0 : i32
    %c0_i32_0 = arith.constant 0 : i32
    %c0_i32_1 = arith.constant 0 : i32
    return %c0_i32, %c0_i32_0 : i32, i32
  }
  func.func @transform_14(%arg0: i32) -> (i32, i32) {
    %c0_i32 = arith.constant 0 : i32
    %c0_i32_0 = arith.constant 0 : i32
    %c0_i32_1 = arith.constant 0 : i32
    return %c0_i32, %c0_i32_0 : i32, i32
  }
  func.func @transform_15(%arg0: i32) -> (i32, i32) {
    %c0_i32 = arith.constant 0 : i32
    %c0_i32_0 = arith.constant 0 : i32
    %c0_i32_1 = arith.constant 0 : i32
    return %c0_i32, %c0_i32_0 : i32, i32
  }
  func.func @transform_16(%arg0: i32) -> (i32, i32) {
    %c0_i32 = arith.constant 0 : i32
    %c0_i32_0 = arith.constant 0 : i32
    %c0_i32_1 = arith.constant 0 : i32
    return %c0_i32, %c0_i32_0 : i32, i32
  }
  func.func @transform_17(%arg0: i32) -> (i32, i32) {
    %c0_i32 = arith.constant 0 : i32
    %c0_i32_0 = arith.constant 0 : i32
    %c0_i32_1 = arith.constant 0 : i32
    return %c0_i32, %c0_i32_0 : i32, i32
  }
  func.func @transform_18(%arg0: i32) -> (i32, i32, i32) {
    %c0_i32 = arith.constant 0 : i32
    %c0_i32_0 = arith.constant 0 : i32
    %c0_i32_1 = arith.constant 0 : i32
    return %arg0, %c0_i32, %c0_i32_0 : i32, i32, i32
  }
}

</mosaic_0001>

<bundles_post_ra>
// kernel: recurrent_hourglass_forward.1
= control target key start
LH: loop header
LB: loop body
LE: loop exit
PB: predicated region body
PF: predicated region fallthrough
CT: control target
= control target key end

     0   :  { %s2716_s27 = smov 0   ;;  %s3929_s0 = inlined_call_operand.vmem [shape: f32[9,256], index: 0, kind: input, shape index: {}]   ;;  %s3930_s1 = inlined_call_operand.vmem [shape: f32[2,4,256], index: 1, kind: input, shape index: {}]   ;;  %s3931_s2 = inlined_call_operand.vmem [shape: bf16[8,36], index: 2, kind: input, shape index: {}]   ;;  %s3932_s3 = inlined_call_operand.vmem [shape: bf16[8,72], index: 3, kind: input, shape index: {}]   ;;  %s3933_s4 = inlined_call_operand.vmem [shape: bf16[8,72], index: 4, kind: input, shape index: {}]   ;;  %s3934_s5 = inlined_call_operand.vmem [shape: f32[8,1], index: 5, kind: input, shape index: {}]   ;;  %s3935_s6 = inlined_call_operand.vmem [shape: f32[8,1], index: 6, kind: input, shape index: {}]   ;;  %s3936_s7 = inlined_call_operand.vmem [shape: f32[8,1], index: 7, kind: input, shape index: {}]   ;;  %s3937_s8 = inlined_call_operand.vmem [shape: bf16[16,72], index: 8, kind: input, shape index: {}]   ;;  %s3938_s9 = inlined_call_operand.vmem [shape: bf16[8,72], index: 9, kind: input, shape index: {}]   ;;  %s3939_s10 = inlined_call_operand.vmem [shape: bf16[8,72], index: 10, kind: input, shape index: {}]   ;;  %s3940_s11 = inlined_call_operand.vmem [shape: f32[16,1], index: 11, kind: input, shape index: {}]   ;;  %s3941_s12 = inlined_call_operand.vmem [shape: f32[8,1], index: 12, kind: input, shape index: {}]   ;;  %s3942_s13 = inlined_call_operand.vmem [shape: f32[8,1], index: 13, kind: input, shape index: {}]   ;;  %s3943_s14 = inlined_call_operand.vmem [shape: bf16[24,72], index: 14, kind: input, shape index: {}]   ;;  %s3944_s15 = inlined_call_operand.vmem [shape: bf16[16,72], index: 15, kind: input, shape index: {}]   ;;  %s3945_s16 = inlined_call_operand.vmem [shape: bf16[8,72], index: 16, kind: input, shape index: {}]   ;;  %s3946_s17 = inlined_call_operand.vmem [shape: f32[24,1], index: 17, kind: input, shape index: {}]   ;;  %s3947_s18 = inlined_call_operand.vmem [shape: f32[2,16,256], index: 18, kind: output, shape index: {}]  }
   0x1   :  { %3957 = sst [smem:[#allocation2_spill]] %s3929_s0 }
   0x2   :  { %3958 = sst [smem:[#allocation3_spill]] %s3930_s1 }
   0x3   :  { %3959 = sst [smem:[#allocation4_spill]] %s3931_s2 }
   0x4 LB: > { %s2438_s28 = sadd.s32 4294967295, %s2610_s27   ;;  %p2442_p0 = scmp.ge.s32.totalorder %s2610_s27, 1  ;;  %s2610_s27 = sphi %s2716_s27, %s28_s27  }
   0x5   : > { %p512_p1 = scmp.lt.s32.totalorder %s2610_s27, 3 }
   0x7   : > { %p513_p2 = pnand %p2442_p0, %p512_p1 }
   0x8   : > { %p566_p3 = scmp.lt.s32.totalorder (!%p513_p2), %s2438_s28, 1  ;;  %s3960_s19 = sld [smem:[#allocation3_spill]] (!%p513_p2)  ;;  %v2618_v2 = vmov (!%p513_p2), 0   ;;  %v763_v3 = vld [vmem:[%s3934_s5] sm:$0xff] (!%p513_p2)  ;;  %v589_v4 = vlaneseq (!%p513_p2)  ;;  %vm747_vm4 = vcmask (!%p513_p2), 1043456   ;;  %vm773_vm9 = vcmask (!%p513_p2), 1041408  }
   0x9   : > { %516 = sbr.rel (%p513_p2) target bundleno = 3462 (0xd86), region = 92  ;;  %s3955_s20 = smov (!%p513_p2), 1   ;;  %812 = vmatprep.mubr.bf16.mxu0 (!%p513_p2), %v2618_v2  ;;  %2541 = vset.pattern.permute.xlu0 (!%p513_p2), %v2618_v2  ;;  %vm769_vm10 = vcmask (!%p513_p2), 293888   ;;  %vm926_vm11 = vcmask (!%p513_p2), 588800  }
   0xa   : > { %s2613_s21 = smov (!%p513_p2), 16   ;;  %s2614_s22 = smov (!%p513_p2), 17   ;;  %971 = vmatprep.mubr.bf16.mxu1 (!%p513_p2), %v2618_v2  ;;  %2542 = vset.pattern.permute.xlu1 (!%p513_p2), %v2618_v2  ;;  %v2775_v5 = vshrl.u32 (!%p513_p2), %v589_v4, 7  ;;  %v2777_v6 = vand.u32 (!%p513_p2), 127, %v589_v4 }
   0xb   : > { %s2615_s2 = smov (!%p513_p2), 15   ;;  %s3953_s23 = smov (!%p513_p2), 127  }
   0xc   : > { %s3951_s24 = smov (!%p513_p2), 112   ;;  %s2619_s25 = smov (!%p513_p2), 113   ;;  %v647_v9 = vsub.s32 (!%p513_p2), 3, %v2775_v5  ;;  %v613_v12 = vsub.s32 (!%p513_p2), 1, %v2775_v5  ;;  %vm642_vm0 = vcmp.lt.s32.totalorder (!%p513_p2), %v2777_v6, 1  ;;  %v596_v15 = vsub.s32 (!%p513_p2), 0, %v2775_v5 }
   0xd   : > { %s3949_s26 = smov (!%p513_p2), 111   ;;  %vm608_vm1 = vcmp.lt.s32.totalorder (!%p513_p2), %v2777_v6, 16  ;;  %v630_v18 = vsub.s32 (!%p513_p2), 2, %v2775_v5  ;;  %vm591_vm2 = vcmp.lt.s32.totalorder (!%p513_p2), %v2777_v6, 17  ;;  %vm625_vm3 = vcmp.lt.s32.totalorder (!%p513_p2), %v2777_v6, 15 }
   0xe   : > { %v664_v37 = vsub.s32 (!%p513_p2), 5, %v2775_v5  ;;  %vm659_vm5 = vcmp.lt.s32.totalorder (!%p513_p2), %v2777_v6, 127  ;;  %v698_v42 = vsub.s32 (!%p513_p2), 7, %v2775_v5  ;;  %vm693_vm6 = vcmp.lt.s32.totalorder (!%p513_p2), %v2777_v6, 112 }
   0xf   : > { %v681_v4 = vsub.s32 (!%p513_p2), 6, %v2775_v5  ;;  %vm676_vm7 = vcmp.lt.s32.totalorder (!%p513_p2), %v2777_v6, 113  ;;  %vm710_vm8 = vcmp.lt.s32.totalorder (!%p513_p2), %v2777_v6, 111  ;;  %v2547_v6 = vld [vmem:[%s3937_s8] sm:$0xff] (!%p513_p2)  }
  0x10   : > { %s3968_s28 = smov (!%p566_p3, %s2438_s28), 1 }
  0x11   : > { %s2494_s29 = sshll.u32 %s3968_s28, 3  ;;  %s2495_s30 = sshll.u32 %s3968_s28, 5 }
  0x12   : > { %s570_s1 = scalar_lea.vmem %s3960_s19, %s2494_s29  ;;  %s3964_s29 = smov 111  }
  0x13   : > { %v2730_v0 = vld [vmem:[%s570_s1] sm:$0xff]  ;;  %s3961_s1 = sld [smem:[#allocation2_spill]] }
  0x14   : > { %638 = vrot.lane.b32.xlu1 %v2730_v0, %s3955_s20  ;;  %604 = vrot.lane.b32.xlu0 %v2730_v0, %s2613_s21  ;;  %v2738_v1 = vcombine.high %v2730_v0, %v2730_v0 }
  0x18   : > { %585 = vrot.lane.b32.xlu0 %v2730_v0, %s2614_s22  ;;  %640 = vrot.lane.b32.xlu1 %v2738_v1, %s3955_s20 }
  0x19   : > { %v2783_v10 = vld [vmem:[%s3961_s1] sm:$0xff]  ;;  %v2788_v11 = vld [vmem:[%s3961_s1 + $0x8] sm:$0xff] }
  0x1a   : > { %v2794_v16 = vrot.slane %v2783_v10, %v647_v9  ;;  %v2797_v17 = vrot.slane %v2788_v11, %v647_v9  ;;  %v2806_v21 = vrot.slane %v2783_v10, %v613_v12  ;;  %v2809_v22 = vrot.slane %v2788_v11, %v613_v12 }
  0x1b   : > { %v2813_v23 = vrot.slane %v2783_v10, %v596_v15  ;;  %v2816_v24 = vrot.slane %v2788_v11, %v596_v15  ;;  %v2828_v33 = vrot.slane %v2783_v10, %v630_v18  ;;  %v2831_v34 = vrot.slane %v2788_v11, %v630_v18 }
  0x1c   : > { %587 = vrot.lane.b32.xlu1 %v2738_v1, %s2614_s22  ;;  %606 = vrot.lane.b32.xlu0 %v2738_v1, %s2613_s21  ;;  %v2849_v51 = vrot.slane %v2783_v10, %v664_v37  ;;  %v2852_v52 = vrot.slane %v2788_v11, %v664_v37  ;;  %v2864_v63 = vrot.slane %v2783_v10, %v698_v42 }
  0x1d   : > { %v2880_v18 = vrot.slane %v2783_v10, %v681_v4 }
  0x20   : > { %623 = vrot.lane.b32.xlu1 %v2738_v1, %s2615_s2  ;;  %621 = vrot.lane.b32.xlu0 %v2730_v0, %s2615_s2 }
  0x24   : > { %657 = vrot.lane.b32.xlu1 %v2738_v1, %s3953_s23  ;;  %655 = vrot.lane.b32.xlu0 %v2730_v0, %s3953_s23 }
  0x28   : > { %691 = vrot.lane.b32.xlu1 %v2738_v1, %s3951_s24  ;;  %689 = vrot.lane.b32.xlu0 %v2730_v0, %s3951_s24  ;;  %s3962_s24 = sld [smem:[#allocation4_spill]] }
  0x2c   : > { %674 = vrot.lane.b32.xlu1 %v2738_v1, %s2619_s25  ;;  %672 = vrot.lane.b32.xlu0 %v2730_v0, %s2619_s25 }
  0x30   : > { %708 = vrot.lane.b32.xlu1 %v2738_v1, %s3949_s26  ;;  %706 = vrot.lane.b32.xlu0 %v2730_v0, %s3949_s26  ;;  %s3963_s26 = smov 112  }
  0x34   : > { %766 = vperm.xlu0 %2541, %v763_v3   ;;  %v2867_v3 = vrot.slane %v2788_v11, %v698_v42 }
  0x86   : > { %v639_v7 = vpop.permute.xlu1 %638  ;;  %v605_v8 = vpop.permute.xlu0 %604 }
  0x8a   : > { %v586_v13 = vpop.permute.xlu0 %585  ;;  %v641_v14 = vpop.permute.xlu1 %640 }
  0x8b   : > { %v643_v19 = vsel %vm642_vm0, %v639_v7, %v641_v14  ;;  %v644_v20 = vsel %vm642_vm0, %v641_v14, %v639_v7 }
  0x8c   : > { %v653_v27 = vmul.f32 %v2794_v16, %v644_v20  ;;  %v654_v28 = vmul.f32 %v2797_v17, %v643_v19  ;;  %v2883_v19 = vrot.slane %v2788_v11, %v681_v4  ;;  %v2895_v11 = vld [vmem:[%s3961_s1 + $0x18] ss:$0 sm:$0xff]  ;;  %v1007_v4 = vld [vmem:[%s3935_s6] sm:$0xff] }
  0x8e   : > { %v588_v25 = vpop.permute.xlu1 %587  ;;  %v607_v26 = vpop.permute.xlu0 %606  ;;  %v731_v43 = vrot.slane %v653_v27, 4  ;;  %v732_v44 = vrot.slane %v654_v28, 4 }
  0x8f   : > { %v609_v29 = vsel %vm608_vm1, %v605_v8, %v607_v26  ;;  %v610_v30 = vsel %vm608_vm1, %v607_v26, %v605_v8  ;;  %v592_v35 = vsel %vm591_vm2, %v586_v13, %v588_v25  ;;  %v593_v36 = vsel %vm591_vm2, %v588_v25, %v586_v13 }
  0x90   : > { %v619_v31 = vmul.f32 %v2806_v21, %v610_v30  ;;  %v620_v32 = vmul.f32 %v2809_v22, %v609_v29  ;;  %v602_v47 = vmul.f32 %v2813_v23, %v593_v36  ;;  %v603_v48 = vmul.f32 %v2816_v24, %v592_v35  ;;  %v2900_v35 = vld [vmem:[%s3961_s1 + $0x10] ss:$0 sm:$0xff] }
  0x92   : > { %v725_v38 = vrot.slane %v619_v31, 4  ;;  %v726_v39 = vrot.slane %v620_v32, 4  ;;  %v624_v40 = vpop.permute.xlu1 %623  ;;  %v622_v41 = vpop.permute.xlu0 %621 }
  0x93   : > { %v626_v45 = vsel %vm625_vm3, %v622_v41, %v624_v40  ;;  %v627_v46 = vsel %vm625_vm3, %v624_v40, %v622_v41 }
  0x94   : > { %v636_v49 = vmul.f32 %v2828_v33, %v627_v46  ;;  %v637_v50 = vmul.f32 %v2831_v34, %v626_v45  ;;  %v749_v55 = vsel %vm747_vm4, %v603_v48, %v726_v39  ;;  %v748_v57 = vsel %vm747_vm4, %v602_v47, %v725_v38 }
  0x96   : > { %v658_v53 = vpop.permute.xlu1 %657  ;;  %v656_v54 = vpop.permute.xlu0 %655  ;;  %v751_v56 = vsel %vm747_vm4, %v637_v50, %v732_v44  ;;  %v750_v58 = vsel %vm747_vm4, %v636_v49, %v731_v43  ;;  %v762_v49 = vld [vmem:[%s3962_s24] sm:$0xf] }
  0x97   : > { %v660_v59 = vsel %vm659_vm5, %v656_v54, %v658_v53  ;;  %v661_v60 = vsel %vm659_vm5, %v658_v53, %v656_v54  ;;  %v757_v61 = vpack.c.bf16 %v751_v56, %v749_v55  ;;  %v756_v62 = vpack.c.bf16 %v750_v58, %v748_v57 }
  0x98   : > { %v670_v7 = vmul.f32 %v2849_v51, %v660_v59  ;;  %v671_v8 = vmul.f32 %v2852_v52, %v661_v60 }
  0x99   : > { %780 = vmatprep.subr.bf16.mxu0 %v757_v61  ;;  %v901_v61 = vld [vmem:[%s3946_s17 + $0x8] sm:$0xff] }
  0x9a   : > { %v692_v9 = vpop.permute.xlu1 %691  ;;  %781 = vmatpush1.bf16.msra.mxu0 %v756_v62  ;;  %v690_v12 = vpop.permute.xlu0 %689  ;;  %v737_v20 = vrot.slane %v670_v7, 4  ;;  %v738_v25 = vrot.slane %v671_v8, 4  ;;  %v902_v62 = vld [vmem:[%s3946_s17 + $0x10] sm:$0xff] }
  0x9b   : > { %v694_v13 = vsel %vm693_vm6, %v690_v12, %v692_v9  ;;  %v695_v14 = vsel %vm693_vm6, %v692_v9, %v690_v12 }
  0x9c   : > { %v704_v15 = vmul.f32 %v2864_v63, %v694_v13  ;;  %v705_v5 = vmul.f32 %v2867_v3, %v695_v14  ;;  %v753_v38 = vsel %vm747_vm4, %v2738_v1, %v738_v25  ;;  %v752_v40 = vsel %vm747_vm4, %v2730_v0, %v737_v20 }
  0x9e   : > { %v675_v26 = vpop.permute.xlu1 %674  ;;  %v673_v27 = vpop.permute.xlu0 %672  ;;  %v743_v30 = vrot.slane %v704_v15, 4  ;;  %v744_v31 = vrot.slane %v705_v5, 4 }
  0x9f   : > { %v677_v28 = vsel %vm676_vm7, %v673_v27, %v675_v26  ;;  %v678_v29 = vsel %vm676_vm7, %v675_v26, %v673_v27 }
  0xa0   : > { %v687_v10 = vmul.f32 %v2880_v18, %v677_v28  ;;  %v688_v32 = vmul.f32 %v2883_v19, %v678_v29 }
  0xa2   : > { %v709_v36 = vpop.permute.xlu1 %708  ;;  %v707_v37 = vpop.permute.xlu0 %706  ;;  %v755_v39 = vsel %vm747_vm4, %v688_v32, %v744_v31  ;;  %v754_v41 = vsel %vm747_vm4, %v687_v10, %v743_v30 }
  0xa3   : > { %v711_v42 = vsel %vm710_vm8, %v707_v37, %v709_v36  ;;  %v712_v43 = vsel %vm710_vm8, %v709_v36, %v707_v37  ;;  %v759_v44 = vpack.c.bf16 %v755_v39, %v753_v38  ;;  %v758_v45 = vpack.c.bf16 %v754_v41, %v752_v40 }
  0xa4   : > { %v722_v46 = vmul.f32 %v2895_v11, %v712_v43  ;;  %v721_v47 = vmul.f32 %v2900_v35, %v711_v42 }
  0xa5   : > { %782 = vmatprep.subr.bf16.mxu0 %v759_v44 }
  0xa6   : > { %v761_v1 = vpack.c.bf16 %v722_v46, %v722_v46  ;;  %783 = vmatpush1.bf16.msra.mxu0 %v758_v45  ;;  %v760_v48 = vpack.c.bf16 %v721_v47, %v721_v47 }
  0xa8   : > { %2449 = vmatprep.subr.msk.bf16.mxu0 %vm773_vm9, %v761_v1  ;;  %v775_v0 = vsel %vm773_vm9, %v760_v48, 0 }
  0xaa   : > { %785 = vmatpush1.bf16.msra.mxu0 %v775_v0 }
  0xad   : > { %2450 = vmatmul.mubr.msk.bf16.vlgmr.msra.gmra.mrb[0].mxu0 %vm769_vm10, %v762_v49 }
  0xae   : > { %1048 = vmatprep.mubr.bf16.mxu0 %v2618_v2 }
  0xb3   : > { %v767_v50 = vpop.permute.xlu0 %766 }
 0x180   : > { %v814_v53 = vpop.f32.mrb[0].mxu0 }
 0x181   : > { %v815_v54 = vadd.f32 %v814_v53, %v767_v50  ;;  %v816_v55 = vpop.f32.mrb[1].mxu0 }
 0x182   : > { %v818_v56 = vpop.f32.mrb[2].mxu0  ;;  %v817_v58 = vadd.f32 %v816_v55, %v767_v50 }
 0x183   : > { %v2918_v57 = vmax.f32 %v815_v54, 0.0  ;;  %v819_v59 = vpop.f32.mrb[3].mxu0 }
 0x184   : > { %v2924_v60 = vmax.f32 %v817_v58, 0.0 }
 0x185   : > { %831 = vrot.lane.b32.xlu0 %v2918_v57, %s2613_s21  ;;  %823 = vrot.lane.b32.xlu1 %v2918_v57, %s2614_s22 }
 0x189   : > { %839 = vrot.lane.b32.xlu0 %v2918_v57, %s2615_s2  ;;  %825 = vrot.lane.b32.xlu1 %v2924_v60, %s2614_s22 }
 0x18d   : > { %847 = vrot.lane.b32.xlu0 %v2918_v57, %s3955_s20  ;;  %833 = vrot.lane.b32.xlu1 %v2924_v60, %s2613_s21 }
 0x191   : > { %855 = vrot.lane.b32.xlu0 %v2918_v57, %s3953_s23  ;;  %841 = vrot.lane.b32.xlu1 %v2924_v60, %s2615_s2 }
 0x195   : > { %863 = vrot.lane.b32.xlu0 %v2918_v57, %s2619_s25  ;;  %849 = vrot.lane.b32.xlu1 %v2924_v60, %s3955_s20  ;;  %s3965_s20 = smov 1  }
 0x199   : > { %871 = vrot.lane.b32.xlu0 %v2918_v57, %s3963_s26  ;;  %857 = vrot.lane.b32.xlu1 %v2924_v60, %s3953_s23  ;;  %s3966_s23 = smov 127  }
 0x19d   : > { %879 = vrot.lane.b32.xlu0 %v2918_v57, %s3964_s29  ;;  %865 = vrot.lane.b32.xlu1 %v2924_v60, %s2619_s25 }
 0x1a1   : > { %910 = vperm.xlu0 %2541, %v901_v61   ;;  %873 = vrot.lane.b32.xlu1 %v2924_v60, %s3963_s26 }
 0x1a5   : > { %915 = vperm.xlu0 %2541, %v902_v62   ;;  %881 = vrot.lane.b32.xlu1 %v2924_v60, %s3964_s29 }
 0x1a9   : > { %1010 = vperm.xlu1 %2542, %v1007_v4  }
 0x1f7   : > { %v832_v7 = vpop.permute.xlu0 %831  ;;  %v824_v8 = vpop.permute.xlu1 %823 }
 0x1fb   : > { %v840_v9 = vpop.permute.xlu0 %839  ;;  %v826_v12 = vpop.permute.xlu1 %825 }
 0x1fc   : > { %v827_v13 = vsel %vm591_vm2, %v824_v8, %v826_v12  ;;  %v828_v14 = vsel %vm591_vm2, %v826_v12, %v824_v8 }
 0x1fd   : > { %v830_v26 = vmul.f32 %v827_v13, %v2816_v24  ;;  %v829_v28 = vmul.f32 %v828_v14, %v2813_v23 }
 0x1ff   : > { %v848_v15 = vpop.permute.xlu0 %847  ;;  %v834_v5 = vpop.permute.xlu1 %833 }
 0x200   : > { %v835_v20 = vsel %vm608_vm1, %v832_v7, %v834_v5  ;;  %v836_v25 = vsel %vm608_vm1, %v834_v5, %v832_v7 }
 0x201   : > { %v838_v27 = vmul.f32 %v835_v20, %v2809_v22  ;;  %v837_v29 = vmul.f32 %v836_v25, %v2806_v21 }
 0x203   : > { %v842_v30 = vpop.permute.xlu1 %841  ;;  %v888_v31 = vpack.c.bf16 %v838_v27, %v830_v26  ;;  %v887_v10 = vpack.c.bf16 %v837_v29, %v829_v28  ;;  %v856_v32 = vpop.permute.xlu0 %855  ;;  %v3019_v29 = vld [vmem:[%s3943_s14] sm:$0xff]  }
 0x204   : > { %v843_v36 = vsel %vm625_vm3, %v840_v9, %v842_v30  ;;  %v844_v37 = vsel %vm625_vm3, %v842_v30, %v840_v9  ;;  %v1006_v30 = vld [vmem:[%s3932_s3] sm:$0xf] }
 0x205   : > { %939 = vmatprep.subr.bf16.mxu1 %v888_v31  ;;  %1016 = vmatprep.subr.bf16.mxu0 %v888_v31  ;;  %v845_v41 = vmul.f32 %v844_v37, %v2828_v33  ;;  %v846_v42 = vmul.f32 %v843_v36, %v2831_v34  ;;  %v3032_v31 = vld [vmem:[%s3943_s14 + $0x8] ss:$0 sps:$4 sm:$0xff]  }
 0x206   : > { %940 = vmatpush1.bf16.msra.mxu1 %v887_v10  ;;  %1017 = vmatpush1.bf16.msra.mxu0 %v887_v10 }
 0x207   : > { %v850_v38 = vpop.permute.xlu1 %849  ;;  %v864_v45 = vpop.permute.xlu0 %863 }
 0x208   : > { %v851_v39 = vsel %vm642_vm0, %v848_v15, %v850_v38  ;;  %v852_v40 = vsel %vm642_vm0, %v850_v38, %v848_v15 }
 0x209   : > { %v853_v43 = vmul.f32 %v852_v40, %v2794_v16  ;;  %v854_v44 = vmul.f32 %v851_v39, %v2797_v17 }
 0x20b   : > { %v858_v46 = vpop.permute.xlu1 %857  ;;  %v890_v47 = vpack.c.bf16 %v854_v44, %v846_v42  ;;  %v889_v1 = vpack.c.bf16 %v853_v43, %v845_v41  ;;  %v872_v56 = vpop.permute.xlu0 %871 }
 0x20c   : > { %v859_v48 = vsel %vm659_vm5, %v856_v32, %v858_v46  ;;  %v860_v0 = vsel %vm659_vm5, %v858_v46, %v856_v32 }
 0x20d   : > { %v861_v49 = vmul.f32 %v859_v48, %v2849_v51  ;;  %v862_v50 = vmul.f32 %v860_v0, %v2852_v52  ;;  %941 = vmatprep.subr.bf16.mxu1 %v890_v47  ;;  %1018 = vmatprep.subr.bf16.mxu0 %v890_v47 }
 0x20e   : > { %942 = vmatpush1.bf16.msra.mxu1 %v889_v1  ;;  %1019 = vmatpush1.bf16.msra.mxu0 %v889_v1 }
 0x20f   : > { %v866_v53 = vpop.permute.xlu1 %865  ;;  %v892_v54 = vpack.c.bf16 %v862_v50, %v2924_v60  ;;  %v891_v55 = vpack.c.bf16 %v861_v49, %v2918_v57  ;;  %v880_v9 = vpop.permute.xlu0 %879 }
 0x210   : > { %v867_v58 = vsel %vm676_vm7, %v864_v45, %v866_v53  ;;  %v868_v59 = vsel %vm676_vm7, %v866_v53, %v864_v45 }
 0x211   : > { %943 = vmatprep.subr.bf16.mxu1 %v892_v54  ;;  %1020 = vmatprep.subr.bf16.mxu0 %v892_v54  ;;  %v869_v57 = vmul.f32 %v867_v58, %v2880_v18  ;;  %v870_v4 = vmul.f32 %v868_v59, %v2883_v19 }
 0x212   : > { %944 = vmatpush1.bf16.msra.mxu1 %v891_v55  ;;  %1021 = vmatpush1.bf16.msra.mxu0 %v891_v55 }
 0x213   : > { %v874_v61 = vpop.permute.xlu1 %873 }
 0x214   : > { %v875_v62 = vsel %vm693_vm6, %v872_v56, %v874_v61  ;;  %v876_v60 = vsel %vm693_vm6, %v874_v61, %v872_v56 }
 0x215   : > { %v877_v7 = vmul.f32 %v875_v62, %v2864_v63  ;;  %v878_v8 = vmul.f32 %v876_v60, %v2867_v3 }
 0x217   : > { %v882_v12 = vpop.permute.xlu1 %881  ;;  %v894_v13 = vpack.c.bf16 %v878_v8, %v870_v4  ;;  %v893_v14 = vpack.c.bf16 %v877_v7, %v869_v57 }
 0x218   : > { %v883_v15 = vsel %vm710_vm8, %v880_v9, %v882_v12  ;;  %v884_v5 = vsel %vm710_vm8, %v882_v12, %v880_v9 }
 0x219   : > { %v886_v20 = vmul.f32 %v2895_v11, %v884_v5  ;;  %945 = vmatprep.subr.bf16.mxu1 %v894_v13  ;;  %1022 = vmatprep.subr.bf16.mxu0 %v894_v13  ;;  %v885_v25 = vmul.f32 %v2900_v35, %v883_v15  ;;  %v900_v5 = vld [vmem:[%s3946_s17] sm:$0xff] }
 0x21a   : > { %946 = vmatpush1.bf16.msra.mxu1 %v893_v14  ;;  %1023 = vmatpush1.bf16.msra.mxu0 %v893_v14 }
 0x21b   : > { %v896_v26 = vpack.c.bf16 %v886_v20, %v886_v20  ;;  %v895_v27 = vpack.c.bf16 %v885_v25, %v885_v25 }
 0x21d   : > { %2453 = vmatprep.subr.msk.bf16.mxu1 %vm747_vm4, %v896_v26  ;;  %2458 = vmatprep.subr.msk.bf16.mxu0 %vm747_vm4, %v896_v26  ;;  %v934_v28 = vsel %vm747_vm4, %v895_v27, 0 }
 0x21e   : > { %948 = vmatpush1.bf16.msra.mxu1 %v934_v28  ;;  %1025 = vmatpush1.bf16.msra.mxu0 %v934_v28 }
 0x220   : > { %v3037_v32 = vpop.permute.xlu0 %910 }
 0x221   : > { %2454 = vmatmul.mubr.msk.bf16.vlgmr.msra.gmra.mrb[0].mxu1 %vm926_vm11, %v3019_v29  ;;  %2459 = vmatmul.mubr.msk.bf16.vlgmr.msra.gmra.mrb[4].mxu0 %vm926_vm11, %v1006_v30 }
 0x222   : > { %979 = vmatprep.mubr.bf16.mxu1 %v2618_v2  ;;  %1532 = vmatprep.mubr.bf16.mxu0 %v2618_v2 }
 0x224   : > { %v3057_v58 = vpop.permute.xlu0 %915 }
 0x228   : > { %v1011_v10 = vpop.permute.xlu1 %1010 }
 0x229   : > { %2455 = vmatmul.mubr.msk.bf16.gmra.mrb[4].mxu1 %vm926_vm11, %v3032_v31 }
 0x22a   : > { %1171 = vmatprep.mubr.bf16.mxu1 %v2618_v2 }
 0x2f4   : > { %v973_v36 = vpop.f32.mrb[0].mxu1  ;;  %v1050_v37 = vpop.f32.mrb[4].mxu0 }
 0x2f5   : > { %v1051_v38 = vadd.f32 %v1050_v37, %v1011_v10  ;;  %v974_v39 = vpop.f32.mrb[1].mxu1  ;;  %v1052_v40 = vpop.f32.mrb[5].mxu0 }
 0x2f6   : > { %v1053_v41 = vadd.f32 %v1052_v40, %v1011_v10  ;;  %v975_v42 = vpop.f32.mrb[2].mxu1  ;;  %v1054_v43 = vpop.f32.mrb[6].mxu0 }
 0x2f7   : > { %v3039_v44 = vmax.f32 %v1051_v38, 0.0  ;;  %v976_v45 = vadd.f32 %v975_v42, %v3037_v32  ;;  %v977_v46 = vpop.f32.mrb[3].mxu1  ;;  %v1055_v47 = vpop.f32.mrb[7].mxu0 }
 0x2f8   : > { %v3042_v1 = vmax.f32 %v1053_v41, 0.0  ;;  %v978_v48 = vadd.f32 %v977_v46, %v3037_v32 }
 0x2f9   : > { %v2456_v0 = vmul.f32 -1.442695, %v976_v45  ;;  %1059 = vrot.lane.b32.xlu1 %v3039_v44, %s2614_s22 }
 0x2fa   : > { %v2457_v49 = vmul.f32 -1.442695, %v978_v48  ;;  %1061 = vrot.lane.b32.xlu0 %v3042_v1, %s2614_s22 }
 0x2fb   : > { %2548 = vpow2.f32 %v2456_v0 }
 0x2fc   : > { %2550 = vpow2.f32 %v2457_v49  ;;  %v981_v50 = vpop.f32.mrb[4].mxu1 }
 0x2fd   : > { %v983_v53 = vpop.f32.mrb[5].mxu1  ;;  %1067 = vrot.lane.b32.xlu1 %v3039_v44, %s2613_s21  ;;  %v982_v62 = vadd.f32 %v981_v50, %v3057_v58 }
 0x2fe   : > { %1069 = vrot.lane.b32.xlu0 %v3042_v1, %s2613_s21  ;;  %v985_v54 = vpop.f32.mrb[6].mxu1  ;;  %v984_v57 = vadd.f32 %v983_v53, %v3057_v58 }
 0x2ff   : > { %v986_v55 = vpop.f32.mrb[7].mxu1 }
 0x301   : > { %1075 = vrot.lane.b32.xlu1 %v3039_v44, %s2615_s2 }
 0x302   : > { %1077 = vrot.lane.b32.xlu0 %v3042_v1, %s2615_s2 }
 0x305   : > { %v2549_v56 = vpop.eup %2548  ;;  %1083 = vrot.lane.b32.xlu1 %v3039_v44, %s3965_s20 }
 0x306   : > { %v2551_v59 = vpop.eup %2550  ;;  %v994_v61 = vadd.f32 1.0, %v2549_v56  ;;  %1085 = vrot.lane.b32.xlu0 %v3042_v1, %s3965_s20 }
 0x307   : > { %v995_v60 = vadd.f32 1.0, %v2551_v59 }
 0x308   : > { %2552 = vrcp.f32 %v994_v61 }
 0x309   : > { %2554 = vrcp.f32 %v995_v60  ;;  %1091 = vrot.lane.b32.xlu1 %v3039_v44, %s3966_s23 }
 0x30a   : > { %2556 = vtanh.f32 %v982_v62  ;;  %1093 = vrot.lane.b32.xlu0 %v3042_v1, %s3966_s23 }
 0x30b   : > { %2558 = vtanh.f32 %v984_v57 }
 0x30d   : > { %1099 = vrot.lane.b32.xlu1 %v3039_v44, %s2619_s25 }
 0x30e   : > { %1101 = vrot.lane.b32.xlu0 %v3042_v1, %s2619_s25 }
 0x311   : > { %1107 = vrot.lane.b32.xlu1 %v3039_v44, %s3963_s26 }
 0x312   : > { %v2553_v4 = vpop.eup %2552  ;;  %1109 = vrot.lane.b32.xlu0 %v3042_v1, %s3963_s26 }
 0x313   : > { %v2555_v7 = vpop.eup %2554  ;;  %v1000_v8 = vsub.f32 1.0, %v2553_v4 }
 0x314   : > { %v2557_v9 = vpop.eup %2556  ;;  %v1001_v12 = vsub.f32 1.0, %v2555_v7 }
 0x315   : > { %v2559_v13 = vpop.eup %2558  ;;  %v3077_v14 = vmul.f32 %v2557_v9, %v1000_v8  ;;  %1115 = vrot.lane.b32.xlu1 %v3039_v44, %s3964_s29 }
 0x316   : > { %v3081_v15 = vmul.f32 %v2559_v13, %v1001_v12  ;;  %1117 = vrot.lane.b32.xlu0 %v3042_v1, %s3964_s29 }
 0x319   : > { %1190 = vrot.lane.b32.xlu1 %v3077_v14, %s2614_s22 }
 0x31a   : > { %1192 = vrot.lane.b32.xlu0 %v3081_v15, %s2614_s22 }
 0x31d   : > { %1198 = vrot.lane.b32.xlu1 %v3077_v14, %s2613_s21 }
 0x31e   : > { %1200 = vrot.lane.b32.xlu0 %v3081_v15, %s2613_s21 }
 0x321   : > { %1206 = vrot.lane.b32.xlu1 %v3077_v14, %s2615_s2 }
 0x322   : > { %1208 = vrot.lane.b32.xlu0 %v3081_v15, %s2615_s2 }
 0x325   : > { %1214 = vrot.lane.b32.xlu1 %v3077_v14, %s3965_s20 }
 0x326   : > { %1216 = vrot.lane.b32.xlu0 %v3081_v15, %s3965_s20 }
 0x329   : > { %1222 = vrot.lane.b32.xlu1 %v3077_v14, %s3966_s23 }
 0x32a   : > { %1224 = vrot.lane.b32.xlu0 %v3081_v15, %s3966_s23 }
 0x32d   : > { %1230 = vrot.lane.b32.xlu1 %v3077_v14, %s2619_s25 }
 0x32e   : > { %1232 = vrot.lane.b32.xlu0 %v3081_v15, %s2619_s25 }
 0x331   : > { %1238 = vrot.lane.b32.xlu1 %v3077_v14, %s3963_s26 }
 0x332   : > { %1240 = vrot.lane.b32.xlu0 %v3081_v15, %s3963_s26 }
 0x335   : > { %1246 = vrot.lane.b32.xlu1 %v3077_v14, %s3964_s29 }
 0x336   : > { %1248 = vrot.lane.b32.xlu0 %v3081_v15, %s3964_s29 }
 0x339   : > { %905 = vperm.xlu1 %2542, %v900_v5  }
 0x36b   : > { %v1060_v20 = vpop.permute.xlu1 %1059 }
 0x36c   : > { %v1062_v25 = vpop.permute.xlu0 %1061 }
 0x36d   : > { %v1063_v26 = vsel %vm591_vm2, %v1060_v20, %v1062_v25  ;;  %v1064_v27 = vsel %vm591_vm2, %v1062_v25, %v1060_v20 }
 0x36e   : > { %v1065_v37 = vmul.f32 %v1064_v27, %v2813_v23  ;;  %v1066_v38 = vmul.f32 %v1063_v26, %v2816_v24 }
 0x36f   : > { %v1068_v28 = vpop.permute.xlu1 %1067 }
 0x370   : > { %v1070_v30 = vpop.permute.xlu0 %1069 }
 0x371   : > { %v1071_v10 = vsel %vm608_vm1, %v1068_v28, %v1070_v30  ;;  %v1072_v36 = vsel %vm608_vm1, %v1070_v30, %v1068_v28 }
 0x372   : > { %v1073_v39 = vmul.f32 %v1072_v36, %v2806_v21  ;;  %v1074_v40 = vmul.f32 %v1071_v10, %v2809_v22 }
 0x373   : > { %v1076_v41 = vpop.permute.xlu1 %1075 }
 0x374   : > { %v1123_v42 = vpack.c.bf16 %v1073_v39, %v1065_v37  ;;  %v1078_v43 = vpop.permute.xlu0 %1077  ;;  %v1124_v45 = vpack.c.bf16 %v1074_v40, %v1066_v38 }
 0x375   : > { %v1079_v46 = vsel %vm625_vm3, %v1076_v41, %v1078_v43  ;;  %v1080_v47 = vsel %vm625_vm3, %v1078_v43, %v1076_v41 }
 0x376   : > { %1139 = vmatprep.subr.bf16.mxu1 %v1124_v45  ;;  %1500 = vmatprep.subr.bf16.mxu0 %v1124_v45  ;;  %v1081_v53 = vmul.f32 %v1080_v47, %v2828_v33  ;;  %v1082_v54 = vmul.f32 %v1079_v46, %v2831_v34 }
 0x377   : > { %1140 = vmatpush1.bf16.msra.mxu1 %v1123_v42  ;;  %1501 = vmatpush1.bf16.msra.mxu0 %v1123_v42  ;;  %v1084_v48 = vpop.permute.xlu1 %1083 }
 0x378   : > { %v1086_v0 = vpop.permute.xlu0 %1085 }
 0x379   : > { %v1087_v49 = vsel %vm642_vm0, %v1084_v48, %v1086_v0  ;;  %v1088_v50 = vsel %vm642_vm0, %v1086_v0, %v1084_v48 }
 0x37a   : > { %v1089_v55 = vmul.f32 %v1088_v50, %v2794_v16  ;;  %v1090_v56 = vmul.f32 %v1087_v49, %v2797_v17 }
 0x37b   : > { %v1092_v59 = vpop.permute.xlu1 %1091 }
 0x37c   : > { %v1125_v61 = vpack.c.bf16 %v1089_v55, %v1081_v53  ;;  %v1094_v62 = vpop.permute.xlu0 %1093  ;;  %v1126_v60 = vpack.c.bf16 %v1090_v56, %v1082_v54  ;;  %v1490_v55 = vld [vmem:[%s3933_s4] sm:$0xf] }
 0x37d   : > { %v1095_v57 = vsel %vm659_vm5, %v1092_v59, %v1094_v62  ;;  %v1096_v4 = vsel %vm659_vm5, %v1094_v62, %v1092_v59 }
 0x37e   : > { %v1097_v7 = vmul.f32 %v1095_v57, %v2849_v51  ;;  %v1098_v8 = vmul.f32 %v1096_v4, %v2852_v52  ;;  %1141 = vmatprep.subr.bf16.mxu1 %v1126_v60  ;;  %1502 = vmatprep.subr.bf16.mxu0 %v1126_v60 }
 0x37f   : > { %1142 = vmatpush1.bf16.msra.mxu1 %v1125_v61  ;;  %1503 = vmatpush1.bf16.msra.mxu0 %v1125_v61  ;;  %v1100_v9 = vpop.permute.xlu1 %1099 }
 0x380   : > { %v1127_v12 = vpack.c.bf16 %v1097_v7, %v3039_v44  ;;  %v1102_v13 = vpop.permute.xlu0 %1101  ;;  %v1128_v5 = vpack.c.bf16 %v1098_v8, %v3042_v1 }
 0x381   : > { %v1103_v20 = vsel %vm676_vm7, %v1100_v9, %v1102_v13  ;;  %v1104_v25 = vsel %vm676_vm7, %v1102_v13, %v1100_v9 }
 0x382   : > { %1143 = vmatprep.subr.bf16.mxu1 %v1128_v5  ;;  %1504 = vmatprep.subr.bf16.mxu0 %v1128_v5  ;;  %v1105_v1 = vmul.f32 %v1103_v20, %v2880_v18  ;;  %v1106_v30 = vmul.f32 %v1104_v25, %v2883_v19 }
 0x383   : > { %1144 = vmatpush1.bf16.msra.mxu1 %v1127_v12  ;;  %1505 = vmatpush1.bf16.msra.mxu0 %v1127_v12  ;;  %v1108_v26 = vpop.permute.xlu1 %1107 }
 0x384   : > { %v1110_v27 = vpop.permute.xlu0 %1109 }
 0x385   : > { %v1111_v28 = vsel %vm693_vm6, %v1108_v26, %v1110_v27  ;;  %v1112_v44 = vsel %vm693_vm6, %v1110_v27, %v1108_v26 }
 0x386   : > { %v1113_v10 = vmul.f32 %v1111_v28, %v2864_v63  ;;  %v1114_v36 = vmul.f32 %v1112_v44, %v2867_v3 }
 0x387   : > { %v1116_v37 = vpop.permute.xlu1 %1115 }
 0x388   : > { %v1129_v38 = vpack.c.bf16 %v1113_v10, %v1105_v1  ;;  %v1118_v39 = vpop.permute.xlu0 %1117  ;;  %v1130_v40 = vpack.c.bf16 %v1114_v36, %v1106_v30 }
 0x389   : > { %v1119_v41 = vsel %vm710_vm8, %v1116_v37, %v1118_v39  ;;  %v1120_v42 = vsel %vm710_vm8, %v1118_v39, %v1116_v37 }
 0x38a   : > { %v1121_v43 = vmul.f32 %v2900_v35, %v1119_v41  ;;  %v1122_v45 = vmul.f32 %v2895_v11, %v1120_v42  ;;  %1145 = vmatprep.subr.bf16.mxu1 %v1130_v40  ;;  %1506 = vmatprep.subr.bf16.mxu0 %v1130_v40 }
 0x38b   : > { %1146 = vmatpush1.bf16.msra.mxu1 %v1129_v38  ;;  %1507 = vmatpush1.bf16.msra.mxu0 %v1129_v38  ;;  %v1191_v46 = vpop.permute.xlu1 %1190 }
 0x38c   : > { %v1131_v47 = vpack.c.bf16 %v1121_v43, %v1121_v43  ;;  %v1132_v48 = vpack.c.bf16 %v1122_v45, %v1122_v45  ;;  %v1193_v0 = vpop.permute.xlu0 %1192 }
 0x38d   : > { %v1195_v49 = vsel %vm591_vm2, %v1193_v0, %v1191_v46  ;;  %v1194_v53 = vsel %vm591_vm2, %v1191_v46, %v1193_v0 }
 0x38e   : > { %2460 = vmatprep.subr.msk.bf16.mxu1 %vm747_vm4, %v1132_v48  ;;  %2472 = vmatprep.subr.msk.bf16.mxu0 %vm747_vm4, %v1132_v48  ;;  %v1134_v50 = vsel %vm747_vm4, %v1131_v47, 0  ;;  %v1196_v59 = vmul.f32 %v1195_v49, %v2813_v23  ;;  %v1197_v60 = vmul.f32 %v1194_v53, %v2816_v24 }
 0x38f   : > { %1148 = vmatpush1.bf16.msra.mxu1 %v1134_v50  ;;  %1509 = vmatpush1.bf16.msra.mxu0 %v1134_v50  ;;  %v1199_v54 = vpop.permute.xlu1 %1198 }
 0x390   : > { %v1201_v56 = vpop.permute.xlu0 %1200 }
 0x391   : > { %v1202_v61 = vsel %vm608_vm1, %v1199_v54, %v1201_v56  ;;  %v1203_v62 = vsel %vm608_vm1, %v1201_v56, %v1199_v54 }
 0x392   : > { %v1204_v57 = vmul.f32 %v1203_v62, %v2806_v21  ;;  %v1205_v4 = vmul.f32 %v1202_v61, %v2809_v22  ;;  %2461 = vmatmul.mubr.msk.bf16.vlgmr.msra.gmra.mrb[8].mxu1 %vm926_vm11, %v3019_v29  ;;  %2473 = vmatmul.mubr.msk.bf16.vlgmr.msra.gmra.mrb[8].mxu0 %vm926_vm11, %v1490_v55 }
 0x393   : > { %v1207_v7 = vpop.permute.xlu1 %1206  ;;  %1181 = vmatprep.mubr.bf16.mxu1 %v2618_v2  ;;  %1655 = vmatprep.mubr.bf16.mxu0 %v2618_v2 }
 0x394   : > { %v1254_v8 = vpack.c.bf16 %v1204_v57, %v1196_v59  ;;  %v1209_v9 = vpop.permute.xlu0 %1208  ;;  %v1255_v12 = vpack.c.bf16 %v1205_v4, %v1197_v60 }
 0x395   : > { %v1210_v13 = vsel %vm625_vm3, %v1207_v7, %v1209_v9  ;;  %v1211_v5 = vsel %vm625_vm3, %v1209_v9, %v1207_v7 }
 0x396   : > { %1280 = vmatprep.subr.bf16.mxu1 %v1255_v12  ;;  %v1212_v28 = vmul.f32 %v1211_v5, %v2828_v33  ;;  %v1213_v44 = vmul.f32 %v1210_v13, %v2831_v34 }
 0x397   : > { %1281 = vmatpush1.bf16.msra.mxu1 %v1254_v8  ;;  %v1215_v20 = vpop.permute.xlu1 %1214 }
 0x398   : > { %v1217_v25 = vpop.permute.xlu0 %1216 }
 0x399   : > { %v1218_v26 = vsel %vm642_vm0, %v1215_v20, %v1217_v25  ;;  %v1219_v27 = vsel %vm642_vm0, %v1217_v25, %v1215_v20  ;;  %v3239_v25 = vld [vmem:[%s3944_s15] sm:$0xff]  }
 0x39a   : > { %v1220_v1 = vmul.f32 %v1219_v27, %v2794_v16  ;;  %v1221_v30 = vmul.f32 %v1218_v26, %v2797_v17  ;;  %2462 = vmatmul.mubr.msk.bf16.gmra.mrb[12].mxu1 %vm926_vm11, %v3032_v31 }
 0x39b   : > { %v1223_v10 = vpop.permute.xlu1 %1222  ;;  %1312 = vmatprep.mubr.bf16.mxu1 %v2618_v2 }
 0x39c   : > { %v1256_v36 = vpack.c.bf16 %v1220_v1, %v1212_v28  ;;  %v1225_v37 = vpop.permute.xlu0 %1224  ;;  %v1257_v38 = vpack.c.bf16 %v1221_v30, %v1213_v44 }
 0x39d   : > { %v1226_v39 = vsel %vm659_vm5, %v1223_v10, %v1225_v37  ;;  %v1227_v40 = vsel %vm659_vm5, %v1225_v37, %v1223_v10 }
 0x39e   : > { %v1228_v41 = vmul.f32 %v1226_v39, %v2849_v51  ;;  %v1229_v42 = vmul.f32 %v1227_v40, %v2852_v52  ;;  %1282 = vmatprep.subr.bf16.mxu1 %v1257_v38 }
 0x39f   : > { %1283 = vmatpush1.bf16.msra.mxu1 %v1256_v36  ;;  %v1231_v43 = vpop.permute.xlu1 %1230 }
 0x3a0   : > { %v1258_v45 = vpack.c.bf16 %v1228_v41, %v3077_v14  ;;  %v1233_v46 = vpop.permute.xlu0 %1232  ;;  %v1259_v47 = vpack.c.bf16 %v1229_v42, %v3081_v15 }
 0x3a1   : > { %v1234_v48 = vsel %vm676_vm7, %v1231_v43, %v1233_v46  ;;  %v1235_v0 = vsel %vm676_vm7, %v1233_v46, %v1231_v43 }
 0x3a2   : > { %1284 = vmatprep.subr.bf16.mxu1 %v1259_v47  ;;  %v1236_v55 = vmul.f32 %v1234_v48, %v2880_v18  ;;  %v1237_v56 = vmul.f32 %v1235_v0, %v2883_v19 }
 0x3a3   : > { %1285 = vmatpush1.bf16.msra.mxu1 %v1258_v45  ;;  %v1239_v49 = vpop.permute.xlu1 %1238 }
 0x3a4   : > { %v1241_v50 = vpop.permute.xlu0 %1240 }
 0x3a5   : > { %v1242_v53 = vsel %vm693_vm6, %v1239_v49, %v1241_v50  ;;  %v1243_v54 = vsel %vm693_vm6, %v1241_v50, %v1239_v49  ;;  %v1491_v50 = vld [vmem:[%s3936_s7] sm:$0xff] }
 0x3a6   : > { %v1244_v59 = vmul.f32 %v1242_v53, %v2864_v63  ;;  %v1245_v61 = vmul.f32 %v1243_v54, %v2867_v3 }
 0x3a7   : > { %v1247_v62 = vpop.permute.xlu1 %1246 }
 0x3a8   : > { %v1260_v60 = vpack.c.bf16 %v1244_v59, %v1236_v55  ;;  %v1249_v57 = vpop.permute.xlu0 %1248  ;;  %v1261_v4 = vpack.c.bf16 %v1245_v61, %v1237_v56 }
 0x3a9   : > { %v1250_v7 = vsel %vm710_vm8, %v1247_v62, %v1249_v57  ;;  %v1251_v8 = vsel %vm710_vm8, %v1249_v57, %v1247_v62 }
 0x3aa   : > { %v1252_v9 = vmul.f32 %v2900_v35, %v1250_v7  ;;  %v1253_v12 = vmul.f32 %v2895_v11, %v1251_v8  ;;  %1286 = vmatprep.subr.bf16.mxu1 %v1261_v4 }
 0x3ab   : > { %1287 = vmatpush1.bf16.msra.mxu1 %v1260_v60 }
 0x3ac   : > { %v1262_v13 = vpack.c.bf16 %v1252_v9, %v1252_v9  ;;  %v1263_v5 = vpack.c.bf16 %v1253_v12, %v1253_v12 }
 0x3ae   : > { %2464 = vmatprep.subr.msk.bf16.mxu1 %vm747_vm4, %v1263_v5  ;;  %v1275_v20 = vsel %vm747_vm4, %v1262_v13, 0 }
 0x3af   : > { %1289 = vmatpush1.bf16.msra.mxu1 %v1275_v20 }
 0x3b2   : > { %2465 = vmatmul.mubr.msk.bf16.vlgmr.msra.gmra.mrb[8].mxu1 %vm926_vm11, %v3239_v25 }
 0x3b3   : > { %1469 = vmatprep.mubr.bf16.mxu1 %v2618_v2 }
 0x3b8   : > { %v3244_v26 = vpop.permute.xlu1 %905 }
 0x465   : > { %v3286_v47 = vpop.f32.mrb[8].mxu0 }
 0x466   : > { %v3288_v48 = vpop.f32.mrb[9].mxu0 }
 0x467   : > { %v1538_v0 = vpop.f32.mrb[10].mxu0 }
 0x468   : > { %v1539_v49 = vpop.f32.mrb[11].mxu0 }
 0x485   : > { %v1314_v27 = vpop.f32.mrb[8].mxu1 }
 0x486   : > { %v2496_v28 = vadd.f32 %v1314_v27, %v3244_v26  ;;  %v1316_v44 = vpop.f32.mrb[9].mxu1 }
 0x487   : > { %v2497_v1 = vadd.f32 %v1316_v44, %v3244_v26  ;;  %v3248_v30 = vpop.f32.mrb[10].mxu1 }
 0x488   : > { %v2466_v10 = vmul.f32 -1.442695, %v2496_v28  ;;  %v3250_v36 = vpop.f32.mrb[11].mxu1 }
 0x489   : > { %v2467_v37 = vmul.f32 -1.442695, %v2497_v1 }
 0x48a   : > { %2560 = vpow2.f32 %v2466_v10 }
 0x48b   : > { %2562 = vpow2.f32 %v2467_v37 }
 0x494   : > { %v2561_v38 = vpop.eup %2560 }
 0x495   : > { %v2563_v39 = vpop.eup %2562  ;;  %v1339_v40 = vadd.f32 1.0, %v2561_v38 }
 0x496   : > { %v1340_v41 = vadd.f32 1.0, %v2563_v39 }
 0x497   : > { %2564 = vrcp.f32 %v1339_v40 }
 0x498   : > { %2566 = vrcp.f32 %v1340_v41 }
 0x4a1   : > { %v2565_v42 = vpop.eup %2564 }
 0x4a2   : > { %v2567_v43 = vpop.eup %2566  ;;  %v3253_v45 = vmul.f32 %v2565_v42, %v3077_v14 }
 0x4a3   : > { %v3256_v46 = vmul.f32 %v2567_v43, %v3081_v15 }
 0x4a4   : > { %1353 = vrot.lane.b32.xlu0 %v3253_v45, %s2614_s22 }
 0x4a5   : > { %1355 = vrot.lane.b32.xlu1 %v3256_v46, %s2614_s22 }
 0x4a8   : > { %1361 = vrot.lane.b32.xlu0 %v3253_v45, %s2613_s21 }
 0x4a9   : > { %1363 = vrot.lane.b32.xlu1 %v3256_v46, %s2613_s21 }
 0x4ac   : > { %1369 = vrot.lane.b32.xlu0 %v3253_v45, %s2615_s2 }
 0x4ad   : > { %1371 = vrot.lane.b32.xlu1 %v3256_v46, %s2615_s2 }
 0x4b0   : > { %1377 = vrot.lane.b32.xlu0 %v3253_v45, %s3965_s20 }
 0x4b1   : > { %1379 = vrot.lane.b32.xlu1 %v3256_v46, %s3965_s20 }
 0x4b4   : > { %1385 = vrot.lane.b32.xlu0 %v3253_v45, %s3966_s23 }
 0x4b5   : > { %1387 = vrot.lane.b32.xlu1 %v3256_v46, %s3966_s23 }
 0x4b8   : > { %1393 = vrot.lane.b32.xlu0 %v3253_v45, %s2619_s25 }
 0x4b9   : > { %1395 = vrot.lane.b32.xlu1 %v3256_v46, %s2619_s25 }
 0x4bc   : > { %1401 = vrot.lane.b32.xlu0 %v3253_v45, %s3963_s26 }
 0x4bd   : > { %1403 = vrot.lane.b32.xlu1 %v3256_v46, %s3963_s26 }
 0x4c0   : > { %1409 = vrot.lane.b32.xlu0 %v3253_v45, %s3964_s29 }
 0x4c1   : > { %1411 = vrot.lane.b32.xlu1 %v3256_v46, %s3964_s29 }
 0x4c4   : > { %1494 = vperm.xlu0 %2541, %v1491_v50  }
 0x516   : > { %v1354_v53 = vpop.permute.xlu0 %1353 }
 0x517   : > { %v1356_v54 = vpop.permute.xlu1 %1355 }
 0x518   : > { %v1357_v55 = vsel %vm591_vm2, %v1354_v53, %v1356_v54  ;;  %v1358_v56 = vsel %vm591_vm2, %v1356_v54, %v1354_v53 }
 0x519   : > { %v1359_v57 = vmul.f32 %v1358_v56, %v2813_v23  ;;  %v1360_v4 = vmul.f32 %v1357_v55, %v2816_v24 }
 0x51a   : > { %v1362_v59 = vpop.permute.xlu0 %1361 }
 0x51b   : > { %v1364_v61 = vpop.permute.xlu1 %1363 }
 0x51c   : > { %v1365_v62 = vsel %vm608_vm1, %v1362_v59, %v1364_v61  ;;  %v1366_v60 = vsel %vm608_vm1, %v1364_v61, %v1362_v59 }
 0x51d   : > { %v1367_v7 = vmul.f32 %v1366_v60, %v2806_v21  ;;  %v1368_v8 = vmul.f32 %v1365_v62, %v2809_v22 }
 0x51e   : > { %v1370_v9 = vpop.permute.xlu0 %1369 }
 0x51f   : > { %v1417_v12 = vpack.c.bf16 %v1367_v7, %v1359_v57  ;;  %v1372_v13 = vpop.permute.xlu1 %1371  ;;  %v1418_v5 = vpack.c.bf16 %v1368_v8, %v1360_v4 }
 0x520   : > { %v1373_v20 = vsel %vm625_vm3, %v1370_v9, %v1372_v13  ;;  %v1374_v27 = vsel %vm625_vm3, %v1372_v13, %v1370_v9 }
 0x521   : > { %1437 = vmatprep.subr.bf16.mxu1 %v1418_v5  ;;  %v1375_v37 = vmul.f32 %v1374_v27, %v2828_v33  ;;  %v1376_v38 = vmul.f32 %v1373_v20, %v2831_v34 }
 0x522   : > { %1438 = vmatpush1.bf16.msra.mxu1 %v1417_v12  ;;  %v1378_v28 = vpop.permute.xlu0 %1377 }
 0x523   : > { %v1380_v44 = vpop.permute.xlu1 %1379 }
 0x524   : > { %v1381_v1 = vsel %vm642_vm0, %v1378_v28, %v1380_v44  ;;  %v1382_v10 = vsel %vm642_vm0, %v1380_v44, %v1378_v28 }
 0x525   : > { %v1383_v39 = vmul.f32 %v1382_v10, %v2794_v16  ;;  %v1384_v40 = vmul.f32 %v1381_v1, %v2797_v17 }
 0x526   : > { %v1386_v41 = vpop.permute.xlu0 %1385 }
 0x527   : > { %v1419_v42 = vpack.c.bf16 %v1383_v39, %v1375_v37  ;;  %v1388_v43 = vpop.permute.xlu1 %1387  ;;  %v1420_v0 = vpack.c.bf16 %v1384_v40, %v1376_v38  ;;  %v3352_v40 = vld [vmem:[%s3945_s16] sm:$0xf] }
 0x528   : > { %v1389_v49 = vsel %vm659_vm5, %v1386_v41, %v1388_v43  ;;  %v1390_v50 = vsel %vm659_vm5, %v1388_v43, %v1386_v41 }
 0x529   : > { %v1391_v53 = vmul.f32 %v1389_v49, %v2849_v51  ;;  %v1392_v54 = vmul.f32 %v1390_v50, %v2852_v52  ;;  %1439 = vmatprep.subr.bf16.mxu1 %v1420_v0 }
 0x52a   : > { %1440 = vmatpush1.bf16.msra.mxu1 %v1419_v42  ;;  %v1394_v55 = vpop.permute.xlu0 %1393 }
 0x52b   : > { %v1421_v56 = vpack.c.bf16 %v1391_v53, %v3253_v45  ;;  %v1396_v59 = vpop.permute.xlu1 %1395  ;;  %v1422_v61 = vpack.c.bf16 %v1392_v54, %v3256_v46 }
 0x52c   : > { %v1397_v62 = vsel %vm676_vm7, %v1394_v55, %v1396_v59  ;;  %v1398_v60 = vsel %vm676_vm7, %v1396_v59, %v1394_v55 }
 0x52d   : > { %1441 = vmatprep.subr.bf16.mxu1 %v1422_v61  ;;  %v1399_v45 = vmul.f32 %v1397_v62, %v2880_v18  ;;  %v1400_v46 = vmul.f32 %v1398_v60, %v2883_v19 }
 0x52e   : > { %1442 = vmatpush1.bf16.msra.mxu1 %v1421_v56  ;;  %v1402_v57 = vpop.permute.xlu0 %1401 }
 0x52f   : > { %v1404_v4 = vpop.permute.xlu1 %1403 }
 0x530   : > { %v1405_v7 = vsel %vm693_vm6, %v1402_v57, %v1404_v4  ;;  %v1406_v8 = vsel %vm693_vm6, %v1404_v4, %v1402_v57 }
 0x531   : > { %v1407_v9 = vmul.f32 %v1405_v7, %v2864_v63  ;;  %v1408_v12 = vmul.f32 %v1406_v8, %v2867_v3 }
 0x532   : > { %v1410_v13 = vpop.permute.xlu0 %1409 }
 0x533   : > { %v1423_v5 = vpack.c.bf16 %v1407_v9, %v1399_v45  ;;  %v1412_v20 = vpop.permute.xlu1 %1411  ;;  %v1424_v27 = vpack.c.bf16 %v1408_v12, %v1400_v46 }
 0x534   : > { %v1413_v28 = vsel %vm710_vm8, %v1410_v13, %v1412_v20  ;;  %v1414_v44 = vsel %vm710_vm8, %v1412_v20, %v1410_v13 }
 0x535   : > { %v1415_v1 = vmul.f32 %v2900_v35, %v1413_v28  ;;  %v1416_v10 = vmul.f32 %v2895_v11, %v1414_v44  ;;  %1443 = vmatprep.subr.bf16.mxu1 %v1424_v27 }
 0x536   : > { %1444 = vmatpush1.bf16.msra.mxu1 %v1423_v5 }
 0x537   : > { %v1425_v37 = vpack.c.bf16 %v1415_v1, %v1415_v1  ;;  %v1426_v38 = vpack.c.bf16 %v1416_v10, %v1416_v10 }
 0x539   : > { %2470 = vmatprep.subr.msk.bf16.mxu1 %vm747_vm4, %v1426_v38  ;;  %v1432_v39 = vsel %vm747_vm4, %v1425_v37, 0 }
 0x53a   : > { %1446 = vmatpush1.bf16.msra.mxu1 %v1432_v39 }
 0x53d   : > { %2471 = vmatmul.mubr.msk.bf16.vlgmr.msra.gmra.mrb[12].mxu1 %vm926_vm11, %v3352_v40 }
 0x53e   : > { %2082 = vmatprep.mubr.bf16.mxu1 %v2618_v2 }
 0x543   : > { %v1495_v11 = vpop.permute.xlu0 %1494 }
 0x544   : > { %v1535_v35 = vadd.f32 %v3286_v47, %v1495_v11  ;;  %v1537_v41 = vadd.f32 %v3288_v48, %v1495_v11 }
 0x546   : > { %v3359_v42 = vmax.f32 %v1535_v35, 0.0  ;;  %v1542_v43 = vmax.f32 %v1537_v41, 0.0 }
 0x548   : > { %1545 = vrot.lane.b32.xlu0 %v1542_v43, %s2614_s22  ;;  %1543 = vrot.lane.b32.xlu1 %v3359_v42, %s2614_s22 }
 0x54c   : > { %1553 = vrot.lane.b32.xlu0 %v1542_v43, %s2613_s21  ;;  %1551 = vrot.lane.b32.xlu1 %v3359_v42, %s2613_s21 }
 0x550   : > { %1561 = vrot.lane.b32.xlu0 %v1542_v43, %s2615_s2  ;;  %1559 = vrot.lane.b32.xlu1 %v3359_v42, %s2615_s2 }
 0x554   : > { %1569 = vrot.lane.b32.xlu0 %v1542_v43, %s3965_s20  ;;  %1567 = vrot.lane.b32.xlu1 %v3359_v42, %s3965_s20 }
 0x558   : > { %1577 = vrot.lane.b32.xlu0 %v1542_v43, %s3966_s23  ;;  %1575 = vrot.lane.b32.xlu1 %v3359_v42, %s3966_s23 }
 0x55c   : > { %1585 = vrot.lane.b32.xlu0 %v1542_v43, %s2619_s25  ;;  %1583 = vrot.lane.b32.xlu1 %v3359_v42, %s2619_s25 }
 0x560   : > { %1593 = vrot.lane.b32.xlu0 %v1542_v43, %s3963_s26  ;;  %1591 = vrot.lane.b32.xlu1 %v3359_v42, %s3963_s26 }
 0x564   : > { %1601 = vrot.lane.b32.xlu0 %v1542_v43, %s3964_s29  ;;  %1599 = vrot.lane.b32.xlu1 %v3359_v42, %s3964_s29 }
 0x5ba   : > { %v1546_v47 = vpop.permute.xlu0 %1545  ;;  %v1544_v48 = vpop.permute.xlu1 %1543 }
 0x5bb   : > { %v1547_v0 = vsel %vm591_vm2, %v1544_v48, %v1546_v47  ;;  %v1548_v49 = vsel %vm591_vm2, %v1546_v47, %v1544_v48 }
 0x5bc   : > { %v1549_v56 = vmul.f32 %v1548_v49, %v2813_v23  ;;  %v1550_v59 = vmul.f32 %v1547_v0, %v2816_v24 }
 0x5be   : > { %v1554_v50 = vpop.permute.xlu0 %1553  ;;  %v1552_v53 = vpop.permute.xlu1 %1551 }
 0x5bf   : > { %v1555_v54 = vsel %vm608_vm1, %v1552_v53, %v1554_v50  ;;  %v1556_v55 = vsel %vm608_vm1, %v1554_v50, %v1552_v53 }
 0x5c0   : > { %v1557_v61 = vmul.f32 %v1556_v55, %v2806_v21  ;;  %v1558_v62 = vmul.f32 %v1555_v54, %v2809_v22 }
 0x5c2   : > { %v1607_v60 = vpack.c.bf16 %v1557_v61, %v1549_v56  ;;  %v1562_v57 = vpop.permute.xlu0 %1561  ;;  %v1560_v4 = vpop.permute.xlu1 %1559  ;;  %v1608_v7 = vpack.c.bf16 %v1558_v62, %v1550_v59 }
 0x5c3   : > { %v1563_v8 = vsel %vm625_vm3, %v1560_v4, %v1562_v57  ;;  %v1564_v45 = vsel %vm625_vm3, %v1562_v57, %v1560_v4 }
 0x5c4   : > { %1623 = vmatprep.subr.bf16.mxu0 %v1608_v7  ;;  %v1565_v5 = vmul.f32 %v1564_v45, %v2828_v33  ;;  %v1566_v20 = vmul.f32 %v1563_v8, %v2831_v34  ;;  %v3435_v45 = vld [vmem:[%s3961_s1 + $0x10] ss:$0 sm:$0xff] }
 0x5c5   : > { %1624 = vmatpush1.bf16.msra.mxu0 %v1607_v60 }
 0x5c6   : > { %v1570_v46 = vpop.permute.xlu0 %1569  ;;  %v1568_v9 = vpop.permute.xlu1 %1567 }
 0x5c7   : > { %v1571_v12 = vsel %vm642_vm0, %v1568_v9, %v1570_v46  ;;  %v1572_v13 = vsel %vm642_vm0, %v1570_v46, %v1568_v9  ;;  %v3441_v9 = vld [vmem:[%s3961_s1 + $0x18] ss:$0 sm:$0xff] }
 0x5c8   : > { %v1573_v27 = vmul.f32 %v1572_v13, %v2794_v16  ;;  %v1574_v28 = vmul.f32 %v1571_v12, %v2797_v17 }
 0x5ca   : > { %v1609_v44 = vpack.c.bf16 %v1573_v27, %v1565_v5  ;;  %v1578_v1 = vpop.permute.xlu0 %1577  ;;  %v1576_v10 = vpop.permute.xlu1 %1575  ;;  %v1610_v37 = vpack.c.bf16 %v1574_v28, %v1566_v20  ;;  %v2498_v27 = vadd.f32 %v3248_v30, %v3037_v32  ;;  %v2499_v28 = vadd.f32 %v3250_v36, %v3037_v32 }
 0x5cb   : > { %v1579_v38 = vsel %vm659_vm5, %v1576_v10, %v1578_v1  ;;  %v1580_v39 = vsel %vm659_vm5, %v1578_v1, %v1576_v10 }
 0x5cc   : > { %v1581_v11 = vmul.f32 %v1579_v38, %v2849_v51  ;;  %v1582_v35 = vmul.f32 %v1580_v39, %v2852_v52  ;;  %1625 = vmatprep.subr.bf16.mxu0 %v1610_v37  ;;  %v2469_v1 = vmul.f32 -1.442695, %v2499_v28 }
 0x5cd   : > { %1626 = vmatpush1.bf16.msra.mxu0 %v1609_v44  ;;  %v2468_v44 = vmul.f32 -1.442695, %v2498_v27 }
 0x5ce   : > { %v1611_v41 = vpack.c.bf16 %v1581_v11, %v3359_v42  ;;  %v1586_v47 = vpop.permute.xlu0 %1585  ;;  %v1584_v48 = vpop.permute.xlu1 %1583  ;;  %v1612_v0 = vpack.c.bf16 %v1582_v35, %v1542_v43 }
 0x5cf   : > { %v1587_v49 = vsel %vm676_vm7, %v1584_v48, %v1586_v47  ;;  %v1588_v50 = vsel %vm676_vm7, %v1586_v47, %v1584_v48  ;;  %2568 = vpow2.f32 %v2468_v44 }
 0x5d0   : > { %1627 = vmatprep.subr.bf16.mxu0 %v1612_v0  ;;  %v1589_v42 = vmul.f32 %v1587_v49, %v2880_v18  ;;  %v1590_v43 = vmul.f32 %v1588_v50, %v2883_v19  ;;  %2570 = vpow2.f32 %v2469_v1 }
 0x5d1   : > { %1628 = vmatpush1.bf16.msra.mxu0 %v1611_v41 }
 0x5d2   : > { %v1594_v53 = vpop.permute.xlu0 %1593  ;;  %v1592_v54 = vpop.permute.xlu1 %1591 }
 0x5d3   : > { %v1595_v55 = vsel %vm693_vm6, %v1592_v54, %v1594_v53  ;;  %v1596_v56 = vsel %vm693_vm6, %v1594_v53, %v1592_v54 }
 0x5d4   : > { %v1597_v59 = vmul.f32 %v1595_v55, %v2864_v63  ;;  %v1598_v61 = vmul.f32 %v1596_v56, %v2867_v3 }
 0x5d6   : > { %v1613_v62 = vpack.c.bf16 %v1597_v59, %v1589_v42  ;;  %v1602_v60 = vpop.permute.xlu0 %1601  ;;  %v1600_v57 = vpop.permute.xlu1 %1599  ;;  %v1614_v4 = vpack.c.bf16 %v1598_v61, %v1590_v43 }
 0x5d7   : > { %v1603_v7 = vsel %vm710_vm8, %v1600_v57, %v1602_v60  ;;  %v1604_v8 = vsel %vm710_vm8, %v1602_v60, %v1600_v57 }
 0x5d8   : > { %v1605_v46 = vmul.f32 %v3435_v45, %v1603_v7  ;;  %v1606_v12 = vmul.f32 %v3441_v9, %v1604_v8  ;;  %1629 = vmatprep.subr.bf16.mxu0 %v1614_v4 }
 0x5d9   : > { %1630 = vmatpush1.bf16.msra.mxu0 %v1613_v62  ;;  %v2569_v10 = vpop.eup %2568 }
 0x5da   : > { %v1615_v13 = vpack.c.bf16 %v1605_v46, %v1605_v46  ;;  %v1616_v5 = vpack.c.bf16 %v1606_v12, %v1606_v12  ;;  %v2571_v37 = vpop.eup %2570 }
 0x5db   : > { %v1342_v38 = vadd.f32 1.0, %v2571_v37 }
 0x5dc   : > { %2474 = vmatprep.subr.msk.bf16.mxu0 %vm747_vm4, %v1616_v5  ;;  %v1618_v20 = vsel %vm747_vm4, %v1615_v13, 0 }
 0x5dd   : > { %1632 = vmatpush1.bf16.msra.mxu0 %v1618_v20 }
 0x5e0   : > { %2475 = vmatmul.mubr.msk.bf16.vlgmr.msra.gmra.mrb[12].mxu0 %vm926_vm11, %v3019_v29  ;;  %v1341_v29 = vadd.f32 1.0, %v2569_v10 }
 0x5e1   : > { %1665 = vmatprep.mubr.bf16.mxu0 %v2618_v2 }
 0x5e2   : > { %2572 = vrcp.f32 %v1341_v29 }
 0x5e3   : > { %2574 = vrcp.f32 %v1342_v38 }
 0x5e8   : > { %2476 = vmatmul.mubr.msk.bf16.gmra.mrb[16].mxu0 %vm926_vm11, %v3032_v31 }
 0x5e9   : > { %1786 = vmatprep.mubr.bf16.mxu0 %v2618_v2 }
 0x5ec   : > { %v2573_v36 = vpop.eup %2572 }
 0x5ed   : > { %v2575_v47 = vpop.eup %2574  ;;  %v1484_v48 = vsub.f32 1.0, %v2573_v36  ;;  %v1482_v53 = vmul.f32 %v2573_v36, %v3077_v14 }
 0x5ee   : > { %v1485_v49 = vsub.f32 1.0, %v2575_v47  ;;  %v1483_v55 = vmul.f32 %v2575_v47, %v3081_v15 }
 0x610   : > { %v1471_v39 = vpop.f32.mrb[12].mxu1 }
 0x611   : > { %v2500_v31 = vadd.f32 %v1471_v39, %v3057_v58  ;;  %v1473_v11 = vpop.f32.mrb[13].mxu1 }
 0x612   : > { %v2501_v35 = vadd.f32 %v1473_v11, %v3057_v58  ;;  %v1475_v30 = vpop.f32.mrb[14].mxu1 }
 0x613   : > { %2576 = vtanh.f32 %v2500_v31  ;;  %v1476_v41 = vpop.f32.mrb[15].mxu1 }
 0x614   : > { %2578 = vtanh.f32 %v2501_v35 }
 0x61d   : > { %v2577_v0 = vpop.eup %2576 }
 0x61e   : > { %v2579_v50 = vpop.eup %2578  ;;  %v1486_v54 = vmul.f32 %v2577_v0, %v1484_v48 }
 0x61f   : > { %v1487_v56 = vmul.f32 %v2579_v50, %v1485_v49 }
 0x620   : > { %v3460_v42 = vadd.f32 %v1486_v54, %v1482_v53 }
 0x621   : > { %v3462_v43 = vadd.f32 %v1487_v56, %v1483_v55 }
 0x622   : > { %1674 = vrot.lane.b32.xlu1 %v3460_v42, %s2614_s22 }
 0x623   : > { %1676 = vrot.lane.b32.xlu0 %v3462_v43, %s2614_s22 }
 0x626   : > { %1682 = vrot.lane.b32.xlu1 %v3460_v42, %s2613_s21 }
 0x627   : > { %1684 = vrot.lane.b32.xlu0 %v3462_v43, %s2613_s21 }
 0x62a   : > { %1690 = vrot.lane.b32.xlu1 %v3460_v42, %s2615_s2 }
 0x62b   : > { %1692 = vrot.lane.b32.xlu0 %v3462_v43, %s2615_s2 }
 0x62e   : > { %1698 = vrot.lane.b32.xlu1 %v3460_v42, %s3965_s20 }
 0x62f   : > { %1700 = vrot.lane.b32.xlu0 %v3462_v43, %s3965_s20 }
 0x632   : > { %1706 = vrot.lane.b32.xlu1 %v3460_v42, %s3966_s23 }
 0x633   : > { %1708 = vrot.lane.b32.xlu0 %v3462_v43, %s3966_s23 }
 0x636   : > { %1714 = vrot.lane.b32.xlu1 %v3460_v42, %s2619_s25 }
 0x637   : > { %1716 = vrot.lane.b32.xlu0 %v3462_v43, %s2619_s25 }
 0x63a   : > { %1722 = vrot.lane.b32.xlu1 %v3460_v42, %s3963_s26 }
 0x63b   : > { %1724 = vrot.lane.b32.xlu0 %v3462_v43, %s3963_s26 }
 0x63e   : > { %1730 = vrot.lane.b32.xlu1 %v3460_v42, %s3964_s29 }
 0x63f   : > { %1732 = vrot.lane.b32.xlu0 %v3462_v43, %s3964_s29 }
 0x694   : > { %v1675_v59 = vpop.permute.xlu1 %1674 }
 0x695   : > { %v1677_v61 = vpop.permute.xlu0 %1676 }
 0x696   : > { %v1678_v62 = vsel %vm591_vm2, %v1675_v59, %v1677_v61  ;;  %v1679_v60 = vsel %vm591_vm2, %v1677_v61, %v1675_v59 }
 0x697   : > { %v1680_v46 = vmul.f32 %v1679_v60, %v2813_v23  ;;  %v1681_v12 = vmul.f32 %v1678_v62, %v2816_v24 }
 0x698   : > { %v1683_v57 = vpop.permute.xlu1 %1682 }
 0x699   : > { %v1685_v4 = vpop.permute.xlu0 %1684 }
 0x69a   : > { %v1686_v7 = vsel %vm608_vm1, %v1683_v57, %v1685_v4  ;;  %v1687_v8 = vsel %vm608_vm1, %v1685_v4, %v1683_v57 }
 0x69b   : > { %v1688_v13 = vmul.f32 %v1687_v8, %v2806_v21  ;;  %v1689_v5 = vmul.f32 %v1686_v7, %v2809_v22 }
 0x69c   : > { %v1691_v20 = vpop.permute.xlu1 %1690 }
 0x69d   : > { %v1738_v27 = vpack.c.bf16 %v1688_v13, %v1680_v46  ;;  %v1693_v28 = vpop.permute.xlu0 %1692  ;;  %v1739_v44 = vpack.c.bf16 %v1689_v5, %v1681_v12 }
 0x69e   : > { %v1694_v1 = vsel %vm625_vm3, %v1691_v20, %v1693_v28  ;;  %v1695_v10 = vsel %vm625_vm3, %v1693_v28, %v1691_v20 }
 0x69f   : > { %1754 = vmatprep.subr.bf16.mxu0 %v1739_v44  ;;  %v1696_v31 = vmul.f32 %v1695_v10, %v2828_v33  ;;  %v1697_v11 = vmul.f32 %v1694_v1, %v2831_v34 }
 0x6a0   : > { %1755 = vmatpush1.bf16.msra.mxu0 %v1738_v27  ;;  %v1699_v37 = vpop.permute.xlu1 %1698 }
 0x6a1   : > { %v1701_v29 = vpop.permute.xlu0 %1700 }
 0x6a2   : > { %v1702_v38 = vsel %vm642_vm0, %v1699_v37, %v1701_v29  ;;  %v1703_v39 = vsel %vm642_vm0, %v1701_v29, %v1699_v37 }
 0x6a3   : > { %v1704_v35 = vmul.f32 %v1703_v39, %v2794_v16  ;;  %v1705_v30 = vmul.f32 %v1702_v38, %v2797_v17 }
 0x6a4   : > { %v1707_v41 = vpop.permute.xlu1 %1706 }
 0x6a5   : > { %v1740_v36 = vpack.c.bf16 %v1704_v35, %v1696_v31  ;;  %v1709_v47 = vpop.permute.xlu0 %1708  ;;  %v1741_v48 = vpack.c.bf16 %v1705_v30, %v1697_v11 }
 0x6a6   : > { %v1710_v0 = vsel %vm659_vm5, %v1707_v41, %v1709_v47  ;;  %v1711_v49 = vsel %vm659_vm5, %v1709_v47, %v1707_v41 }
 0x6a7   : > { %v1712_v50 = vmul.f32 %v1710_v0, %v2849_v51  ;;  %v1713_v53 = vmul.f32 %v1711_v49, %v2852_v52  ;;  %1756 = vmatprep.subr.bf16.mxu0 %v1741_v48 }
 0x6a8   : > { %1757 = vmatpush1.bf16.msra.mxu0 %v1740_v36  ;;  %v1715_v54 = vpop.permute.xlu1 %1714 }
 0x6a9   : > { %v1742_v55 = vpack.c.bf16 %v1712_v50, %v3460_v42  ;;  %v1717_v56 = vpop.permute.xlu0 %1716  ;;  %v1743_v59 = vpack.c.bf16 %v1713_v53, %v3462_v43 }
 0x6aa   : > { %v1718_v61 = vsel %vm676_vm7, %v1715_v54, %v1717_v56  ;;  %v1719_v62 = vsel %vm676_vm7, %v1717_v56, %v1715_v54 }
 0x6ab   : > { %1758 = vmatprep.subr.bf16.mxu0 %v1743_v59  ;;  %v1720_v8 = vmul.f32 %v1718_v61, %v2880_v18  ;;  %v1721_v46 = vmul.f32 %v1719_v62, %v2883_v19 }
 0x6ac   : > { %1759 = vmatpush1.bf16.msra.mxu0 %v1742_v55  ;;  %v1723_v60 = vpop.permute.xlu1 %1722 }
 0x6ad   : > { %v1725_v57 = vpop.permute.xlu0 %1724 }
 0x6ae   : > { %v1726_v4 = vsel %vm693_vm6, %v1723_v60, %v1725_v57  ;;  %v1727_v7 = vsel %vm693_vm6, %v1725_v57, %v1723_v60 }
 0x6af   : > { %v1728_v12 = vmul.f32 %v1726_v4, %v2864_v63  ;;  %v1729_v13 = vmul.f32 %v1727_v7, %v2867_v3 }
 0x6b0   : > { %v1731_v5 = vpop.permute.xlu1 %1730 }
 0x6b1   : > { %v1744_v20 = vpack.c.bf16 %v1728_v12, %v1720_v8  ;;  %v1733_v27 = vpop.permute.xlu0 %1732  ;;  %v1745_v28 = vpack.c.bf16 %v1729_v13, %v1721_v46 }
 0x6b2   : > { %v1734_v44 = vsel %vm710_vm8, %v1731_v5, %v1733_v27  ;;  %v1735_v1 = vsel %vm710_vm8, %v1733_v27, %v1731_v5 }
 0x6b3   : > { %v1736_v10 = vmul.f32 %v3435_v45, %v1734_v44  ;;  %v1737_v37 = vmul.f32 %v3441_v9, %v1735_v1  ;;  %1760 = vmatprep.subr.bf16.mxu0 %v1745_v28 }
 0x6b4   : > { %1761 = vmatpush1.bf16.msra.mxu0 %v1744_v20 }
 0x6b5   : > { %v1746_v29 = vpack.c.bf16 %v1736_v10, %v1736_v10  ;;  %v1747_v38 = vpack.c.bf16 %v1737_v37, %v1737_v37 }
 0x6b7   : > { %2477 = vmatprep.subr.msk.bf16.mxu0 %vm747_vm4, %v1747_v38  ;;  %v1749_v39 = vsel %vm747_vm4, %v1746_v29, 0 }
 0x6b8   : > { %1763 = vmatpush1.bf16.msra.mxu0 %v1749_v39 }
 0x6bb   : > { %2478 = vmatmul.mubr.msk.bf16.vlgmr.msra.gmra.mrb[12].mxu0 %vm926_vm11, %v3239_v25 }
 0x6bc   : > { %1939 = vmatprep.mubr.bf16.mxu0 %v2618_v2 }
 0x78e   : > { %v1788_v31 = vpop.f32.mrb[12].mxu0 }
 0x78f   : > { %v2502_v11 = vadd.f32 %v1788_v31, %v3244_v26  ;;  %v1790_v35 = vpop.f32.mrb[13].mxu0 }
 0x790   : > { %v2503_v30 = vadd.f32 %v1790_v35, %v3244_v26  ;;  %v3553_v41 = vpop.f32.mrb[14].mxu0 }
 0x791   : > { %v2479_v36 = vmul.f32 -1.442695, %v2502_v11  ;;  %v3555_v47 = vpop.f32.mrb[15].mxu0 }
 0x792   : > { %v2480_v48 = vmul.f32 -1.442695, %v2503_v30 }
 0x793   : > { %2580 = vpow2.f32 %v2479_v36 }
 0x794   : > { %2582 = vpow2.f32 %v2480_v48 }
 0x79d   : > { %v2581_v0 = vpop.eup %2580 }
 0x79e   : > { %v2583_v49 = vpop.eup %2582  ;;  %v1813_v50 = vadd.f32 1.0, %v2581_v0 }
 0x79f   : > { %v1814_v25 = vadd.f32 1.0, %v2583_v49 }
 0x7a0   : > { %2584 = vrcp.f32 %v1813_v50 }
 0x7a1   : > { %2586 = vrcp.f32 %v1814_v25 }
 0x7aa   : > { %v2585_v53 = vpop.eup %2584 }
 0x7ab   : > { %v2587_v54 = vpop.eup %2586  ;;  %v3558_v55 = vmul.f32 %v2585_v53, %v3460_v42 }
 0x7ac   : > { %v1826_v26 = vmul.f32 %v2587_v54, %v3462_v43 }
 0x7ad   : > { %1827 = vrot.lane.b32.xlu1 %v3558_v55, %s2614_s22 }
 0x7ae   : > { %1829 = vrot.lane.b32.xlu0 %v1826_v26, %s2614_s22 }
 0x7b1   : > { %1835 = vrot.lane.b32.xlu1 %v3558_v55, %s2613_s21 }
 0x7b2   : > { %1837 = vrot.lane.b32.xlu0 %v1826_v26, %s2613_s21 }
 0x7b5   : > { %1843 = vrot.lane.b32.xlu1 %v3558_v55, %s2615_s2 }
 0x7b6   : > { %1845 = vrot.lane.b32.xlu0 %v1826_v26, %s2615_s2 }
 0x7b9   : > { %1851 = vrot.lane.b32.xlu1 %v3558_v55, %s3965_s20 }
 0x7ba   : > { %1853 = vrot.lane.b32.xlu0 %v1826_v26, %s3965_s20 }
 0x7bd   : > { %1859 = vrot.lane.b32.xlu1 %v3558_v55, %s3966_s23 }
 0x7be   : > { %1861 = vrot.lane.b32.xlu0 %v1826_v26, %s3966_s23 }
 0x7c1   : > { %1867 = vrot.lane.b32.xlu1 %v3558_v55, %s2619_s25 }
 0x7c2   : > { %1869 = vrot.lane.b32.xlu0 %v1826_v26, %s2619_s25 }
 0x7c5   : > { %1875 = vrot.lane.b32.xlu1 %v3558_v55, %s3963_s26 }
 0x7c6   : > { %1877 = vrot.lane.b32.xlu0 %v1826_v26, %s3963_s26 }
 0x7c9   : > { %1883 = vrot.lane.b32.xlu1 %v3558_v55, %s3964_s29 }
 0x7ca   : > { %1885 = vrot.lane.b32.xlu0 %v1826_v26, %s3964_s29 }
 0x81f   : > { %v1828_v56 = vpop.permute.xlu1 %1827 }
 0x820   : > { %v1830_v59 = vpop.permute.xlu0 %1829 }
 0x821   : > { %v1831_v61 = vsel %vm591_vm2, %v1828_v56, %v1830_v59  ;;  %v1832_v62 = vsel %vm591_vm2, %v1830_v59, %v1828_v56 }
 0x822   : > { %v1833_v8 = vmul.f32 %v1832_v62, %v2813_v23  ;;  %v1834_v46 = vmul.f32 %v1831_v61, %v2816_v24 }
 0x823   : > { %v1836_v60 = vpop.permute.xlu1 %1835 }
 0x824   : > { %v1838_v57 = vpop.permute.xlu0 %1837 }
 0x825   : > { %v1839_v4 = vsel %vm608_vm1, %v1836_v60, %v1838_v57  ;;  %v1840_v7 = vsel %vm608_vm1, %v1838_v57, %v1836_v60 }
 0x826   : > { %v1841_v12 = vmul.f32 %v1840_v7, %v2806_v21  ;;  %v1842_v13 = vmul.f32 %v1839_v4, %v2809_v22 }
 0x827   : > { %v1844_v5 = vpop.permute.xlu1 %1843 }
 0x828   : > { %v1891_v20 = vpack.c.bf16 %v1841_v12, %v1833_v8  ;;  %v1846_v27 = vpop.permute.xlu0 %1845  ;;  %v1892_v28 = vpack.c.bf16 %v1842_v13, %v1834_v46 }
 0x829   : > { %v1847_v44 = vsel %vm625_vm3, %v1844_v5, %v1846_v27  ;;  %v1848_v1 = vsel %vm625_vm3, %v1846_v27, %v1844_v5 }
 0x82a   : > { %1907 = vmatprep.subr.bf16.mxu0 %v1892_v28  ;;  %v1849_v39 = vmul.f32 %v1848_v1, %v2828_v33  ;;  %v1850_v31 = vmul.f32 %v1847_v44, %v2831_v34 }
 0x82b   : > { %v1852_v10 = vpop.permute.xlu1 %1851  ;;  %1908 = vmatpush1.bf16.msra.mxu0 %v1891_v20 }
 0x82c   : > { %v1854_v37 = vpop.permute.xlu0 %1853 }
 0x82d   : > { %v1855_v29 = vsel %vm642_vm0, %v1852_v10, %v1854_v37  ;;  %v1856_v38 = vsel %vm642_vm0, %v1854_v37, %v1852_v10 }
 0x82e   : > { %v1857_v11 = vmul.f32 %v1856_v38, %v2794_v16  ;;  %v1858_v35 = vmul.f32 %v1855_v29, %v2797_v17 }
 0x82f   : > { %v1860_v30 = vpop.permute.xlu1 %1859 }
 0x830   : > { %v1893_v36 = vpack.c.bf16 %v1857_v11, %v1849_v39  ;;  %v1862_v48 = vpop.permute.xlu0 %1861  ;;  %v1894_v0 = vpack.c.bf16 %v1858_v35, %v1850_v31  ;;  %v2504_v39 = vadd.f32 %v3553_v41, %v3037_v32  ;;  %v2505_v31 = vadd.f32 %v3555_v47, %v3037_v32 }
 0x831   : > { %v1863_v49 = vsel %vm659_vm5, %v1860_v30, %v1862_v48  ;;  %v1864_v50 = vsel %vm659_vm5, %v1862_v48, %v1860_v30 }
 0x832   : > { %v1865_v25 = vmul.f32 %v1863_v49, %v2849_v51  ;;  %v1866_v53 = vmul.f32 %v1864_v50, %v2852_v52  ;;  %1909 = vmatprep.subr.bf16.mxu0 %v1894_v0  ;;  %v2481_v11 = vmul.f32 -1.442695, %v2504_v39  ;;  %v2482_v35 = vmul.f32 -1.442695, %v2505_v31 }
 0x833   : > { %v1868_v54 = vpop.permute.xlu1 %1867  ;;  %1910 = vmatpush1.bf16.msra.mxu0 %v1893_v36 }
 0x834   : > { %v1895_v56 = vpack.c.bf16 %v1865_v25, %v3558_v55  ;;  %v1870_v59 = vpop.permute.xlu0 %1869  ;;  %v1896_v61 = vpack.c.bf16 %v1866_v53, %v1826_v26  ;;  %2588 = vpow2.f32 %v2481_v11 }
 0x835   : > { %v1871_v62 = vsel %vm676_vm7, %v1868_v54, %v1870_v59  ;;  %v1872_v60 = vsel %vm676_vm7, %v1870_v59, %v1868_v54  ;;  %2590 = vpow2.f32 %v2482_v35 }
 0x836   : > { %1911 = vmatprep.subr.bf16.mxu0 %v1896_v61  ;;  %v1873_v55 = vmul.f32 %v1871_v62, %v2880_v18  ;;  %v1874_v26 = vmul.f32 %v1872_v60, %v2883_v19 }
 0x837   : > { %v1876_v57 = vpop.permute.xlu1 %1875  ;;  %1912 = vmatpush1.bf16.msra.mxu0 %v1895_v56 }
 0x838   : > { %v1878_v4 = vpop.permute.xlu0 %1877 }
 0x839   : > { %v1879_v7 = vsel %vm693_vm6, %v1876_v57, %v1878_v4  ;;  %v1880_v8 = vsel %vm693_vm6, %v1878_v4, %v1876_v57 }
 0x83a   : > { %v1881_v46 = vmul.f32 %v1879_v7, %v2864_v63  ;;  %v1882_v12 = vmul.f32 %v1880_v8, %v2867_v3 }
 0x83b   : > { %v1884_v13 = vpop.permute.xlu1 %1883 }
 0x83c   : > { %v1897_v5 = vpack.c.bf16 %v1881_v46, %v1873_v55  ;;  %v1886_v20 = vpop.permute.xlu0 %1885  ;;  %v1898_v27 = vpack.c.bf16 %v1882_v12, %v1874_v26 }
 0x83d   : > { %v1887_v28 = vsel %vm710_vm8, %v1884_v13, %v1886_v20  ;;  %v1888_v44 = vsel %vm710_vm8, %v1886_v20, %v1884_v13 }
 0x83e   : > { %v1889_v1 = vmul.f32 %v3435_v45, %v1887_v28  ;;  %v1890_v10 = vmul.f32 %v3441_v9, %v1888_v44  ;;  %1913 = vmatprep.subr.bf16.mxu0 %v1898_v27  ;;  %v2589_v30 = vpop.eup %2588 }
 0x83f   : > { %1914 = vmatpush1.bf16.msra.mxu0 %v1897_v5  ;;  %v2591_v36 = vpop.eup %2590  ;;  %v1815_v48 = vadd.f32 1.0, %v2589_v30 }
 0x840   : > { %v1899_v37 = vpack.c.bf16 %v1889_v1, %v1889_v1  ;;  %v1900_v29 = vpack.c.bf16 %v1890_v10, %v1890_v10  ;;  %v1816_v0 = vadd.f32 1.0, %v2591_v36 }
 0x841   : > { %2592 = vrcp.f32 %v1815_v48 }
 0x842   : > { %2483 = vmatprep.subr.msk.bf16.mxu0 %vm747_vm4, %v1900_v29  ;;  %v1902_v38 = vsel %vm747_vm4, %v1899_v37, 0  ;;  %2594 = vrcp.f32 %v1816_v0 }
 0x843   : > { %1916 = vmatpush1.bf16.msra.mxu0 %v1902_v38 }
 0x846   : > { %2484 = vmatmul.mubr.msk.bf16.vlgmr.msra.gmra.mrb[16].mxu0 %vm926_vm11, %v3352_v40 }
 0x847   : > { %2364 = vmatprep.mubr.bf16.mxu0 %v2618_v2 }
 0x84b   : > { %v2593_v32 = vpop.eup %2592 }
 0x84c   : > { %v2595_v47 = vpop.eup %2594  ;;  %v1954_v54 = vsub.f32 1.0, %v2593_v32  ;;  %v1952_v62 = vmul.f32 %v2593_v32, %v3460_v42 }
 0x84d   : > { %v1955_v59 = vsub.f32 1.0, %v2595_v47  ;;  %v1953_v57 = vmul.f32 %v2595_v47, %v3462_v43 }
 0x919   : > { %v1941_v49 = vpop.f32.mrb[16].mxu0 }
 0x91a   : > { %v2506_v40 = vadd.f32 %v1941_v49, %v3057_v58  ;;  %v1943_v50 = vpop.f32.mrb[17].mxu0 }
 0x91b   : > { %v2507_v25 = vadd.f32 %v1943_v50, %v3057_v58  ;;  %v1945_v41 = vpop.f32.mrb[18].mxu0  ;;  %v2035_v58 = vld [vmem:[%s3942_s13] sm:$0xff] }
 0x91c   : > { %2596 = vtanh.f32 %v2506_v40  ;;  %v1946_v53 = vpop.f32.mrb[19].mxu0 }
 0x91d   : > { %2598 = vtanh.f32 %v2507_v25 }
 0x926   : > { %v2597_v56 = vpop.eup %2596 }
 0x927   : > { %v2599_v61 = vpop.eup %2598  ;;  %v1956_v60 = vmul.f32 %v2597_v56, %v1954_v54 }
 0x928   : > { %v1957_v4 = vmul.f32 %v2599_v61, %v1955_v59 }
 0x929   : > { %v3647_v7 = vadd.f32 %v1956_v60, %v1952_v62 }
 0x92a   : > { %v1959_v8 = vadd.f32 %v1957_v4, %v1953_v57 }
 0x92b   : > { %1960 = vrot.lane.b32.xlu1 %v3647_v7, %s2614_s22 }
 0x92c   : > { %1962 = vrot.lane.b32.xlu0 %v1959_v8, %s2614_s22 }
 0x92f   : > { %1968 = vrot.lane.b32.xlu1 %v3647_v7, %s2613_s21 }
 0x930   : > { %1970 = vrot.lane.b32.xlu0 %v1959_v8, %s2613_s21 }
 0x933   : > { %1976 = vrot.lane.b32.xlu1 %v3647_v7, %s2615_s2 }
 0x934   : > { %1978 = vrot.lane.b32.xlu0 %v1959_v8, %s2615_s2 }
 0x937   : > { %1984 = vrot.lane.b32.xlu1 %v3647_v7, %s3965_s20 }
 0x938   : > { %1986 = vrot.lane.b32.xlu0 %v1959_v8, %s3965_s20 }
 0x93b   : > { %1992 = vrot.lane.b32.xlu1 %v3647_v7, %s3966_s23 }
 0x93c   : > { %1994 = vrot.lane.b32.xlu0 %v1959_v8, %s3966_s23 }
 0x93f   : > { %2000 = vrot.lane.b32.xlu1 %v3647_v7, %s2619_s25 }
 0x940   : > { %2002 = vrot.lane.b32.xlu0 %v1959_v8, %s2619_s25 }
 0x943   : > { %2008 = vrot.lane.b32.xlu1 %v3647_v7, %s3963_s26 }
 0x944   : > { %2010 = vrot.lane.b32.xlu0 %v1959_v8, %s3963_s26 }
 0x947   : > { %2016 = vrot.lane.b32.xlu1 %v3647_v7, %s3964_s29 }
 0x948   : > { %2018 = vrot.lane.b32.xlu0 %v1959_v8, %s3964_s29 }
 0x94b   : > { %2038 = vperm.xlu1 %2542, %v2035_v58  }
 0x99d   : > { %v1961_v55 = vpop.permute.xlu1 %1960 }
 0x99e   : > { %v1963_v26 = vpop.permute.xlu0 %1962 }
 0x99f   : > { %v1964_v46 = vsel %vm591_vm2, %v1961_v55, %v1963_v26  ;;  %v1965_v12 = vsel %vm591_vm2, %v1963_v26, %v1961_v55 }
 0x9a0   : > { %v1966_v28 = vmul.f32 %v1965_v12, %v2813_v23  ;;  %v1967_v44 = vmul.f32 %v1964_v46, %v2816_v24 }
 0x9a1   : > { %v1969_v13 = vpop.permute.xlu1 %1968 }
 0x9a2   : > { %v1971_v5 = vpop.permute.xlu0 %1970 }
 0x9a3   : > { %v1972_v20 = vsel %vm608_vm1, %v1969_v13, %v1971_v5  ;;  %v1973_v27 = vsel %vm608_vm1, %v1971_v5, %v1969_v13 }
 0x9a4   : > { %v1974_v1 = vmul.f32 %v1973_v27, %v2806_v21  ;;  %v1975_v10 = vmul.f32 %v1972_v20, %v2809_v22 }
 0x9a5   : > { %v1977_v37 = vpop.permute.xlu1 %1976 }
 0x9a6   : > { %v2024_v29 = vpack.c.bf16 %v1974_v1, %v1966_v28  ;;  %v1979_v38 = vpop.permute.xlu0 %1978  ;;  %v2025_v39 = vpack.c.bf16 %v1975_v10, %v1967_v44 }
 0x9a7   : > { %v1980_v31 = vsel %vm625_vm3, %v1977_v37, %v1979_v38  ;;  %v1981_v11 = vsel %vm625_vm3, %v1979_v38, %v1977_v37 }
 0x9a8   : > { %2050 = vmatprep.subr.bf16.mxu1 %v2025_v39  ;;  %v1982_v0 = vmul.f32 %v1981_v11, %v2828_v33  ;;  %v1983_v49 = vmul.f32 %v1980_v31, %v2831_v34  ;;  %v2034_v11 = vld [vmem:[%s3939_s10] sm:$0xf] }
 0x9a9   : > { %v1985_v35 = vpop.permute.xlu1 %1984  ;;  %2051 = vmatpush1.bf16.msra.mxu1 %v2024_v29 }
 0x9aa   : > { %v1987_v30 = vpop.permute.xlu0 %1986 }
 0x9ab   : > { %v1988_v36 = vsel %vm642_vm0, %v1985_v35, %v1987_v30  ;;  %v1989_v48 = vsel %vm642_vm0, %v1987_v30, %v1985_v35 }
 0x9ac   : > { %v1990_v40 = vmul.f32 %v1989_v48, %v2794_v16  ;;  %v1991_v50 = vmul.f32 %v1988_v36, %v2797_v17 }
 0x9ad   : > { %v1993_v25 = vpop.permute.xlu1 %1992 }
 0x9ae   : > { %v2026_v41 = vpack.c.bf16 %v1990_v40, %v1982_v0  ;;  %v1995_v53 = vpop.permute.xlu0 %1994  ;;  %v2027_v32 = vpack.c.bf16 %v1991_v50, %v1983_v49 }
 0x9af   : > { %v1996_v47 = vsel %vm659_vm5, %v1993_v25, %v1995_v53  ;;  %v1997_v54 = vsel %vm659_vm5, %v1995_v53, %v1993_v25 }
 0x9b0   : > { %v1998_v56 = vmul.f32 %v1996_v47, %v2849_v51  ;;  %v1999_v59 = vmul.f32 %v1997_v54, %v2852_v52  ;;  %2052 = vmatprep.subr.bf16.mxu1 %v2027_v32 }
 0x9b1   : > { %v2001_v61 = vpop.permute.xlu1 %2000  ;;  %2053 = vmatpush1.bf16.msra.mxu1 %v2026_v41 }
 0x9b2   : > { %v2028_v62 = vpack.c.bf16 %v1998_v56, %v3647_v7  ;;  %v2003_v60 = vpop.permute.xlu0 %2002  ;;  %v2029_v57 = vpack.c.bf16 %v1999_v59, %v1959_v8 }
 0x9b3   : > { %v2004_v4 = vsel %vm676_vm7, %v2001_v61, %v2003_v60  ;;  %v2005_v58 = vsel %vm676_vm7, %v2003_v60, %v2001_v61 }
 0x9b4   : > { %2054 = vmatprep.subr.bf16.mxu1 %v2029_v57  ;;  %v2006_v7 = vmul.f32 %v2004_v4, %v2880_v18  ;;  %v2007_v8 = vmul.f32 %v2005_v58, %v2883_v19 }
 0x9b5   : > { %v2009_v55 = vpop.permute.xlu1 %2008  ;;  %2055 = vmatpush1.bf16.msra.mxu1 %v2028_v62 }
 0x9b6   : > { %v2011_v26 = vpop.permute.xlu0 %2010 }
 0x9b7   : > { %v2012_v46 = vsel %vm693_vm6, %v2009_v55, %v2011_v26  ;;  %v2013_v12 = vsel %vm693_vm6, %v2011_v26, %v2009_v55 }
 0x9b8   : > { %v2014_v13 = vmul.f32 %v2012_v46, %v2864_v63  ;;  %v2015_v5 = vmul.f32 %v2013_v12, %v2867_v3 }
 0x9b9   : > { %v2017_v20 = vpop.permute.xlu1 %2016 }
 0x9ba   : > { %v2030_v27 = vpack.c.bf16 %v2014_v13, %v2006_v7  ;;  %v2019_v28 = vpop.permute.xlu0 %2018  ;;  %v2031_v44 = vpack.c.bf16 %v2015_v5, %v2007_v8 }
 0x9bb   : > { %v2020_v1 = vsel %vm710_vm8, %v2017_v20, %v2019_v28  ;;  %v2021_v10 = vsel %vm710_vm8, %v2019_v28, %v2017_v20 }
 0x9bc   : > { %v2022_v37 = vmul.f32 %v3435_v45, %v2020_v1  ;;  %v2023_v29 = vmul.f32 %v3441_v9, %v2021_v10  ;;  %2056 = vmatprep.subr.bf16.mxu1 %v2031_v44 }
 0x9bd   : > { %2057 = vmatpush1.bf16.msra.mxu1 %v2030_v27 }
 0x9be   : > { %v2032_v38 = vpack.c.bf16 %v2022_v37, %v2022_v37  ;;  %v2033_v39 = vpack.c.bf16 %v2023_v29, %v2023_v29 }
 0x9c0   : > { %2485 = vmatprep.subr.msk.bf16.mxu1 %vm747_vm4, %v2033_v39  ;;  %v2045_v31 = vsel %vm747_vm4, %v2032_v38, 0 }
 0x9c1   : > { %2059 = vmatpush1.bf16.msra.mxu1 %v2045_v31 }
 0x9c4   : > { %2486 = vmatmul.mubr.msk.bf16.vlgmr.msra.gmra.mrb[16].mxu1 %vm926_vm11, %v2034_v11 }
 0x9c5   : > { %2217 = vmatprep.mubr.bf16.mxu1 %v2618_v2  ;;  %v2170_v2 = vld [vmem:[%s3941_s12] sm:$0xff] }
 0x9ca   : > { %v2039_v35 = vpop.permute.xlu1 %2038 }
 0xa97   : > { %v2084_v30 = vpop.f32.mrb[16].mxu1 }
 0xa98   : > { %v2085_v36 = vadd.f32 %v2084_v30, %v2039_v35  ;;  %v2086_v48 = vpop.f32.mrb[17].mxu1 }
 0xa99   : > { %v2087_v0 = vadd.f32 %v2086_v48, %v2039_v35  ;;  %v2088_v49 = vpop.f32.mrb[18].mxu1 }
 0xa9a   : > { %v2091_v40 = vmax.f32 %v2085_v36, 0.0  ;;  %v2089_v50 = vpop.f32.mrb[19].mxu1 }
 0xa9b   : > { %v2092_v25 = vmax.f32 %v2087_v0, 0.0 }
 0xa9c   : > { %v3733_v41 = vadd.f32 %v2091_v40, %v3460_v42 }
 0xa9d   : > { %v2094_v53 = vadd.f32 %v2092_v25, %v3462_v43 }
 0xa9e   : > { %2095 = vrot.lane.b32.xlu0 %v3733_v41, %s2614_s22 }
 0xa9f   : > { %2097 = vrot.lane.b32.xlu1 %v2094_v53, %s2614_s22 }
 0xaa2   : > { %2103 = vrot.lane.b32.xlu0 %v3733_v41, %s2613_s21 }
 0xaa3   : > { %2105 = vrot.lane.b32.xlu1 %v2094_v53, %s2613_s21 }
 0xaa6   : > { %2111 = vrot.lane.b32.xlu0 %v3733_v41, %s2615_s2 }
 0xaa7   : > { %2113 = vrot.lane.b32.xlu1 %v2094_v53, %s2615_s2 }
 0xaaa   : > { %2119 = vrot.lane.b32.xlu0 %v3733_v41, %s3965_s20 }
 0xaab   : > { %2121 = vrot.lane.b32.xlu1 %v2094_v53, %s3965_s20 }
 0xaae   : > { %2127 = vrot.lane.b32.xlu0 %v3733_v41, %s3966_s23 }
 0xaaf   : > { %2129 = vrot.lane.b32.xlu1 %v2094_v53, %s3966_s23 }
 0xab2   : > { %2135 = vrot.lane.b32.xlu0 %v3733_v41, %s2619_s25 }
 0xab3   : > { %2137 = vrot.lane.b32.xlu1 %v2094_v53, %s2619_s25 }
 0xab6   : > { %2143 = vrot.lane.b32.xlu0 %v3733_v41, %s3963_s26 }
 0xab7   : > { %2145 = vrot.lane.b32.xlu1 %v2094_v53, %s3963_s26 }
 0xaba   : > { %2151 = vrot.lane.b32.xlu0 %v3733_v41, %s3964_s29 }
 0xabb   : > { %2153 = vrot.lane.b32.xlu1 %v2094_v53, %s3964_s29 }
 0xabe   : > { %2173 = vperm.xlu0 %2541, %v2170_v2  }
 0xb10   : > { %v2096_v42 = vpop.permute.xlu0 %2095 }
 0xb11   : > { %v2098_v43 = vpop.permute.xlu1 %2097 }
 0xb12   : > { %v2099_v32 = vsel %vm591_vm2, %v2096_v42, %v2098_v43  ;;  %v2100_v47 = vsel %vm591_vm2, %v2098_v43, %v2096_v42 }
 0xb13   : > { %v2101_v62 = vmul.f32 %v2100_v47, %v2813_v23  ;;  %v2102_v60 = vmul.f32 %v2099_v32, %v2816_v24 }
 0xb14   : > { %v2104_v54 = vpop.permute.xlu0 %2103 }
 0xb15   : > { %v2106_v56 = vpop.permute.xlu1 %2105 }
 0xb16   : > { %v2107_v59 = vsel %vm608_vm1, %v2104_v54, %v2106_v56  ;;  %v2108_v61 = vsel %vm608_vm1, %v2106_v56, %v2104_v54 }
 0xb17   : > { %v2109_v57 = vmul.f32 %v2108_v61, %v2806_v21  ;;  %v2110_v4 = vmul.f32 %v2107_v59, %v2809_v22 }
 0xb18   : > { %v2112_v58 = vpop.permute.xlu0 %2111 }
 0xb19   : > { %v2159_v55 = vpack.c.bf16 %v2109_v57, %v2101_v62  ;;  %v2114_v26 = vpop.permute.xlu1 %2113  ;;  %v2160_v46 = vpack.c.bf16 %v2110_v4, %v2102_v60 }
 0xb1a   : > { %v2115_v12 = vsel %vm625_vm3, %v2112_v58, %v2114_v26  ;;  %v2116_v7 = vsel %vm625_vm3, %v2114_v26, %v2112_v58  ;;  %v2169_v26 = vld [vmem:[%s3938_s9] sm:$0xf] }
 0xb1b   : > { %2185 = vmatprep.subr.bf16.mxu1 %v2160_v46  ;;  %v2117_v27 = vmul.f32 %v2116_v7, %v2828_v33  ;;  %v2118_v28 = vmul.f32 %v2115_v12, %v2831_v34 }
 0xb1c   : > { %2186 = vmatpush1.bf16.msra.mxu1 %v2159_v55  ;;  %v2120_v8 = vpop.permute.xlu0 %2119 }
 0xb1d   : > { %v2122_v13 = vpop.permute.xlu1 %2121 }
 0xb1e   : > { %v2123_v5 = vsel %vm642_vm0, %v2120_v8, %v2122_v13  ;;  %v2124_v20 = vsel %vm642_vm0, %v2122_v13, %v2120_v8 }
 0xb1f   : > { %v2125_v44 = vmul.f32 %v2124_v20, %v2794_v16  ;;  %v2126_v1 = vmul.f32 %v2123_v5, %v2797_v17 }
 0xb20   : > { %v2128_v10 = vpop.permute.xlu0 %2127 }
 0xb21   : > { %v2161_v37 = vpack.c.bf16 %v2125_v44, %v2117_v27  ;;  %v2130_v29 = vpop.permute.xlu1 %2129  ;;  %v2162_v38 = vpack.c.bf16 %v2126_v1, %v2118_v28 }
 0xb22   : > { %v2131_v39 = vsel %vm659_vm5, %v2128_v10, %v2130_v29  ;;  %v2132_v31 = vsel %vm659_vm5, %v2130_v29, %v2128_v10 }
 0xb23   : > { %v2133_v11 = vmul.f32 %v2131_v39, %v2849_v51  ;;  %v2134_v35 = vmul.f32 %v2132_v31, %v2852_v52  ;;  %2187 = vmatprep.subr.bf16.mxu1 %v2162_v38 }
 0xb24   : > { %2188 = vmatpush1.bf16.msra.mxu1 %v2161_v37  ;;  %v2136_v30 = vpop.permute.xlu0 %2135 }
 0xb25   : > { %v2163_v36 = vpack.c.bf16 %v2133_v11, %v3733_v41  ;;  %v2138_v48 = vpop.permute.xlu1 %2137  ;;  %v2164_v0 = vpack.c.bf16 %v2134_v35, %v2094_v53 }
 0xb26   : > { %v2139_v49 = vsel %vm676_vm7, %v2136_v30, %v2138_v48  ;;  %v2140_v40 = vsel %vm676_vm7, %v2138_v48, %v2136_v30 }
 0xb27   : > { %2189 = vmatprep.subr.bf16.mxu1 %v2164_v0  ;;  %v2141_v41 = vmul.f32 %v2139_v49, %v2880_v18  ;;  %v2142_v53 = vmul.f32 %v2140_v40, %v2883_v19 }
 0xb28   : > { %2190 = vmatpush1.bf16.msra.mxu1 %v2163_v36  ;;  %v2144_v50 = vpop.permute.xlu0 %2143 }
 0xb29   : > { %v2146_v25 = vpop.permute.xlu1 %2145 }
 0xb2a   : > { %v2147_v2 = vsel %vm693_vm6, %v2144_v50, %v2146_v25  ;;  %v2148_v42 = vsel %vm693_vm6, %v2146_v25, %v2144_v50 }
 0xb2b   : > { %v2149_v43 = vmul.f32 %v2147_v2, %v2864_v63  ;;  %v2150_v32 = vmul.f32 %v2148_v42, %v2867_v3 }
 0xb2c   : > { %v2152_v47 = vpop.permute.xlu0 %2151 }
 0xb2d   : > { %v2165_v54 = vpack.c.bf16 %v2149_v43, %v2141_v41  ;;  %v2154_v56 = vpop.permute.xlu1 %2153  ;;  %v2166_v59 = vpack.c.bf16 %v2150_v32, %v2142_v53 }
 0xb2e   : > { %v2155_v61 = vsel %vm710_vm8, %v2152_v47, %v2154_v56  ;;  %v2156_v62 = vsel %vm710_vm8, %v2154_v56, %v2152_v47 }
 0xb2f   : > { %v2157_v60 = vmul.f32 %v3435_v45, %v2155_v61  ;;  %v2158_v57 = vmul.f32 %v3441_v9, %v2156_v62  ;;  %2191 = vmatprep.subr.bf16.mxu1 %v2166_v59 }
 0xb30   : > { %2192 = vmatpush1.bf16.msra.mxu1 %v2165_v54 }
 0xb31   : > { %v2167_v4 = vpack.c.bf16 %v2157_v60, %v2157_v60  ;;  %v2168_v58 = vpack.c.bf16 %v2158_v57, %v2158_v57 }
 0xb33   : > { %2487 = vmatprep.subr.msk.bf16.mxu1 %vm747_vm4, %v2168_v58  ;;  %v2180_v55 = vsel %vm747_vm4, %v2167_v4, 0 }
 0xb34   : > { %2194 = vmatpush1.bf16.msra.mxu1 %v2180_v55 }
 0xb37   : > { %2488 = vmatmul.mubr.msk.bf16.vlgmr.msra.gmra.mrb[20].mxu1 %vm926_vm11, %v2169_v26 }
 0xb3d   : > { %v2174_v46 = vpop.permute.xlu0 %2173 }
 0xc0a   : > { %v2219_v12 = vpop.f32.mrb[20].mxu1 }
 0xc0b   : > { %v2220_v45 = vadd.f32 %v2219_v12, %v2174_v46  ;;  %v2221_v7 = vpop.f32.mrb[21].mxu1 }
 0xc0c   : > { %v2222_v9 = vadd.f32 %v2221_v7, %v2174_v46  ;;  %v2223_v8 = vpop.f32.mrb[22].mxu1 }
 0xc0d   : > { %v2226_v13 = vmax.f32 %v2220_v45, 0.0  ;;  %v2224_v5 = vpop.f32.mrb[23].mxu1 }
 0xc0e   : > { %v2227_v20 = vmax.f32 %v2222_v9, 0.0 }
 0xc0f   : > { %v3819_v27 = vadd.f32 %v2226_v13, %v3077_v14  ;;  %v2306_v14 = vld [vmem:[%s3940_s11] sm:$0xff] }
 0xc10   : > { %v3822_v28 = vadd.f32 %v2227_v20, %v3081_v15  ;;  %v2307_v15 = vld [vmem:[%s3940_s11 + $0x8] sm:$0xff] }
 0xc11   : > { %2230 = vrot.lane.b32.xlu1 %v3819_v27, %s2614_s22 }
 0xc12   : > { %2232 = vrot.lane.b32.xlu0 %v3822_v28, %s2614_s22  ;;  %s575_s22 = scalar_lea.vmem %s3947_s18, %s2495_s30 }
 0xc15   : > { %2238 = vrot.lane.b32.xlu1 %v3819_v27, %s2613_s21 }
 0xc16   : > { %2240 = vrot.lane.b32.xlu0 %v3822_v28, %s2613_s21 }
 0xc19   : > { %2246 = vrot.lane.b32.xlu1 %v3819_v27, %s2615_s2 }
 0xc1a   : > { %2248 = vrot.lane.b32.xlu0 %v3822_v28, %s2615_s2 }
 0xc1d   : > { %2254 = vrot.lane.b32.xlu1 %v3819_v27, %s3965_s20 }
 0xc1e   : > { %2256 = vrot.lane.b32.xlu0 %v3822_v28, %s3965_s20 }
 0xc21   : > { %2262 = vrot.lane.b32.xlu1 %v3819_v27, %s3966_s23 }
 0xc22   : > { %2264 = vrot.lane.b32.xlu0 %v3822_v28, %s3966_s23 }
 0xc25   : > { %2270 = vrot.lane.b32.xlu1 %v3819_v27, %s2619_s25 }
 0xc26   : > { %2272 = vrot.lane.b32.xlu0 %v3822_v28, %s2619_s25 }
 0xc29   : > { %2278 = vrot.lane.b32.xlu1 %v3819_v27, %s3963_s26 }
 0xc2a   : > { %2280 = vrot.lane.b32.xlu0 %v3822_v28, %s3963_s26 }
 0xc2d   : > { %2286 = vrot.lane.b32.xlu1 %v3819_v27, %s3964_s29 }
 0xc2e   : > { %2288 = vrot.lane.b32.xlu0 %v3822_v28, %s3964_s29 }
 0xc31   : > { %2310 = vperm.xlu1 %2542, %v2306_v14  }
 0xc32   : > { %2315 = vperm.xlu0 %2541, %v2307_v15  }
 0xc83   : > { %v2231_v44 = vpop.permute.xlu1 %2230 }
 0xc84   : > { %v2233_v1 = vpop.permute.xlu0 %2232 }
 0xc85   : > { %v2234_v10 = vsel %vm591_vm2, %v2231_v44, %v2233_v1  ;;  %v2235_v37 = vsel %vm591_vm2, %v2233_v1, %v2231_v44 }
 0xc86   : > { %v2236_v11 = vmul.f32 %v2235_v37, %v2813_v23  ;;  %v2237_v35 = vmul.f32 %v2234_v10, %v2816_v24 }
 0xc87   : > { %v2239_v29 = vpop.permute.xlu1 %2238 }
 0xc88   : > { %v2241_v38 = vpop.permute.xlu0 %2240 }
 0xc89   : > { %v2242_v39 = vsel %vm608_vm1, %v2239_v29, %v2241_v38  ;;  %v2243_v31 = vsel %vm608_vm1, %v2241_v38, %v2239_v29 }
 0xc8a   : > { %v2244_v30 = vmul.f32 %v2243_v31, %v2806_v21  ;;  %v2245_v36 = vmul.f32 %v2242_v39, %v2809_v22 }
 0xc8b   : > { %v2247_v48 = vpop.permute.xlu1 %2246 }
 0xc8c   : > { %v2294_v0 = vpack.c.bf16 %v2244_v30, %v2236_v11  ;;  %v2249_v49 = vpop.permute.xlu0 %2248  ;;  %v2295_v40 = vpack.c.bf16 %v2245_v36, %v2237_v35 }
 0xc8d   : > { %v2250_v50 = vsel %vm625_vm3, %v2247_v48, %v2249_v49  ;;  %v2251_v25 = vsel %vm625_vm3, %v2249_v49, %v2247_v48 }
 0xc8e   : > { %2332 = vmatprep.subr.bf16.mxu0 %v2295_v40  ;;  %v2252_v22 = vmul.f32 %v2251_v25, %v2828_v33  ;;  %v2253_v42 = vmul.f32 %v2250_v50, %v2831_v34 }
 0xc8f   : > { %2333 = vmatpush1.bf16.msra.mxu0 %v2294_v0  ;;  %v2255_v2 = vpop.permute.xlu1 %2254 }
 0xc90   : > { %v2257_v23 = vpop.permute.xlu0 %2256 }
 0xc91   : > { %v2258_v24 = vsel %vm642_vm0, %v2255_v2, %v2257_v23  ;;  %v2259_v21 = vsel %vm642_vm0, %v2257_v23, %v2255_v2 }
 0xc92   : > { %v2260_v41 = vmul.f32 %v2259_v21, %v2794_v16  ;;  %v2261_v53 = vmul.f32 %v2258_v24, %v2797_v17 }
 0xc93   : > { %v2263_v43 = vpop.permute.xlu1 %2262 }
 0xc94   : > { %v2296_v32 = vpack.c.bf16 %v2260_v41, %v2252_v22  ;;  %v2265_v47 = vpop.permute.xlu0 %2264  ;;  %v2297_v54 = vpack.c.bf16 %v2261_v53, %v2253_v42 }
 0xc95   : > { %v2266_v56 = vsel %vm659_vm5, %v2263_v43, %v2265_v47  ;;  %v2267_v59 = vsel %vm659_vm5, %v2265_v47, %v2263_v43 }
 0xc96   : > { %v2268_v61 = vmul.f32 %v2266_v56, %v2849_v51  ;;  %v2269_v33 = vmul.f32 %v2267_v59, %v2852_v52  ;;  %2334 = vmatprep.subr.bf16.mxu0 %v2297_v54 }
 0xc97   : > { %2335 = vmatpush1.bf16.msra.mxu0 %v2296_v32  ;;  %v2271_v34 = vpop.permute.xlu1 %2270 }
 0xc98   : > { %v2298_v16 = vpack.c.bf16 %v2268_v61, %v3819_v27  ;;  %v2273_v17 = vpop.permute.xlu0 %2272  ;;  %v2299_v62 = vpack.c.bf16 %v2269_v33, %v3822_v28 }
 0xc99   : > { %v2274_v60 = vsel %vm676_vm7, %v2271_v34, %v2273_v17  ;;  %v2275_v57 = vsel %vm676_vm7, %v2273_v17, %v2271_v34 }
 0xc9a   : > { %2336 = vmatprep.subr.bf16.mxu0 %v2299_v62  ;;  %v2276_v55 = vmul.f32 %v2274_v60, %v2880_v18  ;;  %v2277_v26 = vmul.f32 %v2275_v57, %v2883_v19  ;;  %v2602_v18 = vld [vmem:[%s3961_s1 + $0x10] ss:$0 sm:$0xff] }
 0xc9b   : > { %2337 = vmatpush1.bf16.msra.mxu0 %v2298_v16  ;;  %v2279_v4 = vpop.permute.xlu1 %2278 }
 0xc9c   : > { %v2281_v51 = vpop.permute.xlu0 %2280 }
 0xc9d   : > { %v2282_v52 = vsel %vm693_vm6, %v2279_v4, %v2281_v51  ;;  %v2283_v58 = vsel %vm693_vm6, %v2281_v51, %v2279_v4 }
 0xc9e   : > { %v2284_v46 = vmul.f32 %v2282_v52, %v2864_v63  ;;  %v2285_v12 = vmul.f32 %v2283_v58, %v2867_v3  ;;  %v2603_v63 = vld [vmem:[%s3961_s1 + $0x18] ss:$0 sm:$0xff] }
 0xc9f   : > { %v2287_v45 = vpop.permute.xlu1 %2286 }
 0xca0   : > { %v2300_v7 = vpack.c.bf16 %v2284_v46, %v2276_v55  ;;  %v2289_v9 = vpop.permute.xlu0 %2288  ;;  %v2301_v8 = vpack.c.bf16 %v2285_v12, %v2277_v26 }
 0xca1   : > { %v2290_v13 = vsel %vm710_vm8, %v2287_v45, %v2289_v9  ;;  %v2291_v5 = vsel %vm710_vm8, %v2289_v9, %v2287_v45 }
 0xca2   : > { %v2292_v19 = vmul.f32 %v2602_v18, %v2290_v13  ;;  %v2293_v3 = vmul.f32 %v2603_v63, %v2291_v5  ;;  %2338 = vmatprep.subr.bf16.mxu0 %v2301_v8 }
 0xca3   : > { %2339 = vmatpush1.bf16.msra.mxu0 %v2300_v7 }
 0xca4   : > { %v2302_v20 = vpack.c.bf16 %v2292_v19, %v2292_v19  ;;  %v2303_v27 = vpack.c.bf16 %v2293_v3, %v2293_v3 }
 0xca6   : > { %2490 = vmatprep.subr.msk.bf16.mxu0 %vm747_vm4, %v2303_v27  ;;  %v2327_v28 = vsel %vm747_vm4, %v2302_v20, 0 }
 0xca7   : > { %2341 = vmatpush1.bf16.msra.mxu0 %v2327_v28 }
 0xcaa   : > { %2491 = vmatmul.mubr.msk.bf16.vlgmr.msra.gmra.mrb[20].mxu0 %vm926_vm11, %v2547_v6 }
 0xcb0   : > { %v2311_v14 = vpop.permute.xlu1 %2310 }
 0xcb1   : > { %v2316_v10 = vpop.permute.xlu0 %2315 }
 0xd7d   : > { %v2366_v15 = vpop.f32.mrb[20].mxu0 }
 0xd7e   : > { %v2367_v44 = vadd.f32 %v2366_v15, %v2311_v14  ;;  %v2368_v1 = vpop.f32.mrb[21].mxu0 }
 0xd7f   : > { %v2369_v37 = vadd.f32 %v2368_v1, %v2311_v14  ;;  %v2370_v29 = vpop.f32.mrb[22].mxu0 }
 0xd80   : > { %v2375_v38 = vmax.f32 %v2367_v44, 0.0  ;;  %v2371_v39 = vadd.f32 %v2370_v29, %v2316_v10  ;;  %v2372_v31 = vpop.f32.mrb[23].mxu0 }
 0xd81   : > { %v2376_v11 = vmax.f32 %v2369_v37, 0.0  ;;  %v2373_v35 = vadd.f32 %v2372_v31, %v2316_v10 }
 0xd82   : > { %2379 = vst [vmem:[%s575_s22] sm:$0xff] %v2375_v38  ;;  %v2377_v30 = vmax.f32 %v2371_v39, 0.0 }
 0xd83   : > { %2380 = vst [vmem:[%s575_s22 + $0x8] sm:$0xff] %v2376_v11  ;;  %v2378_v36 = vmax.f32 %v2373_v35, 0.0 }
 0xd84   : > { %2381 = vst [vmem:[%s575_s22 + $0x10] sm:$0xff] %v2377_v30 }
 0xd85   : > { %2382 = vst [vmem:[%s575_s22 + $0x18] sm:$0xff] %v2378_v36 }
 0xd86 PF: > { %s28_s27 = sadd.s32 1, %s2610_s27  }
 0xd87   : > { %p25_p4 = scmp.ge.s32.totalorder %s28_s27, 4  }
 0xd89   :  { %27 = sbr.rel (!%p25_p4) target bundleno = 4 (0x4), region = 122 }

</bundles_post_ra>
